<compile_context>
chip_gen: v6e
topology: v6e:2x2x1
jax: 0.10.0
libtpu: 0.0.40
codegen_flags: <defaults>
</compile_context>

<pallas_src>
import numpy as np
import jax
import jax.numpy as jnp
from jax.experimental import pallas as pl
from jax.experimental.pallas import tpu as pltpu

PE_FREQS = 6                       # get_embedder(multires=6)
PE_DIM = 3 + 3 * 2 * PE_FREQS      # 39 rows: [x, sin(2^k x), cos(2^k x)] k=0..5
MATERIAL_DIMS = (128, 128)         # disentangle_network_params['material_mlp_dims']
LIGHT_DIMS = (64, 64)              # disentangle_network_params['light_mlp_dims']
MATERIAL_OUT = 6                   # material_mlp_ch
NORMAL_THRESHOLD = 0.1             # nvdiffrec bend-normal threshold
OUT_CH = 10                        # color(3) | material(6) | light(1)


def _dot3(a, b):
    """Channel-major (3, T) dot product along the channel (sublane) axis -> (1, T)."""
    return a[0:1, :] * b[0:1, :] + a[1:2, :] * b[1:2, :] + a[2:3, :] * b[2:3, :]


def _safe_normalize_cm(x):
    # matches nvdiffrec util.safe_normalize: x / sqrt(clamp(dot(x,x), min=1e-20))
    return x * jax.lax.rsqrt(jnp.maximum(_dot3(x, x), 1e-20))


def _shader_kernel(uv_ref, pos_ref, vdir_ref, vn_ref, fn_ref,
                   w0_ref, b0_ref, w1_ref, b1_ref, w2_ref, b2_ref,
                   lw0_ref, lb0_ref, lw1_ref, lb1_ref, lw2_ref, lb2_ref,
                   out_ref, pe_s, lin_s):
    f32 = jnp.float32
    bf16 = jnp.bfloat16

    uv = uv_ref[...]       # (3, T) channel-major, T pixels on the lane axis
    pos = pos_ref[...]
    vdir = vdir_ref[...]
    vn = vn_ref[...]
    fn = fn_ref[...]

    # ---- NeRF positional encoding (channel-major, VPU/EUP only, angles in f32) ----
    # pe rows: [uv | sin(2^0 uv) | cos(2^0 uv) | ... | sin(2^5 uv) | cos(2^5 uv)]
    pe_s[0:3, :] = uv
    for k in range(PE_FREQS):
        ang = uv * (2.0 ** k)                       # f32: high-freq rows are rounding-sensitive
        base = 3 + 6 * k
        pe_s[base:base + 3, :] = jnp.sin(ang)
        pe_s[base + 3:base + 6, :] = jnp.cos(ang)
    pe = pe_s[...].astype(bf16)                     # (39, T)

    # ---- material MLP (bf16 MXU, f32 acc): 39 -> 128 -> 128 -> 6, lane axis = pixels ----
    h = jnp.maximum(jnp.dot(w0_ref[...], pe,
                            preferred_element_type=f32) + b0_ref[...], 0.0)
    h = jnp.maximum(jnp.dot(w1_ref[...], h.astype(bf16),
                            preferred_element_type=f32) + b1_ref[...], 0.0)
    material = jnp.dot(w2_ref[...], h.astype(bf16),
                       preferred_element_type=f32) + b2_ref[...]          # (6, T)

    # ---- shading normals (prepare_shading_normal, perturbed=(0,0,1), two-sided, opengl) ----
    shading_nrm = _safe_normalize_cm(vn)   # tangent/bitangent terms cancel for perturbed=(0,0,1)
    view_vec = _safe_normalize_cm(vdir - pos)
    front = _dot3(fn, view_vec) > 0.0                                     # (1, T)
    shading_nrm = jnp.where(front, shading_nrm, -shading_nrm)
    geom_nrm = jnp.where(front, fn, -fn)
    t = jnp.clip(_dot3(view_vec, shading_nrm) * (1.0 / NORMAL_THRESHOLD), 0.0, 1.0)
    normal_bend = geom_nrm + t * (shading_nrm - geom_nrm)
    # TODO(synk): dr.antialias(normal, rast, clip_verts, tris) needs nvdiffrast rasterizer
    # coverage data; no Pallas equivalent — treated as identity here.

    # ---- reflection vector: reflect(wo, n) = 2*dot(wo, n)*n - wo ----
    refl = _safe_normalize_cm(
        2.0 * _dot3(view_vec, normal_bend) * normal_bend - view_vec)

    # ---- light MLP on cat([uv, reflvec]) with a single merged K=6 first layer ----
    lin_s[0:3, :] = uv
    lin_s[3:6, :] = refl
    lin = lin_s[...].astype(bf16)                                         # (6, T)
    lh = jnp.maximum(jnp.dot(lw0_ref[...], lin,
                             preferred_element_type=f32) + lb0_ref[...], 0.0)
    lh = jnp.maximum(jnp.dot(lw1_ref[...], lh.astype(bf16),
                             preferred_element_type=f32) + lb1_ref[...], 0.0)
    light = jnp.dot(lw2_ref[...], lh.astype(bf16),
                    preferred_element_type=f32) + lb2_ref[...]            # (1, T)

    # ---- combine & lane-dense stores: rows [color | material | light] ----
    out_ref[0:3, :] = material[0:3, :] + light * material[3:6, :]
    out_ref[3:9, :] = material
    out_ref[9:10, :] = light


def init_params(key):
    """Deterministic synthetic parameters (PyTorch Linear-style uniform init)."""
    def linear(k, fan_in, fan_out):
        kw, kb = jax.random.split(k)
        bound = 1.0 / np.sqrt(fan_in)
        W = jax.random.uniform(kw, (fan_in, fan_out), jnp.float32, -bound, bound)
        b = jax.random.uniform(kb, (1, fan_out), jnp.float32, -bound, bound)
        return W, b

    ks = jax.random.split(key, 6)
    w0, b0 = linear(ks[0], PE_DIM, MATERIAL_DIMS[0])
    w1, b1 = linear(ks[1], MATERIAL_DIMS[0], MATERIAL_DIMS[1])
    w2, b2 = linear(ks[2], MATERIAL_DIMS[1], MATERIAL_OUT)
    lw0, lb0 = linear(ks[3], 6, LIGHT_DIMS[0])
    lw1, lb1 = linear(ks[4], LIGHT_DIMS[0], LIGHT_DIMS[1])
    lw2, lb2 = linear(ks[5], LIGHT_DIMS[1], 1)
    return {
        'material': [(w0, b0), (w1, b1), (w2, b2)],
        'light': [(lw0, lb0), (lw1, lb1), (lw2, lb2)],
    }


def neural_shader_forward(params, position, gbuffer, view_direction,
                          deformed_position, tile_rows=4096):
    bz, h, w, _ = position.shape
    N = bz * h * w
    f32 = jnp.float32
    bf16 = jnp.bfloat16

    # Channel-major (3, N) per-pixel streams (layout plumbing done once in XLA).
    def cm(x):
        return x.reshape(N, 3).T.astype(f32)

    uv = cm(gbuffer['uv_coordinates'])
    pos = cm(deformed_position)
    vdir = cm(jnp.broadcast_to(view_direction[:, None, None, :], (bz, h, w, 3)))
    vn = cm(gbuffer['vertex_normals'])
    fn = cm(gbuffer['face_normals'])

    # Pixel tile: multiple of 128 lanes; prefer >=2 grid steps (v7x has 2 TensorCores).
    n128 = ((N + 127) // 128) * 128
    tile_rows = max(128, (tile_rows // 128) * 128)
    if n128 >= 256:
        tile_rows = min(tile_rows, max(128, ((n128 // 2) // 128) * 128))
    else:
        tile_rows = 128
    Np = ((N + tile_rows - 1) // tile_rows) * tile_rows

    def pad_lanes(x):
        return jnp.pad(x, ((0, 0), (0, Np - N))) if Np != N else x

    streams = [pad_lanes(x) for x in (uv, pos, vdir, vn, fn)]

    (w0, b0), (w1, b1), (w2, b2) = params['material']
    (lw0, lb0), (lw1, lb1), (lw2, lb2) = params['light']

    # Transposed weights (out, in) in bf16 (f32 accumulation in-kernel);
    # biases as (out, 1) f32 columns.  All stay VMEM-resident (index_map -> (0,0)).
    consts = (w0.T.astype(bf16), b0.T, w1.T.astype(bf16), b1.T, w2.T.astype(bf16), b2.T,
              lw0.T.astype(bf16), lb0.T, lw1.T.astype(bf16), lb1.T, lw2.T.astype(bf16), lb2.T)

    stream_spec = pl.BlockSpec((3, tile_rows), lambda i: (0, i))
    out_spec = pl.BlockSpec((OUT_CH, tile_rows), lambda i: (0, i))

    def resident(a):
        return pl.BlockSpec(a.shape, lambda i: (0, 0))

    out = pl.pallas_call(
        _shader_kernel,
        out_shape=jax.ShapeDtypeStruct((OUT_CH, Np), f32),
        grid=(Np // tile_rows,),
        in_specs=[stream_spec] * 5 + [resident(a) for a in consts],
        out_specs=out_spec,
        scratch_shapes=[pltpu.VMEM((PE_DIM, tile_rows), f32),   # PE assembly
                        pltpu.VMEM((6, tile_rows), f32)],       # [uv | reflvec] assembly
        compiler_params=pltpu.CompilerParams(
            dimension_semantics=("parallel",),
            vmem_limit_bytes=48 * 1024 * 1024),
    )(*streams, *consts)

    color = out[0:3, :N].T
    material = out[3:9, :N].T
    light = out[9:10, :N].T
    return color, material, light


def ref_forward(params, position, gbuffer, view_direction, deformed_position):
    """Pure-JAX reference mirroring NeuralShader.forward (positional-encoding branch)."""
    bz, h, w, _ = position.shape
    N = bz * h * w

    def nrm_rm(x):
        return x * jax.lax.rsqrt(jnp.maximum(jnp.sum(x * x, axis=-1, keepdims=True), 1e-20))

    uv = gbuffer['uv_coordinates'].reshape(N, 3)
    pos = deformed_position.reshape(N, 3)
    vdir = jnp.broadcast_to(view_direction[:, None, None, :], (bz, h, w, 3)).reshape(N, 3)
    vn = gbuffer['vertex_normals'].reshape(N, 3)
    fn = gbuffer['face_normals'].reshape(N, 3)

    outs = [uv]
    for k in range(PE_FREQS):
        f = 2.0 ** k
        outs += [jnp.sin(uv * f), jnp.cos(uv * f)]
    pe = jnp.concatenate(outs, axis=-1)

    (w0, b0), (w1, b1), (w2, b2) = params['material']
    hh = jnp.maximum(pe @ w0 + b0, 0.0)
    hh = jnp.maximum(hh @ w1 + b1, 0.0)
    material = hh @ w2 + b2

    sn = nrm_rm(vn)
    vv = nrm_rm(vdir - pos)
    front = jnp.sum(fn * vv, -1, keepdims=True) > 0.0
    sn = jnp.where(front, sn, -sn)
    gn = jnp.where(front, fn, -fn)
    t = jnp.clip(jnp.sum(vv * sn, -1, keepdims=True) / NORMAL_THRESHOLD, 0.0, 1.0)
    nb = gn + t * (sn - gn)
    refl = nrm_rm(2.0 * jnp.sum(vv * nb, -1, keepdims=True) * nb - vv)

    (lw0, lb0), (lw1, lb1), (lw2, lb2) = params['light']
    lin = jnp.concatenate([uv, refl], axis=-1)
    lh = jnp.maximum(lin @ lw0 + lb0, 0.0)
    lh = jnp.maximum(lh @ lw1 + lb1, 0.0)
    light = lh @ lw2 + lb2

    color = material[:, :3] + light * material[:, 3:6]
    return color, material, light


if __name__ == "__main__":
    key = jax.random.PRNGKey(0)
    k = jax.random.split(key, 8)
    bz, h, w = 2, 16, 16

    def unit(x):
        return x / jnp.linalg.norm(x, axis=-1, keepdims=True)

    position = jax.random.normal(k[0], (bz, h, w, 3), jnp.float32)           # canonical_position
    deformed_position = 0.5 * jax.random.normal(k[1], (bz, h, w, 3), jnp.float32)
    view_direction = jax.random.normal(k[2], (bz, 3), jnp.float32)
    gbuffer = {
        'uv_coordinates': jax.random.uniform(k[3], (bz, h, w, 3), jnp.float32),
        'vertex_normals': unit(jax.random.normal(k[4], (bz, h, w, 3), jnp.float32)),
        'face_normals': unit(jax.random.normal(k[5], (bz, h, w, 3), jnp.float32)),
        # tangent_normals mathematically cancel (perturbed normal = (0,0,1)); kept for interface parity
        'tangent_normals': unit(jax.random.normal(k[6], (bz, h, w, 3), jnp.float32)),
    }
    params = init_params(k[7])

    color, material, light = neural_shader_forward(
        params, position, gbuffer, view_direction, deformed_position)
    jax.block_until_ready((color, material, light))

    c_ref, m_ref, l_ref = ref_forward(params, position, gbuffer, view_direction, deformed_position)
    err = max(float(jnp.max(jnp.abs(color - c_ref))),
              float(jnp.max(jnp.abs(material - m_ref))),
              float(jnp.max(jnp.abs(light - l_ref))))
    assert err < 5e-2, f"max abs err vs reference: {err}"
    print("KERNEL_OK")
</pallas_src>

<mosaic_0001>
module attributes {stable_mosaic.version = 11 : i64} {
  func.func @_shader_kernel(%arg0: i32, %arg1: memref<3x256xf32, #tpu.memory_space<vmem>>, %arg2: memref<3x256xf32, #tpu.memory_space<vmem>>, %arg3: memref<3x256xf32, #tpu.memory_space<vmem>>, %arg4: memref<3x256xf32, #tpu.memory_space<vmem>>, %arg5: memref<3x256xf32, #tpu.memory_space<vmem>>, %arg6: memref<128x39xbf16, #tpu.memory_space<vmem>>, %arg7: memref<128x1xf32, #tpu.memory_space<vmem>>, %arg8: memref<128x128xbf16, #tpu.memory_space<vmem>>, %arg9: memref<128x1xf32, #tpu.memory_space<vmem>>, %arg10: memref<6x128xbf16, #tpu.memory_space<vmem>>, %arg11: memref<6x1xf32, #tpu.memory_space<vmem>>, %arg12: memref<64x6xbf16, #tpu.memory_space<vmem>>, %arg13: memref<64x1xf32, #tpu.memory_space<vmem>>, %arg14: memref<64x64xbf16, #tpu.memory_space<vmem>>, %arg15: memref<64x1xf32, #tpu.memory_space<vmem>>, %arg16: memref<1x64xbf16, #tpu.memory_space<vmem>>, %arg17: memref<1x1xf32, #tpu.memory_space<vmem>>, %arg18: memref<10x256xf32, #tpu.memory_space<vmem>>, %arg19: memref<39x256xf32, #tpu.memory_space<vmem>>, %arg20: memref<6x256xf32, #tpu.memory_space<vmem>>) attributes {dimension_semantics = [#tpu.dimension_semantics<parallel>], iteration_bounds = array<i64: 2>, scalar_prefetch = 0 : i64, scratch_operands = 2 : i64, tpu.core_type = #tpu.core_type<tc>, window_params = [{transform_indices = @transform_0, window_bounds = array<i64: 3, 256>}, {transform_indices = @transform_1, window_bounds = array<i64: 3, 256>}, {transform_indices = @transform_2, window_bounds = array<i64: 3, 256>}, {transform_indices = @transform_3, window_bounds = array<i64: 3, 256>}, {transform_indices = @transform_4, window_bounds = array<i64: 3, 256>}, {pipeline_mode = #tpu.pipeline_mode<synchronous>, transform_indices = @transform_5, window_bounds = array<i64: 128, 39>}, {pipeline_mode = #tpu.pipeline_mode<synchronous>, transform_indices = @transform_6, window_bounds = array<i64: 128, 1>}, {pipeline_mode = #tpu.pipeline_mode<synchronous>, transform_indices = @transform_7, window_bounds = array<i64: 128, 128>}, {pipeline_mode = #tpu.pipeline_mode<synchronous>, transform_indices = @transform_8, window_bounds = array<i64: 128, 1>}, {pipeline_mode = #tpu.pipeline_mode<synchronous>, transform_indices = @transform_9, window_bounds = array<i64: 6, 128>}, {pipeline_mode = #tpu.pipeline_mode<synchronous>, transform_indices = @transform_10, window_bounds = array<i64: 6, 1>}, {pipeline_mode = #tpu.pipeline_mode<synchronous>, transform_indices = @transform_11, window_bounds = array<i64: 64, 6>}, {pipeline_mode = #tpu.pipeline_mode<synchronous>, transform_indices = @transform_12, window_bounds = array<i64: 64, 1>}, {pipeline_mode = #tpu.pipeline_mode<synchronous>, transform_indices = @transform_13, window_bounds = array<i64: 64, 64>}, {pipeline_mode = #tpu.pipeline_mode<synchronous>, transform_indices = @transform_14, window_bounds = array<i64: 64, 1>}, {pipeline_mode = #tpu.pipeline_mode<synchronous>, transform_indices = @transform_15, window_bounds = array<i64: 1, 64>}, {pipeline_mode = #tpu.pipeline_mode<synchronous>, transform_indices = @transform_16, window_bounds = array<i64: 1, 1>}, {transform_indices = @transform_17, window_bounds = array<i64: 10, 256>}]} {
    %c0 = arith.constant 0 : index
    %c0_0 = arith.constant 0 : index
    %0 = vector.load %arg1[%c0, %c0_0] : memref<3x256xf32, #tpu.memory_space<vmem>>, vector<3x256xf32>
    %c0_1 = arith.constant 0 : index
    %c0_2 = arith.constant 0 : index
    %1 = vector.load %arg2[%c0_1, %c0_2] : memref<3x256xf32, #tpu.memory_space<vmem>>, vector<3x256xf32>
    %c0_3 = arith.constant 0 : index
    %c0_4 = arith.constant 0 : index
    %2 = vector.load %arg3[%c0_3, %c0_4] : memref<3x256xf32, #tpu.memory_space<vmem>>, vector<3x256xf32>
    %c0_5 = arith.constant 0 : index
    %c0_6 = arith.constant 0 : index
    %3 = vector.load %arg4[%c0_5, %c0_6] : memref<3x256xf32, #tpu.memory_space<vmem>>, vector<3x256xf32>
    %c0_7 = arith.constant 0 : index
    %c0_8 = arith.constant 0 : index
    %4 = vector.load %arg5[%c0_7, %c0_8] : memref<3x256xf32, #tpu.memory_space<vmem>>, vector<3x256xf32>
    %c0_9 = arith.constant 0 : index
    %c0_10 = arith.constant 0 : index
    %5 = vector.load %arg19[%c0_9, %c0_10] : memref<39x256xf32, #tpu.memory_space<vmem>>, vector<3x256xf32>
    tpu.vector_store %arg19[%c0_9, %c0_10], %0 {strides = array<i32>} : memref<39x256xf32, #tpu.memory_space<vmem>>, vector<3x256xf32>,
    %cst = arith.constant 1.000000e+00 : f32
    %6 = vector.broadcast %cst : f32 to vector<3x256xf32>
    %7 = arith.mulf %0, %6 : vector<3x256xf32>
    %8 = math.sin %7 : vector<3x256xf32>
    %c3 = arith.constant 3 : index
    %c0_11 = arith.constant 0 : index
    %9 = vector.load %arg19[%c3, %c0_11] : memref<39x256xf32, #tpu.memory_space<vmem>>, vector<3x256xf32>
    tpu.vector_store %arg19[%c3, %c0_11], %8 {strides = array<i32>} : memref<39x256xf32, #tpu.memory_space<vmem>>, vector<3x256xf32>,
    %10 = math.cos %7 : vector<3x256xf32>
    %c6 = arith.constant 6 : index
    %c0_12 = arith.constant 0 : index
    %11 = vector.load %arg19[%c6, %c0_12] : memref<39x256xf32, #tpu.memory_space<vmem>>, vector<3x256xf32>
    tpu.vector_store %arg19[%c6, %c0_12], %10 {strides = array<i32>} : memref<39x256xf32, #tpu.memory_space<vmem>>, vector<3x256xf32>,
    %cst_13 = arith.constant 2.000000e+00 : f32
    %12 = vector.broadcast %cst_13 : f32 to vector<3x256xf32>
    %13 = arith.mulf %0, %12 : vector<3x256xf32>
    %14 = math.sin %13 : vector<3x256xf32>
    %c9 = arith.constant 9 : index
    %c0_14 = arith.constant 0 : index
    %15 = vector.load %arg19[%c9, %c0_14] : memref<39x256xf32, #tpu.memory_space<vmem>>, vector<3x256xf32>
    tpu.vector_store %arg19[%c9, %c0_14], %14 {strides = array<i32>} : memref<39x256xf32, #tpu.memory_space<vmem>>, vector<3x256xf32>,
    %16 = math.cos %13 : vector<3x256xf32>
    %c12 = arith.constant 12 : index
    %c0_15 = arith.constant 0 : index
    %17 = vector.load %arg19[%c12, %c0_15] : memref<39x256xf32, #tpu.memory_space<vmem>>, vector<3x256xf32>
    tpu.vector_store %arg19[%c12, %c0_15], %16 {strides = array<i32>} : memref<39x256xf32, #tpu.memory_space<vmem>>, vector<3x256xf32>,
    %cst_16 = arith.constant 4.000000e+00 : f32
    %18 = vector.broadcast %cst_16 : f32 to vector<3x256xf32>
    %19 = arith.mulf %0, %18 : vector<3x256xf32>
    %20 = math.sin %19 : vector<3x256xf32>
    %c15 = arith.constant 15 : index
    %c0_17 = arith.constant 0 : index
    %21 = vector.load %arg19[%c15, %c0_17] : memref<39x256xf32, #tpu.memory_space<vmem>>, vector<3x256xf32>
    tpu.vector_store %arg19[%c15, %c0_17], %20 {strides = array<i32>} : memref<39x256xf32, #tpu.memory_space<vmem>>, vector<3x256xf32>,
    %22 = math.cos %19 : vector<3x256xf32>
    %c18 = arith.constant 18 : index
    %c0_18 = arith.constant 0 : index
    %23 = vector.load %arg19[%c18, %c0_18] : memref<39x256xf32, #tpu.memory_space<vmem>>, vector<3x256xf32>
    tpu.vector_store %arg19[%c18, %c0_18], %22 {strides = array<i32>} : memref<39x256xf32, #tpu.memory_space<vmem>>, vector<3x256xf32>,
    %cst_19 = arith.constant 8.000000e+00 : f32
    %24 = vector.broadcast %cst_19 : f32 to vector<3x256xf32>
    %25 = arith.mulf %0, %24 : vector<3x256xf32>
    %26 = math.sin %25 : vector<3x256xf32>
    %c21 = arith.constant 21 : index
    %c0_20 = arith.constant 0 : index
    %27 = vector.load %arg19[%c21, %c0_20] : memref<39x256xf32, #tpu.memory_space<vmem>>, vector<3x256xf32>
    tpu.vector_store %arg19[%c21, %c0_20], %26 {strides = array<i32>} : memref<39x256xf32, #tpu.memory_space<vmem>>, vector<3x256xf32>,
    %28 = math.cos %25 : vector<3x256xf32>
    %c24 = arith.constant 24 : index
    %c0_21 = arith.constant 0 : index
    %29 = vector.load %arg19[%c24, %c0_21] : memref<39x256xf32, #tpu.memory_space<vmem>>, vector<3x256xf32>
    tpu.vector_store %arg19[%c24, %c0_21], %28 {strides = array<i32>} : memref<39x256xf32, #tpu.memory_space<vmem>>, vector<3x256xf32>,
    %cst_22 = arith.constant 1.600000e+01 : f32
    %30 = vector.broadcast %cst_22 : f32 to vector<3x256xf32>
    %31 = arith.mulf %0, %30 : vector<3x256xf32>
    %32 = math.sin %31 : vector<3x256xf32>
    %c27 = arith.constant 27 : index
    %c0_23 = arith.constant 0 : index
    %33 = vector.load %arg19[%c27, %c0_23] : memref<39x256xf32, #tpu.memory_space<vmem>>, vector<3x256xf32>
    tpu.vector_store %arg19[%c27, %c0_23], %32 {strides = array<i32>} : memref<39x256xf32, #tpu.memory_space<vmem>>, vector<3x256xf32>,
    %34 = math.cos %31 : vector<3x256xf32>
    %c30 = arith.constant 30 : index
    %c0_24 = arith.constant 0 : index
    %35 = vector.load %arg19[%c30, %c0_24] : memref<39x256xf32, #tpu.memory_space<vmem>>, vector<3x256xf32>
    tpu.vector_store %arg19[%c30, %c0_24], %34 {strides = array<i32>} : memref<39x256xf32, #tpu.memory_space<vmem>>, vector<3x256xf32>,
    %cst_25 = arith.constant 3.200000e+01 : f32
    %36 = vector.broadcast %cst_25 : f32 to vector<3x256xf32>
    %37 = arith.mulf %0, %36 : vector<3x256xf32>
    %38 = math.sin %37 : vector<3x256xf32>
    %c33 = arith.constant 33 : index
    %c0_26 = arith.constant 0 : index
    %39 = vector.load %arg19[%c33, %c0_26] : memref<39x256xf32, #tpu.memory_space<vmem>>, vector<3x256xf32>
    tpu.vector_store %arg19[%c33, %c0_26], %38 {strides = array<i32>} : memref<39x256xf32, #tpu.memory_space<vmem>>, vector<3x256xf32>,
    %40 = math.cos %37 : vector<3x256xf32>
    %c36 = arith.constant 36 : index
    %c0_27 = arith.constant 0 : index
    %41 = vector.load %arg19[%c36, %c0_27] : memref<39x256xf32, #tpu.memory_space<vmem>>, vector<3x256xf32>
    tpu.vector_store %arg19[%c36, %c0_27], %40 {strides = array<i32>} : memref<39x256xf32, #tpu.memory_space<vmem>>, vector<3x256xf32>,
    %c0_28 = arith.constant 0 : index
    %c0_29 = arith.constant 0 : index
    %42 = vector.load %arg19[%c0_28, %c0_29] : memref<39x256xf32, #tpu.memory_space<vmem>>, vector<39x256xf32>
    %43 = arith.truncf %42 : vector<39x256xf32> to vector<39x256xbf16>
    %c0_30 = arith.constant 0 : index
    %c0_31 = arith.constant 0 : index
    %44 = vector.load %arg6[%c0_30, %c0_31] : memref<128x39xbf16, #tpu.memory_space<vmem>>, vector<128x39xbf16>
    %cst_32 = arith.constant dense<0.000000e+00> : vector<128x256xf32>
    %45 = tpu.matmul %44, %43, %cst_32 {dimension_numbers = #tpu.dot_dimension_numbers<[1], [0], [0], [1], [0, 0, 1, 1], [], []>} : vector<128x39xbf16>, vector<39x256xbf16>, vector<128x256xf32> -> vector<128x256xf32>
    %c0_33 = arith.constant 0 : index
    %c0_34 = arith.constant 0 : index
    %46 = vector.load %arg7[%c0_33, %c0_34] : memref<128x1xf32, #tpu.memory_space<vmem>>, vector<128x1xf32>
    %47 = vector.broadcast %46 : vector<128x1xf32> to vector<128x256xf32>
    %48 = arith.addf %45, %47 : vector<128x256xf32>
    %cst_35 = arith.constant 0.000000e+00 : f32
    %49 = vector.broadcast %cst_35 : f32 to vector<128x256xf32>
    %50 = arith.maximumf %48, %49 : vector<128x256xf32>
    %c0_36 = arith.constant 0 : index
    %c0_37 = arith.constant 0 : index
    %51 = vector.load %arg8[%c0_36, %c0_37] : memref<128x128xbf16, #tpu.memory_space<vmem>>, vector<128x128xbf16>
    %52 = arith.truncf %50 : vector<128x256xf32> to vector<128x256xbf16>
    %cst_38 = arith.constant dense<0.000000e+00> : vector<128x256xf32>
    %53 = tpu.matmul %51, %52, %cst_38 {dimension_numbers = #tpu.dot_dimension_numbers<[1], [0], [0], [1], [0, 0, 1, 1], [], []>} : vector<128x128xbf16>, vector<128x256xbf16>, vector<128x256xf32> -> vector<128x256xf32>
    %c0_39 = arith.constant 0 : index
    %c0_40 = arith.constant 0 : index
    %54 = vector.load %arg9[%c0_39, %c0_40] : memref<128x1xf32, #tpu.memory_space<vmem>>, vector<128x1xf32>
    %55 = vector.broadcast %54 : vector<128x1xf32> to vector<128x256xf32>
    %56 = arith.addf %53, %55 : vector<128x256xf32>
    %cst_41 = arith.constant 0.000000e+00 : f32
    %57 = vector.broadcast %cst_41 : f32 to vector<128x256xf32>
    %58 = arith.maximumf %56, %57 : vector<128x256xf32>
    %c0_42 = arith.constant 0 : index
    %c0_43 = arith.constant 0 : index
    %59 = vector.load %arg10[%c0_42, %c0_43] : memref<6x128xbf16, #tpu.memory_space<vmem>>, vector<6x128xbf16>
    %60 = arith.truncf %58 : vector<128x256xf32> to vector<128x256xbf16>
    %cst_44 = arith.constant dense<0.000000e+00> : vector<6x256xf32>
    %61 = tpu.matmul %59, %60, %cst_44 {dimension_numbers = #tpu.dot_dimension_numbers<[1], [0], [0], [1], [0, 0, 1, 1], [], []>} : vector<6x128xbf16>, vector<128x256xbf16>, vector<6x256xf32> -> vector<6x256xf32>
    %c0_45 = arith.constant 0 : index
    %c0_46 = arith.constant 0 : index
    %62 = vector.load %arg11[%c0_45, %c0_46] : memref<6x1xf32, #tpu.memory_space<vmem>>, vector<6x1xf32>
    %63 = vector.broadcast %62 : vector<6x1xf32> to vector<6x256xf32>
    %64 = arith.addf %61, %63 : vector<6x256xf32>
    %65 = vector.extract_strided_slice %3 {offsets = [0, 0], sizes = [1, 256], strides = [1, 1]} : vector<3x256xf32> to vector<1x256xf32>
    %66 = vector.extract_strided_slice %3 {offsets = [0, 0], sizes = [1, 256], strides = [1, 1]} : vector<3x256xf32> to vector<1x256xf32>
    %67 = arith.mulf %65, %66 : vector<1x256xf32>
    %68 = vector.extract_strided_slice %3 {offsets = [1, 0], sizes = [1, 256], strides = [1, 1]} : vector<3x256xf32> to vector<1x256xf32>
    %69 = vector.extract_strided_slice %3 {offsets = [1, 0], sizes = [1, 256], strides = [1, 1]} : vector<3x256xf32> to vector<1x256xf32>
    %70 = arith.mulf %68, %69 : vector<1x256xf32>
    %71 = arith.addf %67, %70 : vector<1x256xf32>
    %72 = vector.extract_strided_slice %3 {offsets = [2, 0], sizes = [1, 256], strides = [1, 1]} : vector<3x256xf32> to vector<1x256xf32>
    %73 = vector.extract_strided_slice %3 {offsets = [2, 0], sizes = [1, 256], strides = [1, 1]} : vector<3x256xf32> to vector<1x256xf32>
    %74 = arith.mulf %72, %73 : vector<1x256xf32>
    %75 = arith.addf %71, %74 : vector<1x256xf32>
    %cst_47 = arith.constant 9.99999968E-21 : f32
    %76 = vector.broadcast %cst_47 : f32 to vector<1x256xf32>
    %77 = arith.maximumf %75, %76 : vector<1x256xf32>
    %78 = math.rsqrt %77 : vector<1x256xf32>
    %79 = vector.broadcast %78 : vector<1x256xf32> to vector<3x256xf32>
    %80 = arith.mulf %3, %79 : vector<3x256xf32>
    %81 = arith.subf %2, %1 : vector<3x256xf32>
    %82 = vector.extract_strided_slice %81 {offsets = [0, 0], sizes = [1, 256], strides = [1, 1]} : vector<3x256xf32> to vector<1x256xf32>
    %83 = vector.extract_strided_slice %81 {offsets = [0, 0], sizes = [1, 256], strides = [1, 1]} : vector<3x256xf32> to vector<1x256xf32>
    %84 = arith.mulf %82, %83 : vector<1x256xf32>
    %85 = vector.extract_strided_slice %81 {offsets = [1, 0], sizes = [1, 256], strides = [1, 1]} : vector<3x256xf32> to vector<1x256xf32>
    %86 = vector.extract_strided_slice %81 {offsets = [1, 0], sizes = [1, 256], strides = [1, 1]} : vector<3x256xf32> to vector<1x256xf32>
    %87 = arith.mulf %85, %86 : vector<1x256xf32>
    %88 = arith.addf %84, %87 : vector<1x256xf32>
    %89 = vector.extract_strided_slice %81 {offsets = [2, 0], sizes = [1, 256], strides = [1, 1]} : vector<3x256xf32> to vector<1x256xf32>
    %90 = vector.extract_strided_slice %81 {offsets = [2, 0], sizes = [1, 256], strides = [1, 1]} : vector<3x256xf32> to vector<1x256xf32>
    %91 = arith.mulf %89, %90 : vector<1x256xf32>
    %92 = arith.addf %88, %91 : vector<1x256xf32>
    %cst_48 = arith.constant 9.99999968E-21 : f32
    %93 = vector.broadcast %cst_48 : f32 to vector<1x256xf32>
    %94 = arith.maximumf %92, %93 : vector<1x256xf32>
    %95 = math.rsqrt %94 : vector<1x256xf32>
    %96 = vector.broadcast %95 : vector<1x256xf32> to vector<3x256xf32>
    %97 = arith.mulf %81, %96 : vector<3x256xf32>
    %98 = vector.extract_strided_slice %4 {offsets = [0, 0], sizes = [1, 256], strides = [1, 1]} : vector<3x256xf32> to vector<1x256xf32>
    %99 = vector.extract_strided_slice %97 {offsets = [0, 0], sizes = [1, 256], strides = [1, 1]} : vector<3x256xf32> to vector<1x256xf32>
    %100 = arith.mulf %98, %99 : vector<1x256xf32>
    %101 = vector.extract_strided_slice %4 {offsets = [1, 0], sizes = [1, 256], strides = [1, 1]} : vector<3x256xf32> to vector<1x256xf32>
    %102 = vector.extract_strided_slice %97 {offsets = [1, 0], sizes = [1, 256], strides = [1, 1]} : vector<3x256xf32> to vector<1x256xf32>
    %103 = arith.mulf %101, %102 : vector<1x256xf32>
    %104 = arith.addf %100, %103 : vector<1x256xf32>
    %105 = vector.extract_strided_slice %4 {offsets = [2, 0], sizes = [1, 256], strides = [1, 1]} : vector<3x256xf32> to vector<1x256xf32>
    %106 = vector.extract_strided_slice %97 {offsets = [2, 0], sizes = [1, 256], strides = [1, 1]} : vector<3x256xf32> to vector<1x256xf32>
    %107 = arith.mulf %105, %106 : vector<1x256xf32>
    %108 = arith.addf %104, %107 : vector<1x256xf32>
    %cst_49 = arith.constant 0.000000e+00 : f32
    %109 = vector.broadcast %cst_49 : f32 to vector<1x256xf32>
    %110 = arith.cmpf ogt, %108, %109 : vector<1x256xf32>
    %cst_50 = arith.constant 0.000000e+00 : f32
    %111 = vector.broadcast %cst_50 : f32 to vector<3x256xf32>
    %112 = arith.subf %111, %80 : vector<3x256xf32>
    %113 = vector.shape_cast %110 : vector<1x256xi1> to vector<1x256xi1>
    %114 = vector.broadcast %113 : vector<1x256xi1> to vector<3x256xi1>
    %115 = arith.select %114, %80, %112 : vector<3x256xi1>, vector<3x256xf32>
    %cst_51 = arith.constant 0.000000e+00 : f32
    %116 = vector.broadcast %cst_51 : f32 to vector<3x256xf32>
    %117 = arith.subf %116, %4 : vector<3x256xf32>
    %118 = vector.shape_cast %110 : vector<1x256xi1> to vector<1x256xi1>
    %119 = vector.broadcast %118 : vector<1x256xi1> to vector<3x256xi1>
    %120 = arith.select %119, %4, %117 : vector<3x256xi1>, vector<3x256xf32>
    %121 = vector.extract_strided_slice %97 {offsets = [0, 0], sizes = [1, 256], strides = [1, 1]} : vector<3x256xf32> to vector<1x256xf32>
    %122 = vector.extract_strided_slice %115 {offsets = [0, 0], sizes = [1, 256], strides = [1, 1]} : vector<3x256xf32> to vector<1x256xf32>
    %123 = arith.mulf %121, %122 : vector<1x256xf32>
    %124 = vector.extract_strided_slice %97 {offsets = [1, 0], sizes = [1, 256], strides = [1, 1]} : vector<3x256xf32> to vector<1x256xf32>
    %125 = vector.extract_strided_slice %115 {offsets = [1, 0], sizes = [1, 256], strides = [1, 1]} : vector<3x256xf32> to vector<1x256xf32>
    %126 = arith.mulf %124, %125 : vector<1x256xf32>
    %127 = arith.addf %123, %126 : vector<1x256xf32>
    %128 = vector.extract_strided_slice %97 {offsets = [2, 0], sizes = [1, 256], strides = [1, 1]} : vector<3x256xf32> to vector<1x256xf32>
    %129 = vector.extract_strided_slice %115 {offsets = [2, 0], sizes = [1, 256], strides = [1, 1]} : vector<3x256xf32> to vector<1x256xf32>
    %130 = arith.mulf %128, %129 : vector<1x256xf32>
    %131 = arith.addf %127, %130 : vector<1x256xf32>
    %cst_52 = arith.constant 1.000000e+01 : f32
    %132 = vector.broadcast %cst_52 : f32 to vector<1x256xf32>
    %133 = arith.mulf %131, %132 : vector<1x256xf32>
    %cst_53 = arith.constant 0.000000e+00 : f32
    %cst_54 = arith.constant 1.000000e+00 : f32
    %134 = vector.broadcast %cst_53 : f32 to vector<1x256xf32>
    %135 = arith.maximumf %134, %133 : vector<1x256xf32>
    %136 = vector.broadcast %cst_54 : f32 to vector<1x256xf32>
    %137 = arith.minimumf %136, %135 : vector<1x256xf32>
    %138 = arith.subf %115, %120 : vector<3x256xf32>
    %139 = vector.broadcast %137 : vector<1x256xf32> to vector<3x256xf32>
    %140 = arith.mulf %139, %138 : vector<3x256xf32>
    %141 = arith.addf %120, %140 : vector<3x256xf32>
    %142 = vector.extract_strided_slice %97 {offsets = [0, 0], sizes = [1, 256], strides = [1, 1]} : vector<3x256xf32> to vector<1x256xf32>
    %143 = vector.extract_strided_slice %141 {offsets = [0, 0], sizes = [1, 256], strides = [1, 1]} : vector<3x256xf32> to vector<1x256xf32>
    %144 = arith.mulf %142, %143 : vector<1x256xf32>
    %145 = vector.extract_strided_slice %97 {offsets = [1, 0], sizes = [1, 256], strides = [1, 1]} : vector<3x256xf32> to vector<1x256xf32>
    %146 = vector.extract_strided_slice %141 {offsets = [1, 0], sizes = [1, 256], strides = [1, 1]} : vector<3x256xf32> to vector<1x256xf32>
    %147 = arith.mulf %145, %146 : vector<1x256xf32>
    %148 = arith.addf %144, %147 : vector<1x256xf32>
    %149 = vector.extract_strided_slice %97 {offsets = [2, 0], sizes = [1, 256], strides = [1, 1]} : vector<3x256xf32> to vector<1x256xf32>
    %150 = vector.extract_strided_slice %141 {offsets = [2, 0], sizes = [1, 256], strides = [1, 1]} : vector<3x256xf32> to vector<1x256xf32>
    %151 = arith.mulf %149, %150 : vector<1x256xf32>
    %152 = arith.addf %148, %151 : vector<1x256xf32>
    %cst_55 = arith.constant 2.000000e+00 : f32
    %153 = vector.broadcast %cst_55 : f32 to vector<1x256xf32>
    %154 = arith.mulf %153, %152 : vector<1x256xf32>
    %155 = vector.broadcast %154 : vector<1x256xf32> to vector<3x256xf32>
    %156 = arith.mulf %155, %141 : vector<3x256xf32>
    %157 = arith.subf %156, %97 : vector<3x256xf32>
    %158 = vector.extract_strided_slice %157 {offsets = [0, 0], sizes = [1, 256], strides = [1, 1]} : vector<3x256xf32> to vector<1x256xf32>
    %159 = vector.extract_strided_slice %157 {offsets = [0, 0], sizes = [1, 256], strides = [1, 1]} : vector<3x256xf32> to vector<1x256xf32>
    %160 = arith.mulf %158, %159 : vector<1x256xf32>
    %161 = vector.extract_strided_slice %157 {offsets = [1, 0], sizes = [1, 256], strides = [1, 1]} : vector<3x256xf32> to vector<1x256xf32>
    %162 = vector.extract_strided_slice %157 {offsets = [1, 0], sizes = [1, 256], strides = [1, 1]} : vector<3x256xf32> to vector<1x256xf32>
    %163 = arith.mulf %161, %162 : vector<1x256xf32>
    %164 = arith.addf %160, %163 : vector<1x256xf32>
    %165 = vector.extract_strided_slice %157 {offsets = [2, 0], sizes = [1, 256], strides = [1, 1]} : vector<3x256xf32> to vector<1x256xf32>
    %166 = vector.extract_strided_slice %157 {offsets = [2, 0], sizes = [1, 256], strides = [1, 1]} : vector<3x256xf32> to vector<1x256xf32>
    %167 = arith.mulf %165, %166 : vector<1x256xf32>
    %168 = arith.addf %164, %167 : vector<1x256xf32>
    %cst_56 = arith.constant 9.99999968E-21 : f32
    %169 = vector.broadcast %cst_56 : f32 to vector<1x256xf32>
    %170 = arith.maximumf %168, %169 : vector<1x256xf32>
    %171 = math.rsqrt %170 : vector<1x256xf32>
    %172 = vector.broadcast %171 : vector<1x256xf32> to vector<3x256xf32>
    %173 = arith.mulf %157, %172 : vector<3x256xf32>
    %c0_57 = arith.constant 0 : index
    %c0_58 = arith.constant 0 : index
    %174 = vector.load %arg20[%c0_57, %c0_58] : memref<6x256xf32, #tpu.memory_space<vmem>>, vector<3x256xf32>
    tpu.vector_store %arg20[%c0_57, %c0_58], %0 {strides = array<i32>} : memref<6x256xf32, #tpu.memory_space<vmem>>, vector<3x256xf32>,
    %c3_59 = arith.constant 3 : index
    %c0_60 = arith.constant 0 : index
    %175 = vector.load %arg20[%c3_59, %c0_60] : memref<6x256xf32, #tpu.memory_space<vmem>>, vector<3x256xf32>
    tpu.vector_store %arg20[%c3_59, %c0_60], %173 {strides = array<i32>} : memref<6x256xf32, #tpu.memory_space<vmem>>, vector<3x256xf32>,
    %c0_61 = arith.constant 0 : index
    %c0_62 = arith.constant 0 : index
    %176 = vector.load %arg20[%c0_61, %c0_62] : memref<6x256xf32, #tpu.memory_space<vmem>>, vector<6x256xf32>
    %177 = arith.truncf %176 : vector<6x256xf32> to vector<6x256xbf16>
    %c0_63 = arith.constant 0 : index
    %c0_64 = arith.constant 0 : index
    %178 = vector.load %arg12[%c0_63, %c0_64] : memref<64x6xbf16, #tpu.memory_space<vmem>>, vector<64x6xbf16>
    %cst_65 = arith.constant dense<0.000000e+00> : vector<64x256xf32>
    %179 = tpu.matmul %178, %177, %cst_65 {dimension_numbers = #tpu.dot_dimension_numbers<[1], [0], [0], [1], [0, 0, 1, 1], [], []>} : vector<64x6xbf16>, vector<6x256xbf16>, vector<64x256xf32> -> vector<64x256xf32>
    %c0_66 = arith.constant 0 : index
    %c0_67 = arith.constant 0 : index
    %180 = vector.load %arg13[%c0_66, %c0_67] : memref<64x1xf32, #tpu.memory_space<vmem>>, vector<64x1xf32>
    %181 = vector.broadcast %180 : vector<64x1xf32> to vector<64x256xf32>
    %182 = arith.addf %179, %181 : vector<64x256xf32>
    %cst_68 = arith.constant 0.000000e+00 : f32
    %183 = vector.broadcast %cst_68 : f32 to vector<64x256xf32>
    %184 = arith.maximumf %182, %183 : vector<64x256xf32>
    %c0_69 = arith.constant 0 : index
    %c0_70 = arith.constant 0 : index
    %185 = vector.load %arg14[%c0_69, %c0_70] : memref<64x64xbf16, #tpu.memory_space<vmem>>, vector<64x64xbf16>
    %186 = arith.truncf %184 : vector<64x256xf32> to vector<64x256xbf16>
    %cst_71 = arith.constant dense<0.000000e+00> : vector<64x256xf32>
    %187 = tpu.matmul %185, %186, %cst_71 {dimension_numbers = #tpu.dot_dimension_numbers<[1], [0], [0], [1], [0, 0, 1, 1], [], []>} : vector<64x64xbf16>, vector<64x256xbf16>, vector<64x256xf32> -> vector<64x256xf32>
    %c0_72 = arith.constant 0 : index
    %c0_73 = arith.constant 0 : index
    %188 = vector.load %arg15[%c0_72, %c0_73] : memref<64x1xf32, #tpu.memory_space<vmem>>, vector<64x1xf32>
    %189 = vector.broadcast %188 : vector<64x1xf32> to vector<64x256xf32>
    %190 = arith.addf %187, %189 : vector<64x256xf32>
    %cst_74 = arith.constant 0.000000e+00 : f32
    %191 = vector.broadcast %cst_74 : f32 to vector<64x256xf32>
    %192 = arith.maximumf %190, %191 : vector<64x256xf32>
    %c0_75 = arith.constant 0 : index
    %c0_76 = arith.constant 0 : index
    %193 = vector.load %arg16[%c0_75, %c0_76] : memref<1x64xbf16, #tpu.memory_space<vmem>>, vector<1x64xbf16>
    %194 = arith.truncf %192 : vector<64x256xf32> to vector<64x256xbf16>
    %cst_77 = arith.constant dense<0.000000e+00> : vector<1x256xf32>
    %195 = tpu.matmul %193, %194, %cst_77 {dimension_numbers = #tpu.dot_dimension_numbers<[1], [0], [0], [1], [0, 0, 1, 1], [], []>} : vector<1x64xbf16>, vector<64x256xbf16>, vector<1x256xf32> -> vector<1x256xf32>
    %c0_78 = arith.constant 0 : index
    %c0_79 = arith.constant 0 : index
    %196 = vector.load %arg17[%c0_78, %c0_79] : memref<1x1xf32, #tpu.memory_space<vmem>>, vector<1x1xf32>
    %197 = vector.broadcast %196 : vector<1x1xf32> to vector<1x256xf32>
    %198 = arith.addf %195, %197 : vector<1x256xf32>
    %199 = vector.extract_strided_slice %64 {offsets = [0, 0], sizes = [3, 256], strides = [1, 1]} : vector<6x256xf32> to vector<3x256xf32>
    %200 = vector.extract_strided_slice %64 {offsets = [3, 0], sizes = [3, 256], strides = [1, 1]} : vector<6x256xf32> to vector<3x256xf32>
    %201 = vector.broadcast %198 : vector<1x256xf32> to vector<3x256xf32>
    %202 = arith.mulf %201, %200 : vector<3x256xf32>
    %203 = arith.addf %199, %202 : vector<3x256xf32>
    %c0_80 = arith.constant 0 : index
    %c0_81 = arith.constant 0 : index
    %204 = vector.load %arg18[%c0_80, %c0_81] : memref<10x256xf32, #tpu.memory_space<vmem>>, vector<3x256xf32>
    tpu.vector_store %arg18[%c0_80, %c0_81], %203 {strides = array<i32>} : memref<10x256xf32, #tpu.memory_space<vmem>>, vector<3x256xf32>,
    %c3_82 = arith.constant 3 : index
    %c0_83 = arith.constant 0 : index
    %205 = vector.load %arg18[%c3_82, %c0_83] : memref<10x256xf32, #tpu.memory_space<vmem>>, vector<6x256xf32>
    tpu.vector_store %arg18[%c3_82, %c0_83], %64 {strides = array<i32>} : memref<10x256xf32, #tpu.memory_space<vmem>>, vector<6x256xf32>,
    %c9_84 = arith.constant 9 : index
    %c0_85 = arith.constant 0 : index
    %206 = vector.load %arg18[%c9_84, %c0_85] : memref<10x256xf32, #tpu.memory_space<vmem>>, vector<1x256xf32>
    tpu.vector_store %arg18[%c9_84, %c0_85], %198 {strides = array<i32>} : memref<10x256xf32, #tpu.memory_space<vmem>>, vector<1x256xf32>,
    return
  }
  func.func @transform_0(%arg0: i32) -> (i32, i32) {
    %c0_i32 = arith.constant 0 : i32
    %c0_i32_0 = arith.constant 0 : i32
    return %c0_i32, %arg0 : i32, i32
  }
  func.func @transform_1(%arg0: i32) -> (i32, i32) {
    %c0_i32 = arith.constant 0 : i32
    %c0_i32_0 = arith.constant 0 : i32
    return %c0_i32, %arg0 : i32, i32
  }
  func.func @transform_2(%arg0: i32) -> (i32, i32) {
    %c0_i32 = arith.constant 0 : i32
    %c0_i32_0 = arith.constant 0 : i32
    return %c0_i32, %arg0 : i32, i32
  }
  func.func @transform_3(%arg0: i32) -> (i32, i32) {
    %c0_i32 = arith.constant 0 : i32
    %c0_i32_0 = arith.constant 0 : i32
    return %c0_i32, %arg0 : i32, i32
  }
  func.func @transform_4(%arg0: i32) -> (i32, i32) {
    %c0_i32 = arith.constant 0 : i32
    %c0_i32_0 = arith.constant 0 : i32
    return %c0_i32, %arg0 : i32, i32
  }
  func.func @transform_5(%arg0: i32) -> (i32, i32) {
    %c0_i32 = arith.constant 0 : i32
    %c0_i32_0 = arith.constant 0 : i32
    %c0_i32_1 = arith.constant 0 : i32
    return %c0_i32, %c0_i32_0 : i32, i32
  }
  func.func @transform_6(%arg0: i32) -> (i32, i32) {
    %c0_i32 = arith.constant 0 : i32
    %c0_i32_0 = arith.constant 0 : i32
    %c0_i32_1 = arith.constant 0 : i32
    return %c0_i32, %c0_i32_0 : i32, i32
  }
  func.func @transform_7(%arg0: i32) -> (i32, i32) {
    %c0_i32 = arith.constant 0 : i32
    %c0_i32_0 = arith.constant 0 : i32
    %c0_i32_1 = arith.constant 0 : i32
    return %c0_i32, %c0_i32_0 : i32, i32
  }
  func.func @transform_8(%arg0: i32) -> (i32, i32) {
    %c0_i32 = arith.constant 0 : i32
    %c0_i32_0 = arith.constant 0 : i32
    %c0_i32_1 = arith.constant 0 : i32
    return %c0_i32, %c0_i32_0 : i32, i32
  }
  func.func @transform_9(%arg0: i32) -> (i32, i32) {
    %c0_i32 = arith.constant 0 : i32
    %c0_i32_0 = arith.constant 0 : i32
    %c0_i32_1 = arith.constant 0 : i32
    return %c0_i32, %c0_i32_0 : i32, i32
  }
  func.func @transform_10(%arg0: i32) -> (i32, i32) {
    %c0_i32 = arith.constant 0 : i32
    %c0_i32_0 = arith.constant 0 : i32
    %c0_i32_1 = arith.constant 0 : i32
    return %c0_i32, %c0_i32_0 : i32, i32
  }
  func.func @transform_11(%arg0: i32) -> (i32, i32) {
    %c0_i32 = arith.constant 0 : i32
    %c0_i32_0 = arith.constant 0 : i32
    %c0_i32_1 = arith.constant 0 : i32
    return %c0_i32, %c0_i32_0 : i32, i32
  }
  func.func @transform_12(%arg0: i32) -> (i32, i32) {
    %c0_i32 = arith.constant 0 : i32
    %c0_i32_0 = arith.constant 0 : i32
    %c0_i32_1 = arith.constant 0 : i32
    return %c0_i32, %c0_i32_0 : i32, i32
  }
  func.func @transform_13(%arg0: i32) -> (i32, i32) {
    %c0_i32 = arith.constant 0 : i32
    %c0_i32_0 = arith.constant 0 : i32
    %c0_i32_1 = arith.constant 0 : i32
    return %c0_i32, %c0_i32_0 : i32, i32
  }
  func.func @transform_14(%arg0: i32) -> (i32, i32) {
    %c0_i32 = arith.constant 0 : i32
    %c0_i32_0 = arith.constant 0 : i32
    %c0_i32_1 = arith.constant 0 : i32
    return %c0_i32, %c0_i32_0 : i32, i32
  }
  func.func @transform_15(%arg0: i32) -> (i32, i32) {
    %c0_i32 = arith.constant 0 : i32
    %c0_i32_0 = arith.constant 0 : i32
    %c0_i32_1 = arith.constant 0 : i32
    return %c0_i32, %c0_i32_0 : i32, i32
  }
  func.func @transform_16(%arg0: i32) -> (i32, i32) {
    %c0_i32 = arith.constant 0 : i32
    %c0_i32_0 = arith.constant 0 : i32
    %c0_i32_1 = arith.constant 0 : i32
    return %c0_i32, %c0_i32_0 : i32, i32
  }
  func.func @transform_17(%arg0: i32) -> (i32, i32) {
    %c0_i32 = arith.constant 0 : i32
    %c0_i32_0 = arith.constant 0 : i32
    return %c0_i32, %arg0 : i32, i32
  }
}

</mosaic_0001>

<bundles_post_ra>
// kernel: tpu_custom_call.1
= control target key start
LH: loop header
LB: loop body
LE: loop exit
PB: predicated region body
PF: predicated region fallthrough
CT: control target
= control target key end

     0   :  { %s5231_s0 = inlined_call_operand.vmem [shape: f32[3,512], index: 0, kind: input, shape index: {}]   ;;  %s5232_s1 = inlined_call_operand.vmem [shape: f32[3,512], index: 1, kind: input, shape index: {}]   ;;  %s5233_s2 = inlined_call_operand.vmem [shape: f32[3,512], index: 2, kind: input, shape index: {}]   ;;  %s5234_s3 = inlined_call_operand.vmem [shape: f32[3,512], index: 3, kind: input, shape index: {}]   ;;  %s5235_s4 = inlined_call_operand.vmem [shape: f32[3,512], index: 4, kind: input, shape index: {}]   ;;  %s5236_s5 = inlined_call_operand.vmem [shape: bf16[128,39], index: 5, kind: input, shape index: {}]   ;;  %s5237_s6 = inlined_call_operand.vmem [shape: f32[128,1], index: 6, kind: input, shape index: {}]   ;;  %s5238_s7 = inlined_call_operand.vmem [shape: bf16[128,128], index: 7, kind: input, shape index: {}]   ;;  %s5239_s8 = inlined_call_operand.vmem [shape: f32[128,1], index: 8, kind: input, shape index: {}]   ;;  %s5240_s9 = inlined_call_operand.vmem [shape: bf16[6,128], index: 9, kind: input, shape index: {}]   ;;  %s5241_s10 = inlined_call_operand.vmem [shape: f32[6,1], index: 10, kind: input, shape index: {}]   ;;  %s5242_s11 = inlined_call_operand.vmem [shape: bf16[64,6], index: 11, kind: input, shape index: {}]   ;;  %s5243_s12 = inlined_call_operand.vmem [shape: f32[64,1], index: 12, kind: input, shape index: {}]   ;;  %s5244_s13 = inlined_call_operand.vmem [shape: bf16[64,64], index: 13, kind: input, shape index: {}]   ;;  %s5245_s14 = inlined_call_operand.vmem [shape: f32[64,1], index: 14, kind: input, shape index: {}]   ;;  %s5246_s15 = inlined_call_operand.vmem [shape: bf16[1,64], index: 15, kind: input, shape index: {}]   ;;  %s5247_s16 = inlined_call_operand.<no memory space> [shape: f32[1,1], index: 16, kind: input, shape index: {}]   ;;  %s5248_s17 = inlined_call_operand.hbm [shape: f32[10,512], index: 17, kind: output, shape index: {}]  }
   0x1   :  { %5249 = sst [smem:[#allocation9_spill]] %s5231_s0  ;;  %v22_v0 = vstv %s5247_s16 }
   0x2   :  { %5250 = sst [smem:[#allocation10_spill]] %s5232_s1  ;;  %23 = vst [vmem:[#allocation4] sm:$0x1] %v22_v0 }
   0x3   :  { %5251 = sst [smem:[#allocation11_spill]] %s5236_s5 }
   0x4   :  { %5252 = sst [smem:[#allocation12_spill]] %s5237_s6 }
   0x5   :  { %5253 = sst [smem:[#allocation13_spill]] %s5239_s8 }
   0x6   :  { %5254 = sst [smem:[#allocation14_spill]] %s5241_s10 }
   0x7   :  { %24 = vsyncpa [#allocation6], 0 }
   0x8   :  { %26 = vsyncpa [#allocation6 + $0x1], 0  ;;  %s4009_s26 = smov 0   ;;  %s4011_s27 = smov 0  }
   0x9   :  { %s4013_s28 = smov 0   ;;  %s4015_s29 = smov 0  }
   0xa LB: > { %s4030_s16 = sadd.s32 4294967295, %s3901_s29   ;;  %s3584_s0 = sadd.s32 4294967294, %s3901_s29   ;;  %s3901_s29 = sphi %s4015_s29, %s5279_s29   ;;  %s3897_s28 = sphi %s4013_s28, %s5278_s28   ;;  %s3893_s27 = sphi %s4011_s27, %s5277_s27   ;;  %s3889_s26 = sphi %s4009_s26, %s5276_s26  }
   0xb   : > { %s4034_s30 = sadd.s32 1, %s3901_s29   ;;  %s421_s18 = sadd.s32 1, %s3897_s28 }
   0xc   : > { %s418_s19 = ssub.s32 %s3901_s29, %s4034_s30  ;;  %p431_p0 = scmp.ne.s32.totalorder %s3897_s28, %s3893_s27 }
   0xd   : > { %p419_p1 = scmp.eq.s32.totalorder %s418_s19, 0  ;;  %p432_p2 = scmp.eq.s32.totalorder %s4030_s16, 1 }
   0xe   : > { %p437_p3 = scmp.ne.s32.totalorder %s3893_s27, %s3889_s26  ;;  %p438_p4 = scmp.eq.s32.totalorder %s3584_s0, 1 }
   0xf   : > { %s4045_s1 = scalar_select %p419_p1, %s3897_s28, %s421_s18  }
  0x10   : > { %p4047_p5 = por %p432_p2, %p431_p0  ;;  %p4051_p6 = por %p438_p4, %p437_p3 }
  0x11   : > { %5255 = sst [smem:[#allocation8_spill]] %s4045_s1  ;;  %p3587_p7 = scmp.ge.s32.totalorder %s3901_s29, 1 }
  0x12   : > { %p537_p8 = scmp.lt.s32.totalorder %s3901_s29, 3 }
  0x14   : > { %p538_p9 = pnand %p3587_p7, %p537_p8 }
  0x15   : > { %s3589_s22 = sshll.u32 (!%p538_p9), %s4030_s16, 1  ;;  %s5258_s0 = sld [smem:[#allocation9_spill]] (!%p538_p9) }
  0x16   : > { %541 = sbr.rel (%p538_p9) target bundleno = 1564 (0x61c), region = 88  ;;  %p610_p10 = scmp.lt.s32.totalorder (!%p538_p9), %s3589_s22, 3 }
  0x17   : > { %s5268_s6 = sld [smem:[#allocation12_spill]] (!%p538_p9) }
  0x18   : > { %s5269_s8 = sld [smem:[#allocation13_spill]] (!%p538_p9) }
  0x19   : > { %s5272_s5 = sld [smem:[#allocation11_spill]] (!%p538_p9) }
  0x1a   : > { %s5273_s10 = sld [smem:[#allocation14_spill]] (!%p538_p9) }
  0x1b   : > { %s5281_s22 = smov (!%p610_p10, %s3589_s22), 3  ;;  %v3903_v34 = vmov 683565275   ;;  %v3904_v36 = vmov 2475754826  }
  0x1c   : > { %s4058_s23 = sshll.u32 %s5281_s22, 2  ;;  %v3905_v38 = vmov 2131351028   ;;  %v3906_v40 = vmov 2102212464   ;;  %s3705_s22 = sshll.u32 %s4030_s16, 8 }
  0x1d   : > { %s613_s18 = scalar_lea.vmem %s5258_s0, %s4058_s23  ;;  %v3907_v42 = vmov 920167782   ;;  %v3908_v49 = vmov 1326507024   ;;  %s625_s19 = scalar_lea.vmem %s5233_s2, %s4058_s23 }
  0x1e   : > { %v4064_v1 = vld [vmem:[%s613_s18] sm:$0x77]  ;;  %s631_s25 = scalar_lea.vmem %s5234_s3, %s4058_s23 }
  0x1f   : > { %v4067_v2 = vmul.f32 16.0, %v4064_v1  ;;  %v4070_v3 = vmul.f32 32.0, %v4064_v1  ;;  %649 = vst [vmem:[#allocation2 + $0x30] sm:$0x7] %v4064_v1  ;;  %2958 = vst [vmem:[#allocation3 + $0x8] sm:$0x7] %v4064_v1 }
  0x20   : > { %v4075_v4 = vmul.f32 4.0, %v4064_v1  ;;  %v4088_v24 = vmul.f32 8.0, %v4064_v1 }
  0x21   : > { %v1545_v5 = vand.u32 2147483647, %v4067_v2  ;;  %v1548_v6 = vand.u32 2139095040, %v4067_v2  ;;  %v1771_v7 = vand.u32 2147483647, %v4070_v3  ;;  %v1774_v8 = vand.u32 2139095040, %v4070_v3 }
  0x22   : > { %v1101_v13 = vand.u32 2139095040, %v4075_v4  ;;  %v1098_v23 = vand.u32 2147483647, %v4075_v4  ;;  %vm1547_vm13 = vcmp.lt.s32.totalorder %v4067_v2, 0 }
  0x23   : > { %v1549_v9 = vshrl.u32 %v1548_v6, 23  ;;  %v1552_v10 = vand.u32 8388607, %v1545_v5  ;;  %v1775_v11 = vshrl.u32 %v1774_v8, 23  ;;  %v1778_v12 = vand.u32 8388607, %v1771_v7 }
  0x24   : > { %v1102_v16 = vshrl.u32 %v1101_v13, 23 }
  0x25   : > { %v3631_v14 = vadd.s32 4294967169, %v1549_v9  ;;  %v3639_v15 = vadd.s32 4294967169, %v1775_v11  ;;  %v1553_v17 = vor.u32 8388608, %v1552_v10  ;;  %v1779_v19 = vor.u32 8388608, %v1778_v12 }
  0x26   : > { %v3615_v21 = vadd.s32 4294967169, %v1102_v16 }
  0x27   : > { %v1555_v18 = vadd.s32 1, %v3631_v14  ;;  %v1781_v20 = vadd.s32 1, %v3639_v15  ;;  %v4090_v27 = vshll.u32 %v1553_v17, 8  ;;  %v4094_v31 = vshll.u32 %v1779_v19, 8 }
  0x28   : > { %v4096_v32 = vadd.s32 1, %v3615_v21 }
  0x29   : > { %vm1556_vm0 = vcmp.gt.s32.totalorder %v1555_v18, 0  ;;  %vm1782_vm1 = vcmp.gt.s32.totalorder %v1781_v20, 0 }
  0x2a   : > { %v1557_v22 = vsel %vm1556_vm0, %v1555_v18, 0  ;;  %v1783_v28 = vsel %vm1782_vm1, %v1781_v20, 0  ;;  %vm1109_vm6 = vcmp.gt.s32.totalorder %v4096_v32, 0  ;;  %vm4213_vm1 = vcmp.le.f32.partialorder %v1545_v5, 0.7853982 }
  0x2b   : > { %v1558_v25 = vshrl.u32 %v1557_v22, 5  ;;  %v1559_v26 = vand.u32 31, %v1557_v22  ;;  %v4092_v29 = vshrl.u32 %v1783_v28, 5  ;;  %v1785_v30 = vand.u32 31, %v1783_v28 }
  0x2d   : > { %v1560_v33 = vsub.s32 32, %v1559_v26  ;;  %v1562_v35 = vshll.u32 %v3903_v34, %v1559_v26  ;;  %v1565_v37 = vshll.u32 %v3904_v36, %v1559_v26  ;;  %v1568_v39 = vshll.u32 %v3905_v38, %v1559_v26 }
  0x2e   : > { %v1571_v41 = vshll.u32 %v3906_v40, %v1559_v26  ;;  %v1574_v43 = vshll.u32 %v3907_v42, %v1559_v26  ;;  %vm1577_vm2 = vcmp.lt.s32.totalorder %v1558_v25, 1  ;;  %vm1578_vm3 = vcmp.lt.s32.totalorder %v1558_v25, 2 }
  0x2f   : > { %v1561_v44 = vshrl.u32 %v3903_v34, %v1560_v33  ;;  %v1563_v45 = vshrl.u32 %v3904_v36, %v1560_v33  ;;  %v1566_v46 = vshrl.u32 %v3905_v38, %v1560_v33  ;;  %v1569_v47 = vshrl.u32 %v3906_v40, %v1560_v33 }
  0x30   : > { %v1572_v48 = vshrl.u32 %v3907_v42, %v1560_v33  ;;  %v1575_v50 = vshrl.u32 %v3908_v49, %v1560_v33  ;;  %vm1579_vm4 = vcmp.lt.s32.totalorder %v1558_v25, 3  ;;  %vm1580_vm5 = vcmp.lt.s32.totalorder %v1558_v25, 4 }
  0x31   : > { %v1564_v51 = vor.u32 %v1563_v45, %v1562_v35  ;;  %v1567_v52 = vor.u32 %v1566_v46, %v1565_v37  ;;  %v1570_v53 = vor.u32 %v1569_v47, %v1568_v39  ;;  %v1786_v54 = vsub.s32 32, %v1785_v30 }
  0x32   : > { %v1573_v55 = vor.u32 %v1572_v48, %v1571_v41  ;;  %v1576_v56 = vor.u32 %v1575_v50, %v1574_v43  ;;  %v1788_v57 = vshll.u32 %v3903_v34, %v1785_v30  ;;  %v1791_v6 = vshll.u32 %v3904_v36, %v1785_v30 }
  0x33   : > { %v1581_v58 = vsel %vm1577_vm2, %v1561_v44, %v1564_v51  ;;  %v1582_v59 = vsel %vm1580_vm5, %v1570_v53, 2102212464  ;;  %v1585_v60 = vsel %vm1577_vm2, %v1564_v51, %v1567_v52  ;;  %v1589_v61 = vsel %vm1577_vm2, %v1567_v52, %v1570_v53 }
  0x34   : > { %v1583_v62 = vsel %vm1579_vm4, %v1567_v52, %v1582_v59  ;;  %v1586_v63 = vsel %vm1580_vm5, %v1573_v55, 920167782  ;;  %v1590_v0 = vsel %vm1580_vm5, %v1576_v56, 1326507024  ;;  %v1787_v10 = vshrl.u32 %v3903_v34, %v1786_v54 }
  0x35   : > { %v1587_v8 = vsel %vm1579_vm4, %v1570_v53, %v1586_v63  ;;  %v1591_v9 = vsel %vm1579_vm4, %v1573_v55, %v1590_v0  ;;  %v1789_v11 = vshrl.u32 %v3904_v36, %v1786_v54  ;;  %v1584_v12 = vsel %vm1578_vm3, %v1581_v58, %v1583_v62 }
  0x36   : > { %v1588_v13 = vsel %vm1578_vm3, %v1585_v60, %v1587_v8  ;;  %v1592_v14 = vsel %vm1578_vm3, %v1589_v61, %v1591_v9  ;;  %v1792_v15 = vshrl.u32 %v3905_v38, %v1786_v54  ;;  %v1794_v22 = vshll.u32 %v3905_v38, %v1785_v30 }
  0x37   : > { %v4125_v16 = vmul.u32.u64.low %v4090_v27, %v1592_v14  ;;  %v4126_v17 = vmul.u32.u64.high %v4090_v27, %v1592_v14, %v4125_v16  ;;  %v4129_v18 = vmul.u32.u64.low %v4090_v27, %v1588_v13  ;;  %v4130_v19 = vmul.u32.u64.high %v4090_v27, %v1588_v13, %v4129_v18 }
  0x38   : > { %v1790_v20 = vor.u32 %v1789_v11, %v1788_v57  ;;  %v1793_v21 = vor.u32 %v1792_v15, %v1791_v6  ;;  %v1795_v26 = vshrl.u32 %v3906_v40, %v1786_v54  ;;  %v1797_v25 = vshll.u32 %v3906_v40, %v1785_v30 }
  0x39   : > { %v1798_v28 = vshrl.u32 %v3907_v42, %v1786_v54  ;;  %v1800_v33 = vshll.u32 %v3907_v42, %v1785_v30  ;;  %v1801_v35 = vshrl.u32 %v3908_v49, %v1786_v54  ;;  %v1600_v37 = vmul.u32 %v4090_v27, %v1584_v12 }
  0x3a   : > { %v1796_v39 = vor.u32 %v1795_v26, %v1794_v22  ;;  %vm1803_vm7 = vcmp.lt.s32.totalorder %v4092_v29, 1  ;;  %vm1804_vm8 = vcmp.lt.s32.totalorder %v4092_v29, 2  ;;  %vm1602_vm9 = vc.u32 %v4126_v17, %v4129_v18 }
  0x3b   : > { %v1603_v41 = vadd.s32 1, %v4130_v19  ;;  %v1799_v43 = vor.u32 %v1798_v28, %v1797_v25  ;;  %vm1805_vm10 = vcmp.lt.s32.totalorder %v4092_v29, 3  ;;  %v1802_v44 = vor.u32 %v1801_v35, %v1800_v33 }
  0x3c   : > { %vm1806_vm11 = vcmp.lt.s32.totalorder %v4092_v29, 4  ;;  %v1807_v30 = vsel %vm1803_vm7, %v1787_v10, %v1790_v20  ;;  %v1811_v45 = vsel %vm1803_vm7, %v1790_v20, %v1793_v21  ;;  %v1815_v48 = vsel %vm1803_vm7, %v1793_v21, %v1796_v39 }
  0x3d   : > { %v1604_v27 = vsel %vm1602_vm9, %v1603_v41, %v4130_v19  ;;  %v1808_v46 = vsel %vm1806_vm11, %v1796_v39, 2102212464  ;;  %v1812_v47 = vsel %vm1806_vm11, %v1799_v43, 920167782  ;;  %v1816_v53 = vsel %vm1806_vm11, %v1802_v44, 1326507024 }
  0x3e   : > { %v1605_v50 = vadd.s32 %v1604_v27, %v1600_v37  ;;  %v1809_v51 = vsel %vm1805_vm10, %v1793_v21, %v1808_v46  ;;  %v1813_v52 = vsel %vm1805_vm10, %v1796_v39, %v1812_v47  ;;  %v1817_v56 = vsel %vm1805_vm10, %v1799_v43, %v1816_v53 }
  0x3f   : > { %v1810_v54 = vsel %vm1804_vm8, %v1807_v30, %v1809_v51  ;;  %v1814_v55 = vsel %vm1804_vm8, %v1811_v45, %v1813_v52  ;;  %v1110_v57 = vsel %vm1109_vm6, %v4096_v32, 0  ;;  %v1818_v59 = vsel %vm1804_vm8, %v1815_v48, %v1817_v56 }
  0x40   : > { %v1606_v58 = vadd.s32 536870912, %v1605_v50  ;;  %v4158_v60 = vmul.u32.u64.low %v4094_v31, %v1814_v55  ;;  %v4159_v61 = vmul.u32.u64.high %v4094_v31, %v1814_v55, %v4158_v60  ;;  %v1105_v6 = vand.u32 8388607, %v1098_v23 }
  0x41   : > { %v4163_v62 = vmul.u32.u64.low %v4094_v31, %v1818_v59  ;;  %v4164_v63 = vmul.u32.u64.high %v4094_v31, %v1818_v59, %v4163_v62  ;;  %v1112_v8 = vand.u32 31, %v1110_v57  ;;  %v1826_v32 = vmul.u32 %v4094_v31, %v1810_v54 }
  0x42   : > { %v4166_v0 = vshrl.u32 %v1606_v58, 30  ;;  %v1327_v29 = vand.u32 2139095040, %v4088_v24  ;;  %v1829_v10 = vadd.s32 1, %v4159_v61  ;;  %v1106_v14 = vor.u32 8388608, %v1105_v6 }
  0x43   : > { %vm1828_vm12 = vc.u32 %v4164_v63, %v4158_v60  ;;  %v1113_v11 = vsub.s32 32, %v1112_v8  ;;  %v1324_v16 = vand.u32 2147483647, %v4088_v24  ;;  %v654_v31 = vand.u32 2139095040, %v4064_v1 }
  0x44   : > { %v1608_v9 = vshll.u32 %v4166_v0, 30  ;;  %v1830_v13 = vsel %vm1828_vm12, %v1829_v10, %v4159_v61  ;;  %v1328_v19 = vshrl.u32 %v1327_v29, 23  ;;  %v4182_v21 = vshrl.u32 %v1110_v57, 5 }
  0x45   : > { %v1831_v15 = vadd.s32 %v1830_v13, %v1826_v32  ;;  %v1115_v22 = vshll.u32 %v3903_v34, %v1112_v8  ;;  %v1118_v26 = vshll.u32 %v3904_v36, %v1112_v8  ;;  %v1116_v28 = vshrl.u32 %v3904_v36, %v1113_v11 }
  0x46   : > { %v4176_v12 = vsub.s32 %v1605_v50, %v1608_v9  ;;  %v1119_v33 = vshrl.u32 %v3905_v38, %v1113_v11  ;;  %v1124_v35 = vshll.u32 %v3906_v40, %v1112_v8  ;;  %v1121_v39 = vshll.u32 %v3905_v38, %v1112_v8 }
  0x47   : > { %v1832_v25 = vadd.s32 536870912, %v1831_v15  ;;  %v1122_v41 = vshrl.u32 %v3906_v40, %v1113_v11  ;;  %v4192_v43 = vshll.u32 %v1106_v14, 8  ;;  %v1601_v44 = vadd.s32 %v4129_v18, %v4126_v17 }
  0x48   : > { %v1611_v20 = vsub.s32 0, %v4176_v12  ;;  %v1125_v45 = vshrl.u32 %v3907_v42, %v1113_v11  ;;  %v1127_v27 = vshll.u32 %v3907_v42, %v1112_v8  ;;  %v1128_v47 = vshrl.u32 %v3908_v49, %v1113_v11 }
  0x49   : > { %v4196_v30 = vshrl.u32 %v1832_v25, 30  ;;  %vm1133_vm14 = vcmp.lt.s32.totalorder %v4182_v21, 4  ;;  %v3623_v48 = vadd.s32 4294967169, %v1328_v19  ;;  %v1117_v51 = vor.u32 %v1116_v28, %v1115_v22 }
  0x4a   : > { %v3632_v37 = vmin.u32 %v1611_v20, %v4176_v12  ;;  %v1120_v52 = vor.u32 %v1119_v33, %v1118_v26  ;;  %v1126_v53 = vor.u32 %v1125_v45, %v1124_v35  ;;  %v1123_v18 = vor.u32 %v1122_v41, %v1121_v39 }
  0x4b   : > { %v1834_v50 = vshll.u32 %v4196_v30, 30  ;;  %v1129_v54 = vor.u32 %v1128_v47, %v1127_v27  ;;  %vm1130_vm15 = vcmp.lt.s32.totalorder %v4182_v21, 1  ;;  %v1114_v56 = vshrl.u32 %v3903_v34, %v1113_v11 }
  0x4c   : > { %v1613_v46 = vclz %v3632_v37  ;;  %vm1132_vm0 = vcmp.lt.s32.totalorder %v4182_v21, 3  ;;  %v1139_v57 = vsel %vm1133_vm14, %v1126_v53, 920167782  ;;  %v1631_v59 = vsub.s32 4, %v4166_v0 }
  0x4d   : > { %v4205_v55 = vsub.s32 %v1831_v15, %v1834_v50  ;;  %vm1131_vm3 = vcmp.lt.s32.totalorder %v4182_v21, 2  ;;  %v1135_v61 = vsel %vm1133_vm14, %v1123_v18, 2102212464  ;;  %vm1773_vm4 = vcmp.lt.s32.totalorder %v4070_v3, 0 }
  0x4e   : > { %v3633_v17 = vadd.s32 4294967294, %v1613_v46  ;;  %v1138_v8 = vsel %vm1130_vm15, %v1117_v51, %v1120_v52  ;;  %v1143_v5 = vsel %vm1133_vm14, %v1129_v54, 1326507024  ;;  %v1140_v10 = vsel %vm1132_vm0, %v1123_v18, %v1139_v57 }
  0x4f   : > { %v1837_v6 = vsub.s32 0, %v4205_v55  ;;  %v1134_v13 = vsel %vm1130_vm15, %v1114_v56, %v1117_v51  ;;  %v1136_v14 = vsel %vm1132_vm0, %v1120_v52, %v1135_v61  ;;  %v1142_v15 = vsel %vm1130_vm15, %v1120_v52, %v1123_v18 }
  0x50   : > { %vm3634_vm2 = vcmp.lt.s32.totalorder %v3633_v17, 0  ;;  %v4241_v22 = vand.u32 8388607, %v1324_v16  ;;  %v1632_v26 = vsel %vm1547_vm13, %v1631_v59, %v4166_v0  ;;  %v1857_v28 = vsub.s32 4, %v4196_v30 }
  0x51   : > { %v1616_v62 = vsel %vm3634_vm2, 0, %v3633_v17  ;;  %v3640_v11 = vmin.u32 %v1837_v6, %v4205_v55  ;;  %v1141_v33 = vsel %vm1131_vm3, %v1138_v8, %v1140_v10  ;;  %v1137_v39 = vsel %vm1131_vm3, %v1134_v13, %v1136_v14 }
  0x52   : > { %v1617_v32 = vsub.s32 32, %v1616_v62  ;;  %v1618_v29 = vshll.u32 %v4176_v12, %v1616_v62  ;;  %v1621_v9 = vsub.s32 4294967266, %v1616_v62  ;;  %v1144_v12 = vsel %vm1132_vm0, %v1126_v53, %v1143_v5 }
  0x53   : > { %v1839_v25 = vclz %v3640_v11  ;;  %v1145_v41 = vsel %vm1131_vm3, %v1142_v15, %v1144_v12  ;;  %v1334_v0 = vadd.s32 1, %v3623_v48  ;;  %v1634_v52 = vsel %vm4213_vm1, 0, %v1632_v26 }
  0x54   : > { %v1619_v19 = vshrl.u32 %v1601_v44, %v1617_v32  ;;  %v1622_v20 = vadd.s32 127, %v1621_v9  ;;  %v4254_v45 = vmul.u32.u64.low %v4192_v43, %v1145_v41  ;;  %v4255_v27 = vmul.u32.u64.high %v4192_v43, %v1145_v41, %v4254_v45 }
  0x55   : > { %v3641_v44 = vadd.s32 4294967294, %v1839_v25  ;;  %v4258_v50 = vmul.u32.u64.low %v4192_v43, %v1141_v33  ;;  %v4259_v51 = vmul.u32.u64.high %v4192_v43, %v1141_v33, %v4258_v50  ;;  %v1827_v21 = vadd.s32 %v4158_v60, %v4164_v63 }
  0x56   : > { %v1620_v35 = vor.u32 %v1619_v19, %v1618_v29  ;;  %v1623_v37 = vshll.u32 %v1622_v20, 23  ;;  %vm1335_vm6 = vcmp.gt.s32.totalorder %v1334_v0, 0  ;;  %v1858_v48 = vsel %vm1773_vm4, %v1857_v28, %v4196_v30 }
  0x57   : > { %vm3642_vm5 = vcmp.lt.s32.totalorder %v3641_v44, 0  ;;  %v1336_v18 = vsel %vm1335_vm6, %v1334_v0, 0  ;;  %v1153_v59 = vmul.u32 %v4192_v43, %v1137_v39  ;;  %vm4273_vm7 = vcmp.le.f32.partialorder %v1771_v7, 0.7853982 }
  0x58   : > { %v1624_v46 = vor.u32 4788187, %v1623_v37  ;;  %v1627_v47 = vcvt.s32.f32 %v1620_v35  ;;  %v1842_v17 = vsel %vm3642_vm5, 0, %v3641_v44  ;;  %vm1155_vm8 = vc.u32 %v4255_v27, %v4258_v50 }
  0x59   : > { %v1843_v54 = vsub.s32 32, %v1842_v17  ;;  %v1844_v56 = vshll.u32 %v4205_v55, %v1842_v17  ;;  %v1847_v57 = vsub.s32 4294967266, %v1842_v17  ;;  %v1156_v63 = vadd.s32 1, %v4259_v51 }
  0x5a   : > { %v1625_v53 = vand.u32 2147483647, %v1624_v46  ;;  %v1860_v55 = vsel %vm4273_vm7, 0, %v1858_v48  ;;  %v1338_v6 = vand.u32 31, %v1336_v18  ;;  %v4282_v43 = vand.u32 3, %v1634_v52 }
  0x5b   : > { %v1845_v30 = vshrl.u32 %v1827_v21, %v1843_v54  ;;  %v1848_v62 = vadd.s32 127, %v1847_v57  ;;  %v1157_v5 = vsel %vm1155_vm8, %v1156_v63, %v4259_v51  ;;  %v1332_v7 = vor.u32 8388608, %v4241_v22 }
  0x5c   : > { %v1628_v61 = vmul.f32 %v1627_v47, %v1625_v53  ;;  %v1158_v9 = vadd.s32 %v1157_v5, %v1153_v59  ;;  %v1339_v10 = vsub.s32 32, %v1338_v6  ;;  %v1864_v13 = vadd.s32 3, %v1860_v55 }
  0x5d   : > { %v1846_v32 = vor.u32 %v1845_v30, %v1844_v56  ;;  %v1849_v29 = vshll.u32 %v1848_v62, 23  ;;  %v4288_v14 = vand.u32 3, %v1860_v55  ;;  %v4290_v15 = vshrl.u32 %v1336_v18, 5 }
  0x5e   : > { %v1629_v8 = vxor.u32 2147483648, %v1628_v61  ;;  %v1159_v26 = vadd.s32 536870912, %v1158_v9  ;;  %v1341_v22 = vshll.u32 %v3903_v34, %v1338_v6  ;;  %v1342_v25 = vshrl.u32 %v3904_v36, %v1339_v10 }
  0x5f   : > { %v1850_v20 = vor.u32 4788187, %v1849_v29  ;;  %v1853_v12 = vcvt.s32.f32 %v1846_v32  ;;  %v1347_v28 = vshll.u32 %v3905_v38, %v1338_v6  ;;  %v1348_v37 = vshrl.u32 %v3906_v40, %v1339_v10 }
  0x60   : > { %v1630_v11 = vsel %vm1547_vm13, %v1629_v8, %v1628_v61  ;;  %v4298_v35 = vshrl.u32 %v1159_v26, 30  ;;  %v1344_v39 = vshll.u32 %v3904_v36, %v1338_v6  ;;  %v1345_v58 = vshrl.u32 %v3905_v38, %v1339_v10 }
  0x61   : > { %v1633_v19 = vsel %vm4213_vm1, %v4067_v2, %v1630_v11  ;;  %v1851_v33 = vand.u32 2147483647, %v1850_v20  ;;  %v1350_v41 = vshll.u32 %v3906_v40, %v1338_v6  ;;  %v1351_v44 = vshrl.u32 %v3907_v42, %v1339_v10 }
  0x62   : > { %3809 = vcosq.f32 %v1633_v19  ;;  %v1161_v0 = vshll.u32 %v4298_v35, 30  ;;  %v1340_v46 = vshrl.u32 %v3903_v34, %v1339_v10  ;;  %v1638_v47 = vadd.s32 3, %v1634_v52 }
  0x63   : > { %3811 = vsinq.f32 %v1633_v19  ;;  %v1854_v45 = vmul.f32 %v1853_v12, %v1851_v33  ;;  %v1343_v51 = vor.u32 %v1342_v25, %v1341_v22  ;;  %v1349_v21 = vor.u32 %v1348_v37, %v1347_v28 }
  0x64   : > { %v1353_v53 = vshll.u32 %v3907_v42, %v1338_v6  ;;  %v1354_v17 = vshrl.u32 %v3908_v49, %v1339_v10  ;;  %v4309_v18 = vsub.s32 %v1158_v9, %v1161_v0  ;;  %v1352_v54 = vor.u32 %v1351_v44, %v1350_v41 }
  0x65   : > { %v1855_v48 = vxor.u32 2147483648, %v1854_v45  ;;  %vm1359_vm9 = vcmp.lt.s32.totalorder %v4290_v15, 4  ;;  %vm1752_vm10 = vcmp.eq.s32.totalorder %v4282_v43, 0  ;;  %v4313_v56 = vand.u32 3, %v1864_v13 }
  0x66   : > { %v1346_v57 = vor.u32 %v1345_v58, %v1344_v39  ;;  %vm1356_vm11 = vcmp.lt.s32.totalorder %v4290_v15, 1  ;;  %v1361_v52 = vsel %vm1359_vm9, %v1349_v21, 2102212464  ;;  %vm1751_vm12 = vcmp.lt.s32.totalorder %v4282_v43, 2 }
  0x67   : > { %v1856_v59 = vsel %vm1773_vm4, %v1855_v48, %v1854_v45  ;;  %v1164_v61 = vsub.s32 0, %v4309_v18  ;;  %vm1358_vm13 = vcmp.lt.s32.totalorder %v4290_v15, 3  ;;  %v1360_v63 = vsel %vm1356_vm11, %v1340_v46, %v1343_v51 }
  0x68   : > { %vm1637_vm14 = vweird.f32 %v4067_v2  ;;  %v1859_v30 = vsel %vm4273_vm7, %v4070_v3, %v1856_v59  ;;  %v1355_v62 = vor.u32 %v1354_v17, %v1353_v53  ;;  %v1362_v55 = vsel %vm1358_vm13, %v1346_v57, %v1361_v52 }
  0x69   : > { %v1639_v6 = vand.u32 3, %v1638_v47  ;;  %3813 = vcosq.f32 %v1859_v30  ;;  %v3616_v8 = vmin.u32 %v1164_v61, %v4309_v18  ;;  %vm1357_vm15 = vcmp.lt.s32.totalorder %v4290_v15, 2 }
  0x6a   : > { %v1365_v5 = vsel %vm1359_vm9, %v1352_v54, 920167782  ;;  %3815 = vsinq.f32 %v1859_v30  ;;  %vm1100_vm0 = vcmp.lt.s32.totalorder %v4075_v4, 0  ;;  %v1363_v60 = vsel %vm1357_vm15, %v1360_v63, %v1362_v55 }
  0x6b   : > { %v1364_v32 = vsel %vm1356_vm11, %v1343_v51, %v1346_v57  ;;  %v1372_v29 = vshll.u32 %v1332_v7, 8  ;;  %vm1755_vm1 = vcmp.eq.s32.totalorder %v4282_v43, 2  ;;  %v1154_v9 = vadd.s32 %v4258_v50, %v4255_v27 }
  0x6c   : > { %v1166_v10 = vclz %v3616_v8  ;;  %v1184_v11 = vsub.s32 4, %v4298_v35  ;;  %v1366_v13 = vsel %vm1358_vm13, %v1349_v21, %v1365_v5  ;;  %v1368_v19 = vsel %vm1356_vm11, %v1346_v57, %v1349_v21 }
  0x6d   : > { %v1369_v20 = vsel %vm1359_vm9, %v1355_v62, 1326507024  ;;  %v1379_v12 = vmul.u32 %v1372_v29, %v1363_v60  ;;  %v1367_v22 = vsel %vm1357_vm15, %v1364_v32, %v1366_v13  ;;  %vm1640_vm2 = vcmp.lt.s32.totalorder %v1639_v6, 2 }
  0x6e   : > { %v3617_v7 = vadd.s32 4294967294, %v1166_v10  ;;  %v1370_v27 = vsel %vm1358_vm13, %v1352_v54, %v1369_v20  ;;  %vm1870_vm3 = vcmp.eq.s32.totalorder %v4313_v56, 2  ;;  %vm1981_vm4 = vcmp.eq.s32.totalorder %v4288_v14, 2 }
  0x6f   : > { %v3810_v26 = vpop.eup %3809  ;;  %v1371_v28 = vsel %vm1357_vm15, %v1368_v19, %v1370_v27  ;;  %v4358_v33 = vmul.u32.u64.low %v1372_v29, %v1367_v22  ;;  %v4359_v37 = vmul.u32.u64.high %v1372_v29, %v1367_v22, %v4358_v33  ;;  %vm1867_vm5 = vcmp.eq.s32.totalorder %v4313_v56, 0 }
  0x70   : > { %v3812_v50 = vpop.eup %3811  ;;  %v1645_v25 = vxor.u32 2147483648, %v3810_v26  ;;  %vm4366_vm7 = vcmp.le.f32.partialorder %v1098_v23, 0.7853982  ;;  %vm3618_vm8 = vcmp.lt.s32.totalorder %v3617_v7, 0  ;;  %vm1866_vm9 = vcmp.lt.s32.totalorder %v4313_v56, 2 }
  0x71   : > { %v1642_v39 = vxor.u32 2147483648, %v3812_v50  ;;  %v4370_v41 = vmul.u32.u64.low %v1372_v29, %v1371_v28  ;;  %v4371_v44 = vmul.u32.u64.high %v1372_v29, %v1371_v28, %v4370_v41  ;;  %vm1977_vm11 = vcmp.lt.s32.totalorder %v4288_v14, 2 }
  0x72   : > { %v1757_v15 = vsel %vm1755_vm1, %v1645_v25, %v3812_v50  ;;  %v1169_v45 = vsel %vm3618_vm8, 0, %v3617_v7  ;;  %vm1641_vm13 = vcmp.eq.s32.totalorder %v1639_v6, 0  ;;  %vm1644_vm15 = vcmp.eq.s32.totalorder %v1639_v6, 2 }
  0x73   : > { %v1754_v23 = vsel %vm1752_vm10, %v3810_v26, %v1642_v39  ;;  %vm1863_vm6 = vweird.f32 %v4070_v3  ;;  %v1170_v0 = vsub.s32 32, %v1169_v45  ;;  %v1171_v46 = vshll.u32 %v4309_v18, %v1169_v45 }
  0x74   : > { %v1174_v47 = vsub.s32 4294967266, %v1169_v45  ;;  %v1758_v51 = vsel %vm1751_vm12, %v1754_v23, %v1757_v15  ;;  %v1382_v21 = vadd.s32 1, %v4359_v37  ;;  %v1643_v53 = vsel %vm1641_vm13, %v3810_v26, %v1642_v39 }
  0x75   : > { %v1646_v17 = vsel %vm1644_vm15, %v1645_v25, %v3812_v50  ;;  %v1759_v48 = vsel %vm1637_vm14, nan, %v1758_v51  ;;  %v1172_v54 = vshrl.u32 %v1154_v9, %v1170_v0  ;;  %v1185_v52 = vsel %vm1100_vm0, %v1184_v11, %v4298_v35 }
  0x76   : > { %v1175_v57 = vadd.s32 127, %v1174_v47  ;;  %v1761_v59 = vcombine.high %v1759_v48, %v1759_v48  ;;  %v1762_v61 = vrot.slane %v1759_v48, 2  ;;  %vm1381_vm10 = vc.u32 %v4371_v44, %v4358_v33  ;;  %v3814_v55 = vpop.eup %3813 }
  0x77   : > { %v1647_v43 = vsel %vm1640_vm2, %v1643_v53, %v1646_v17  ;;  %vm2184_vm12 = vcmask 1042432   ;;  %v1173_v18 = vor.u32 %v1172_v54, %v1171_v46  ;;  %v1383_v30 = vsel %vm1381_vm10, %v1382_v21, %v4359_v37  ;;  %v3816_v32 = vpop.eup %3815 }
  0x78   : > { %v1176_v63 = vshll.u32 %v1175_v57, 23  ;;  %v1648_v62 = vsel %vm1637_vm14, nan, %v1647_v43  ;;  %v1763_v8 = vrot.slane %v1761_v59, 2  ;;  %1768 = vst [vmem:[#allocation2 + $0x40] ss:$-52 sps:$4 sm:$0xc1] %v1762_v61   ;;  %v1384_v5 = vadd.s32 %v1383_v30, %v1379_v12 }
  0x79   : > { %v1650_v35 = vcombine.high %v1648_v62, %v1648_v62  ;;  %v1651_v60 = vrot.slane %v1648_v62, 5  ;;  %v1871_v29 = vxor.u32 2147483648, %v3814_v55  ;;  %v1180_v10 = vcvt.s32.f32 %v1173_v18  ;;  %v2037_v62 = vld [vmem:[%s5268_s6 + $0x70] sm:$0xff] }
  0x7a   : > { %v1177_v9 = vor.u32 4788187, %v1176_v63  ;;  %v647_v6 = vcombine.high %v4064_v1, %v4064_v1  ;;  %1769 = vst [vmem:[#allocation2 + $0x38] ss:$-20 sps:$4 sm:$0xc1] %v1763_v8   ;;  %v1868_v11 = vxor.u32 2147483648, %v3816_v32  ;;  %vm1190_vm13 = vweird.f32 %v4075_v4 }
  0x7b   : > { %v1187_v13 = vsel %vm4366_vm7, 0, %v1185_v52  ;;  %v1385_v2 = vadd.s32 536870912, %v1384_v5  ;;  %v1652_v19 = vrot.slane %v1650_v35, 5  ;;  %1655 = vst [vmem:[#allocation2 + $0x8] sm:$0x38] %v1651_v60  ;;  %v1872_v20 = vsel %vm1870_vm3, %v1871_v29, %v3816_v32 }
  0x7c   : > { %v1983_v12 = vsel %vm1981_vm4, %v1871_v29, %v3816_v32  ;;  %v1178_v26 = vand.u32 2147483647, %v1177_v9  ;;  %650 = vst [vmem:[#allocation2] sm:$0x7] %v647_v6  ;;  %v655_v7 = vshrl.u32 %v654_v31, 23  ;;  %v1869_v22 = vsel %vm1867_vm5, %v3814_v55, %v1868_v11 }
  0x7d   : > { %2959 = vst [vmem:[#allocation3] sm:$0x7] %v647_v6  ;;  %vm5265_vm14 = vcmp.eq.s32.totalorder %v4288_v14, 0  ;;  %v1386_v50 = vshrl.u32 %v1385_v2, 30  ;;  %1656 = vst [vmem:[#allocation2 + $0x20] sm:$0x38] %v1652_v19  ;;  %v1873_v28 = vsel %vm1866_vm9, %v1869_v22, %v1872_v20 }
  0x7e   : > { %v1980_v27 = vsel %vm5265_vm14, %v3814_v55, %v1868_v11  ;;  %v651_v25 = vand.u32 2147483647, %v4064_v1  ;;  %v1181_v39 = vmul.f32 %v1180_v10, %v1178_v26  ;;  %v3599_v41 = vadd.s32 4294967169, %v655_v7 }
  0x7f   : > { %v1984_v37 = vsel %vm1977_vm11, %v1980_v27, %v1983_v12  ;;  %v1874_v31 = vsel %vm1863_vm6, nan, %v1873_v28  ;;  %v1191_v45 = vadd.s32 3, %v1187_v13  ;;  %v1387_v23 = vshll.u32 %v1386_v50, 30 }
  0x80   : > { %v1985_v15 = vsel %vm1863_vm6, nan, %v1984_v37  ;;  %v1876_v0 = vcombine.high %v1874_v31, %v1874_v31  ;;  %v1877_v46 = vrot.slane %v1874_v31, 7  ;;  %v1182_v51 = vxor.u32 2147483648, %v1181_v39 }
  0x81   : > { %1990 = vst [vmem:[#allocation2 + $0x38] sm:$0x70] %v1985_v15  ;;  %v1987_v47 = vcombine.low %v1985_v15, %v1985_v15  ;;  %v4418_v56 = vsub.s32 %v1384_v5, %v1387_v23  ;;  %v1410_v21 = vsub.s32 4, %v1386_v50  ;;  %v658_v14 = vand.u32 8388607, %v651_v25 }
  0x82   : > { %v661_v53 = vadd.s32 1, %v3599_v41  ;;  %v1878_v17 = vrot.slane %v1876_v0, 7  ;;  %vm2185_vm1 = vcmask 1043456   ;;  %1881 = vst [vmem:[#allocation2 + $0x40] sm:$0xe] %v1877_v46  ;;  %v1183_v3 = vsel %vm1100_vm0, %v1182_v51, %v1181_v39 }
  0x83   : > { %1989 = vst [vmem:[#allocation2 + $0x40] sm:$0x70] %v1987_v47  ;;  %v3909_v48 = vmov 65535   ;;  %v1186_v57 = vsel %vm4366_vm7, %v4075_v4, %v1183_v3  ;;  %vm1326_vm2 = vcmp.lt.s32.totalorder %v4088_v24, 0  ;;  %v1390_v52 = vsub.s32 0, %v4418_v56 }
  0x84   : > { %v2186_v54 = vsel %vm2184_vm12, 4294967295, %v3909_v48  ;;  %1882 = vst [vmem:[#allocation2 + $0x38] sm:$0xe] %v1878_v17  ;;  %3817 = vcosq.f32 %v1186_v57  ;;  %v4430_v59 = vand.u32 3, %v1191_v45  ;;  %v4432_v61 = vand.u32 3, %v1187_v13 }
  0x85   : > { %vm662_vm3 = vcmp.gt.s32.totalorder %v661_v53, 0  ;;  %3819 = vsinq.f32 %v1186_v57  ;;  %v3624_v43 = vmin.u32 %v1390_v52, %v4418_v56  ;;  %v1411_v18 = vsel %vm1326_vm2, %v1410_v21, %v1386_v50 }
  0x86   : > { %v659_v63 = vor.u32 8388608, %v658_v14  ;;  %v663_v58 = vsel %vm662_vm3, %v661_v53, 0  ;;  %v4438_v30 = vmul.f32 2.0, %v4064_v1  ;;  %vm4442_vm0 = vcmp.le.f32.partialorder %v1324_v16, 0.7853982 }
  0x87   : > { %v1392_v55 = vclz %v3624_v43  ;;  %v2187_v8 = vsel %vm2185_vm1, %v2186_v54, 0  ;;  %v1380_v5 = vadd.s32 %v4358_v33, %v4371_v44  ;;  %v4451_v35 = vsel %vm4442_vm0, 0, %v1411_v18 }
  0x88   : > { %v665_v60 = vand.u32 31, %v663_v58  ;;  %vm1197_vm4 = vcmp.eq.s32.totalorder %v4430_v59, 2  ;;  %vm1310_vm5 = vcmp.eq.s32.totalorder %v4432_v61, 2  ;;  %v4455_v29 = vshrl.u32 %v663_v58, 5 }
  0x89   : > { %v3625_v16 = vadd.s32 4294967294, %v1392_v55  ;;  %v4457_v9 = vshll.u32 %v659_v63, 8  ;;  %vm1194_vm6 = vcmp.eq.s32.totalorder %v4430_v59, 0  ;;  %vm1307_vm7 = vcmp.eq.s32.totalorder %v4432_v61, 0 }
  0x8a   : > { %v1999_v32 = vld [vmem:[#allocation2 + $0x40] sm:$0x7f]  ;;  %v666_v33 = vsub.s32 32, %v665_v60  ;;  %v668_v44 = vshll.u32 %v3903_v34, %v665_v60  ;;  %v880_v6 = vand.u32 2139095040, %v4438_v30  ;;  %v3910_v11 = vmov 0  }
  0x8b   : > { %v2005_v10 = vpack.c.bf16 %v1999_v32, %v1999_v32  ;;  %2226 = vmatprep.mubr.bf16.mxu0 %v3910_v11  ;;  %3781 = vset.pattern.permute.xlu0 %v3910_v11  ;;  %v2000_v13 = vld [vmem:[#allocation2 + $0x38] sm:$0x7f]  ;;  %vm1193_vm8 = vcmp.lt.s32.totalorder %v4430_v59, 2  ;;  %vm1306_vm9 = vcmp.lt.s32.totalorder %v4432_v61, 2  ;;  %vm3626_vm11 = vcmp.lt.s32.totalorder %v3625_v16, 0 }
  0x8c   : > { %v671_v2 = vshll.u32 %v3904_v36, %v665_v60  ;;  %v674_v19 = vshll.u32 %v3905_v38, %v665_v60  ;;  %v677_v20 = vshll.u32 %v3906_v40, %v665_v60  ;;  %3782 = vset.pattern.permute.xlu1 %v3910_v11  ;;  %2547 = vmatprep.mubr.bf16.mxu1 %v3910_v11  ;;  %v1395_v7 = vsel %vm3626_vm11, 0, %v3625_v16 }
  0x8d   : > { %v2006_v12 = vpack.c.bf16 %v2000_v13, %v2000_v13  ;;  %v2189_v26 = vand.u32 %v2187_v8, %v2005_v10  ;;  %v680_v22 = vshll.u32 %v3907_v42, %v665_v60  ;;  %v1396_v27 = vsub.s32 32, %v1395_v7  ;;  %2111 = vperm.xlu0 %3781, %v2037_v62  }
  0x8e   : > { %v1397_v50 = vshll.u32 %v4418_v56, %v1395_v7  ;;  %v1400_v28 = vsub.s32 4294967266, %v1395_v7  ;;  %v669_v37 = vshrl.u32 %v3904_v36, %v666_v33  ;;  %v672_v41 = vshrl.u32 %v3905_v38, %v666_v33 }
  0x8f   : > { %v2192_v39 = vand.u32 %v2187_v8, %v2006_v12  ;;  %v675_v31 = vshrl.u32 %v3906_v40, %v666_v33  ;;  %v678_v15 = vshrl.u32 %v3907_v42, %v666_v33  ;;  %v1398_v45 = vshrl.u32 %v1380_v5, %v1396_v27 }
  0x90   : > { %v1401_v23 = vadd.s32 127, %v1400_v28  ;;  %v667_v0 = vshrl.u32 %v3903_v34, %v666_v33  ;;  %v681_v46 = vshrl.u32 %v3908_v49, %v666_v33  ;;  %v670_v47 = vor.u32 %v669_v37, %v668_v44 }
  0x91   : > { %2204 = vmatprep.subr.bf16.mxu0 %v2192_v39  ;;  %v673_v51 = vor.u32 %v672_v41, %v671_v2  ;;  %v676_v56 = vor.u32 %v675_v31, %v674_v19  ;;  %v679_v21 = vor.u32 %v678_v15, %v677_v20  ;;  %v3818_v14 = vpop.eup %3817  ;;  %v1399_v53 = vor.u32 %v1398_v45, %v1397_v50 }
  0x92   : > { %2205 = vmatpush1.bf16.msra.mxu0 %v2189_v26  ;;  %v1402_v17 = vshll.u32 %v1401_v23, 23  ;;  %v682_v3 = vor.u32 %v681_v46, %v680_v22  ;;  %vm683_vm15 = vcmp.lt.s32.totalorder %v4455_v29, 1  ;;  %v3820_v48 = vpop.eup %3819  ;;  %v1198_v54 = vxor.u32 2147483648, %v3818_v14 }
  0x93   : > { %vm684_vm10 = vcmp.lt.s32.totalorder %v4455_v29, 2  ;;  %vm685_vm14 = vcmp.lt.s32.totalorder %v4455_v29, 3  ;;  %vm686_vm1 = vcmp.lt.s32.totalorder %v4455_v29, 4  ;;  %v1195_v57 = vxor.u32 2147483648, %v3820_v48 }
  0x94   : > { %v1403_v52 = vor.u32 4788187, %v1402_v17  ;;  %v1406_v43 = vcvt.s32.f32 %v1399_v53  ;;  %v688_v18 = vsel %vm686_vm1, %v676_v56, 2102212464  ;;  %v1199_v63 = vsel %vm1197_vm4, %v1198_v54, %v3820_v48 }
  0x95   : > { %v1312_v58 = vsel %vm1310_vm5, %v1198_v54, %v3820_v48  ;;  %v687_v55 = vsel %vm683_vm15, %v667_v0, %v670_v47  ;;  %v689_v8 = vsel %vm685_vm14, %v673_v51, %v688_v18  ;;  %v1196_v5 = vsel %vm1194_vm6, %v3818_v14, %v1195_v57 }
  0x96   : > { %v1309_v60 = vsel %vm1307_vm7, %v3818_v14, %v1195_v57  ;;  %v1404_v32 = vand.u32 2147483647, %v1403_v52  ;;  %v691_v16 = vsel %vm683_vm15, %v670_v47, %v673_v51  ;;  %v1200_v10 = vsel %vm1193_vm8, %v1196_v5, %v1199_v63  ;;  %v2038_v5 = vld [vmem:[%s5268_s6 + $0x78] sm:$0xff] }
  0x97   : > { %v1313_v33 = vsel %vm1306_vm9, %v1309_v60, %v1312_v58  ;;  %v692_v44 = vsel %vm686_vm1, %v679_v21, 920167782  ;;  %v695_v13 = vsel %vm683_vm15, %v673_v51, %v676_v56  ;;  %v1201_v2 = vsel %vm1190_vm13, nan, %v1200_v10  ;;  %v2035_v60 = vld [vmem:[%s5268_s6 + $0x60] sm:$0xff]  ;;  %2116 = vperm.xlu0 %3781, %v2038_v5  }
  0x98   : > { %v1314_v19 = vsel %vm1190_vm13, nan, %v1313_v33  ;;  %v1407_v20 = vmul.f32 %v1406_v43, %v1404_v32  ;;  %v693_v59 = vsel %vm685_vm14, %v676_v56, %v692_v44  ;;  %v1203_v12 = vcombine.high %v1201_v2, %v1201_v2  ;;  %2101 = vperm.xlu1 %3782, %v2035_v60  }
  0x99   : > { %v1316_v26 = vcombine.high %v1314_v19, %v1314_v19  ;;  %v1204_v61 = vrot.slane %v1201_v2, 1  ;;  %v1317_v7 = vrot.slane %v1314_v19, 6  ;;  %v690_v27 = vsel %vm684_vm10, %v687_v55, %v689_v8  ;;  %v2036_v2 = vld [vmem:[%s5268_s6 + $0x68] sm:$0xff]  ;;  %v2033_v19 = vld [vmem:[%s5268_s6 + $0x50] sm:$0xff] }
  0x9a   : > { %v1408_v22 = vxor.u32 2147483648, %v1407_v20  ;;  %v694_v50 = vsel %vm684_vm10, %v691_v16, %v693_v59  ;;  %v696_v28 = vsel %vm686_vm1, %v682_v3, 1326507024  ;;  %v1205_v4 = vrot.slane %v1203_v12, 1 }
  0x9b   : > { %v1318_v37 = vrot.slane %v1316_v26, 6  ;;  %1210 = vst [vmem:[#allocation2 + $0x48] ss:$-44 sps:$4 sm:$0x83] %v1204_v61   ;;  %1321 = vst [vmem:[#allocation2 + $0x48] sm:$0x1c] %v1317_v7  ;;  %v697_v39 = vsel %vm685_vm14, %v679_v21, %v696_v28  ;;  %v4530_v45 = vmul.u32.u64.low %v4457_v9, %v694_v50  ;;  %v4531_v23 = vmul.u32.u64.high %v4457_v9, %v694_v50, %v4530_v45  ;;  %2091 = vperm.xlu0 %3781, %v2033_v19  }
  0x9c   : > { %v881_v41 = vshrl.u32 %v880_v6, 23  ;;  %v1409_v31 = vsel %vm1326_vm2, %v1408_v22, %v1407_v20  ;;  %v698_v15 = vsel %vm684_vm10, %v695_v13, %v697_v39  ;;  %1211 = vst [vmem:[#allocation2 + $0x28] ss:$-20 sps:$4 sm:$0x83] %v1205_v4   ;;  %v877_v29 = vand.u32 2147483647, %v4438_v30  ;;  %2106 = vperm.xlu1 %3782, %v2036_v2  }
  0x9d   : > { %1322 = vst [vmem:[#allocation2 + $0x28] sm:$0x1c] %v1318_v37  ;;  %v1412_v0 = vsel %vm4442_vm0, %v4088_v24, %v1409_v31  ;;  %v4538_v46 = vmul.u32.u64.low %v4457_v9, %v698_v15  ;;  %v4539_v6 = vmul.u32.u64.high %v4457_v9, %v698_v15, %v4538_v46  ;;  %v1417_v51 = vadd.s32 3, %v4451_v35  ;;  %v2030_v2 = vld [vmem:[%s5268_s6 + $0x38] sm:$0xff]  ;;  %v2027_v19 = vld [vmem:[%s5268_s6 + $0x20] sm:$0xff] }
  0x9e   : > { %v3607_v47 = vadd.s32 4294967169, %v881_v41  ;;  %3821 = vcosq.f32 %v1412_v0  ;;  %v706_v56 = vmul.u32 %v4457_v9, %v690_v27  ;;  %v709_v14 = vadd.s32 1, %v4531_v23  ;;  %v2031_v46 = vld [vmem:[%s5268_s6 + $0x40] sm:$0xff] }
  0x9f   : > { %3823 = vsinq.f32 %v1412_v0  ;;  %vm708_vm2 = vc.u32 %v4539_v6, %v4530_v45  ;;  %v1529_v53 = vand.u32 3, %v4451_v35  ;;  %v884_v3 = vand.u32 8388607, %v877_v29  ;;  %v2034_v0 = vld [vmem:[%s5268_s6 + $0x58] sm:$0xff]  ;;  %2081 = vperm.xlu0 %3781, %v2031_v46   ;;  %v2024_v46 = vld [vmem:[%s5268_s6 + $0x8] sm:$0xff] }
  0xa0   : > { %v887_v21 = vadd.s32 1, %v3607_v47  ;;  %v710_v17 = vsel %vm708_vm2, %v709_v14, %v4531_v23  ;;  %v1418_v48 = vand.u32 3, %v1417_v51  ;;  %vm1416_vm0 = vweird.f32 %v4088_v24  ;;  %2096 = vperm.xlu1 %3782, %v2034_v0   ;;  %v2029_v24 = vld [vmem:[%s5268_s6 + $0x30] sm:$0xff] }
  0xa1   : > { %v711_v54 = vadd.s32 %v710_v17, %v706_v56  ;;  %vm1530_vm4 = vcmp.lt.s32.totalorder %v1529_v53, 2  ;;  %vm1531_vm5 = vcmp.eq.s32.totalorder %v1529_v53, 0  ;;  %v885_v18 = vor.u32 8388608, %v884_v3  ;;  %v2032_v3 = vld [vmem:[%s5268_s6 + $0x48] sm:$0xff] }
  0xa2   : > { %vm888_vm3 = vcmp.gt.s32.totalorder %v887_v21, 0  ;;  %vm1419_vm6 = vcmp.lt.s32.totalorder %v1418_v48, 2  ;;  %vm1534_vm7 = vcmp.eq.s32.totalorder %v1529_v53, 2  ;;  %vm1420_vm8 = vcmp.eq.s32.totalorder %v1418_v48, 0 }
  0xa3   : > { %v889_v9 = vsel %vm888_vm3, %v887_v21, 0  ;;  %v712_v52 = vadd.s32 536870912, %v711_v54  ;;  %vm1423_vm9 = vcmp.eq.s32.totalorder %v1418_v48, 2  ;;  %v4574_v13 = vshll.u32 %v885_v18, 8  ;;  %2071 = vperm.xlu0 %3781, %v2029_v24  }
  0xa4   : > { %v891_v57 = vand.u32 31, %v889_v9  ;;  %v4557_v35 = vshrl.u32 %v889_v9, 5  ;;  %2086 = vperm.xlu1 %3782, %v2032_v3   ;;  %vm653_vm2 = vcmp.lt.s32.totalorder %v4064_v1, 0  ;;  %vm652_vm3 = vcmp.le.f32.partialorder %v651_v25, 0.7853982  ;;  %v2383_v25 = vld [vmem:[%s5269_s8 + $0x60] sm:$0xff] }
  0xa5   : > { %v4555_v63 = vshrl.u32 %v712_v52, 30 }
  0xa6   : > { %v892_v43 = vsub.s32 32, %v891_v57  ;;  %v894_v58 = vshll.u32 %v3903_v34, %v891_v57  ;;  %v897_v8 = vshll.u32 %v3904_v36, %v891_v57  ;;  %v903_v10 = vshll.u32 %v3906_v40, %v891_v57 }
  0xa7   : > { %v714_v32 = vshll.u32 %v4555_v63, 30  ;;  %v906_v12 = vshll.u32 %v3907_v42, %v891_v57  ;;  %vm909_vm11 = vcmp.lt.s32.totalorder %v4557_v35, 1  ;;  %vm910_vm13 = vcmp.lt.s32.totalorder %v4557_v35, 2  ;;  %2061 = vperm.xlu0 %3781, %v2027_v19  }
  0xa8   : > { %v895_v55 = vshrl.u32 %v3904_v36, %v892_v43  ;;  %v898_v16 = vshrl.u32 %v3905_v38, %v892_v43  ;;  %v904_v33 = vshrl.u32 %v3907_v42, %v892_v43  ;;  %v900_v36 = vshll.u32 %v3905_v38, %v891_v57  ;;  %2076 = vperm.xlu1 %3782, %v2030_v2  }
  0xa9   : > { %v901_v44 = vshrl.u32 %v3906_v40, %v892_v43  ;;  %v4582_v59 = vsub.s32 %v711_v54, %v714_v32  ;;  %v907_v26 = vshrl.u32 %v3908_v49, %v892_v43  ;;  %v893_v61 = vshrl.u32 %v3903_v34, %v892_v43 }
  0xaa   : > { %v896_v7 = vor.u32 %v895_v55, %v894_v58  ;;  %v899_v50 = vor.u32 %v898_v16, %v897_v8  ;;  %v905_v28 = vor.u32 %v904_v33, %v903_v10  ;;  %vm912_vm15 = vcmp.lt.s32.totalorder %v4557_v35, 4 }
  0xab   : > { %v3822_v20 = vpop.eup %3821  ;;  %v717_v27 = vsub.s32 0, %v4582_v59  ;;  %v902_v4 = vor.u32 %v901_v44, %v900_v36  ;;  %v908_v41 = vor.u32 %v907_v26, %v906_v12  ;;  %vm911_vm10 = vcmp.lt.s32.totalorder %v4557_v35, 3 }
  0xac   : > { %v3824_v38 = vpop.eup %3823  ;;  %v1424_v40 = vxor.u32 2147483648, %v3822_v20  ;;  %v918_v21 = vsel %vm912_vm15, %v905_v28, 920167782  ;;  %v917_v17 = vsel %vm909_vm11, %v896_v7, %v899_v50  ;;  %v913_v48 = vsel %vm909_vm11, %v893_v61, %v896_v7 }
  0xad   : > { %v1421_v22 = vxor.u32 2147483648, %v3824_v38  ;;  %v3600_v39 = vmin.u32 %v717_v27, %v4582_v59  ;;  %v914_v23 = vsel %vm912_vm15, %v902_v4, 2102212464  ;;  %v919_v52 = vsel %vm911_vm10, %v902_v4, %v918_v21 }
  0xae   : > { %v1425_v42 = vsel %vm1423_vm9, %v1424_v40, %v3824_v38  ;;  %v1536_v49 = vsel %vm1534_vm7, %v1424_v40, %v3824_v38  ;;  %v915_v54 = vsel %vm911_vm10, %v899_v50, %v914_v23  ;;  %v921_v43 = vsel %vm909_vm11, %v899_v50, %v902_v4  ;;  %v2028_v38 = vld [vmem:[%s5268_s6 + $0x28] sm:$0xff]  ;;  %v2025_v40 = vld [vmem:[%s5268_s6 + $0x10] sm:$0xff] }
  0xaf   : > { %v1422_v37 = vsel %vm1420_vm8, %v3822_v20, %v1421_v22  ;;  %v1533_v34 = vsel %vm1531_vm5, %v3822_v20, %v1421_v22  ;;  %v719_v56 = vclz %v3600_v39  ;;  %v922_v18 = vsel %vm912_vm15, %v908_v41, 1326507024  ;;  %2066 = vperm.xlu1 %3782, %v2028_v38   ;;  %2051 = vperm.xlu0 %3781, %v2025_v40   ;;  %v2026_v41 = vld [vmem:[%s5268_s6 + $0x18] sm:$0xff]  ;;  %v2375_v38 = vld [vmem:[%s5269_s8 + $0x20] sm:$0xff] }
  0xb0   : > { %v1426_v31 = vsel %vm1419_vm6, %v1422_v37, %v1425_v42  ;;  %v1537_v15 = vsel %vm1530_vm4, %v1533_v34, %v1536_v49  ;;  %v707_v58 = vadd.s32 %v4530_v45, %v4539_v6  ;;  %v920_v55 = vsel %vm910_vm13, %v917_v17, %v919_v52  ;;  %v2386_v17 = vld [vmem:[%s5269_s8 + $0x78] sm:$0xff] }
  0xb1   : > { %v1427_v47 = vsel %vm1416_vm0, nan, %v1426_v31  ;;  %v1538_v51 = vsel %vm1416_vm0, nan, %v1537_v15  ;;  %v3601_v9 = vadd.s32 4294967294, %v719_v56  ;;  %v923_v8 = vsel %vm911_vm10, %v905_v28, %v922_v18  ;;  %v2023_v31 = vld [vmem:[%s5268_s6] sm:$0xff]  ;;  %s5274_s6 = sld [smem:[#allocation10_spill]] }
  0xb2   : > { %v1429_v14 = vcombine.high %v1427_v47, %v1427_v47  ;;  %v1540_v62 = vcombine.high %v1538_v51, %v1538_v51  ;;  %1542 = vst [vmem:[#allocation2 + $0x8] sm:$0x7] %v1538_v51  ;;  %v1430_v53 = vrot.slane %v1427_v47, 3  ;;  %v924_v60 = vsel %vm910_vm13, %v921_v43, %v923_v8  ;;  %v2385_v51 = vld [vmem:[%s5269_s8 + $0x70] sm:$0xff]  ;;  %v2382_v43 = vld [vmem:[%s5269_s8 + $0x58] sm:$0xff]  ;;  %v2379_v18 = vld [vmem:[%s5269_s8 + $0x40] sm:$0xff] }
  0xb3   : > { %vm3602_vm14 = vcmp.lt.s32.totalorder %v3601_v9, 0  ;;  %v4640_v32 = vmul.u32.u64.low %v4574_v13, %v920_v55  ;;  %v4641_v16 = vmul.u32.u64.high %v4574_v13, %v920_v55, %v4640_v32  ;;  %v916_v33 = vsel %vm910_vm13, %v913_v48, %v915_v54  ;;  %2056 = vperm.xlu1 %3782, %v2026_v41   ;;  %2041 = vperm.xlu0 %3781, %v2023_v31   ;;  %v2381_v48 = vld [vmem:[%s5269_s8 + $0x50] sm:$0xff] }
  0xb4   : > { %v1431_v57 = vrot.slane %v1429_v14, 3  ;;  %1543 = vst [vmem:[#allocation2 + $0x20] sm:$0x7] %v1540_v62  ;;  %1434 = vst [vmem:[#allocation2 + $0x48] sm:$0xe0] %v1430_v53  ;;  %v722_v5 = vsel %vm3602_vm14, 0, %v3601_v9  ;;  %v4648_v36 = vmul.u32.u64.low %v4574_v13, %v924_v60  ;;  %v4649_v44 = vmul.u32.u64.high %v4574_v13, %v924_v60, %v4648_v36 }
  0xb5   : > { %v723_v45 = vsub.s32 32, %v722_v5  ;;  %v724_v6 = vshll.u32 %v4582_v59, %v722_v5  ;;  %v727_v10 = vsub.s32 4294967266, %v722_v5  ;;  %v932_v35 = vmul.u32 %v4574_v13, %v916_v33 }
  0xb6   : > { %1435 = vst [vmem:[#allocation2 + $0x28] sm:$0xe0] %v1431_v57  ;;  %v935_v26 = vadd.s32 1, %v4641_v16  ;;  %vm934_vm1 = vc.u32 %v4649_v44, %v4640_v32  ;;  %v737_v23 = vsub.s32 4, %v4555_v63  ;;  %v933_v8 = vadd.s32 %v4640_v32, %v4649_v44 }
  0xb7   : > { %v725_v20 = vshrl.u32 %v707_v58, %v723_v45  ;;  %v728_v12 = vadd.s32 127, %v727_v10  ;;  %2046 = vperm.xlu1 %3782, %v2024_v46   ;;  %2459 = vperm.xlu0 %3781, %v2385_v51   ;;  %v2377_v10 = vld [vmem:[%s5269_s8 + $0x30] sm:$0xff]  ;;  %vm743_vm11 = vweird.f32 %v4064_v1  ;;  %vm879_vm13 = vcmp.lt.s32.totalorder %v4438_v30, 0  ;;  %v2374_v51 = vld [vmem:[%s5269_s8 + $0x18] sm:$0xff]  ;;  %s619_s18 = scalar_lea.vmem %s5274_s6, %s4058_s23 }
  0xb8   : > { %v936_v49 = vsel %vm934_vm1, %v935_v26, %v4641_v16  ;;  %v738_v14 = vsel %vm653_vm2, %v737_v23, %v4555_v63  ;;  %v2384_v63 = vld [vmem:[%s5269_s8 + $0x68] sm:$0xff]  ;;  %vm4735_vm15 = vcmp.le.f32.partialorder %v877_v29, 0.7853982 }
  0xb9   : > { %v1997_v59 = vld [vmem:[#allocation2 + $0x8] sm:$0xff]  ;;  %v726_v22 = vor.u32 %v725_v20, %v724_v6  ;;  %v729_v27 = vshll.u32 %v728_v12, 23  ;;  %v937_v37 = vadd.s32 %v936_v49, %v932_v35  ;;  %v740_v24 = vsel %vm652_vm3, 0, %v738_v14 }
  0xba   : > { %v744_v54 = vadd.s32 3, %v740_v24  ;;  %v856_v55 = vand.u32 3, %v740_v24  ;;  %v2380_v6 = vld [vmem:[%s5269_s8 + $0x48] sm:$0xff] }
  0xbb   : > { %v1998_v61 = vld [vmem:[#allocation2 + $0x20] sm:$0xff]  ;;  %v1995_v7 = vld [vmem:[#allocation2 + $0x48] sm:$0xff]  ;;  %v730_v13 = vor.u32 4788187, %v729_v27  ;;  %v733_v42 = vcvt.s32.f32 %v726_v22  ;;  %v938_v39 = vadd.s32 536870912, %v937_v37  ;;  %2464 = vperm.xlu1 %3782, %v2386_v17   ;;  %2449 = vperm.xlu0 %3781, %v2383_v25  }
  0xbc   : > { %v2003_v28 = vpack.c.bf16 %v1997_v59, %v1995_v7  ;;  %v745_v58 = vand.u32 3, %v744_v54  ;;  %vm861_vm5 = vcmp.eq.s32.totalorder %v856_v55, 2  ;;  %vm857_vm7 = vcmp.lt.s32.totalorder %v856_v55, 2  ;;  %v2378_v59 = vld [vmem:[%s5269_s8 + $0x38] sm:$0xff]  ;;  %v2985_v24 = vld [vmem:[%s5243_s12 + $0x28] sm:$0xff] }
  0xbd   : > { %v1996_v50 = vld [vmem:[#allocation2 + $0x28] sm:$0xff]  ;;  %v731_v34 = vand.u32 2147483647, %v730_v13  ;;  %v4676_v0 = vshrl.u32 %v938_v39, 30  ;;  %vm858_vm8 = vcmp.eq.s32.totalorder %v856_v55, 0  ;;  %v2373_v39 = vld [vmem:[%s5269_s8 + $0x10] sm:$0xff] }
  0xbe   : > { %v2004_v4 = vpack.c.bf16 %v1998_v61, %v1996_v50  ;;  %vm750_vm4 = vcmp.eq.s32.totalorder %v745_v58, 2  ;;  %vm747_vm6 = vcmp.eq.s32.totalorder %v745_v58, 0  ;;  %vm746_vm9 = vcmp.lt.s32.totalorder %v745_v58, 2  ;;  %v2983_v54 = vld [vmem:[%s5243_s12 + $0x18] sm:$0xff] }
  0xbf   : > { %v734_v15 = vmul.f32 %v733_v42, %v731_v34  ;;  %v940_v56 = vshll.u32 %v4676_v0, 30  ;;  %2454 = vperm.xlu1 %3782, %v2384_v63   ;;  %2439 = vperm.xlu0 %3781, %v2381_v48   ;;  %v963_v23 = vsub.s32 4, %v4676_v0  ;;  %v2982_v48 = vld [vmem:[%s5243_s12 + $0x10] sm:$0xff] }
  0xc0   : > { %2206 = vmatprep.subr.bf16.mxu0 %v2004_v4 }
  0xc1   : > { %2207 = vmatpush1.bf16.msra.mxu0 %v2003_v28  ;;  %v735_v47 = vxor.u32 2147483648, %v734_v15  ;;  %v941_v53 = vsub.s32 %v937_v37, %v940_v56  ;;  %v2371_v56 = vld [vmem:[%s5269_s8] sm:$0xff]  ;;  %v964_v14 = vsel %vm879_vm13, %v963_v23, %v4676_v0  ;;  %v2987_v0 = vld [vmem:[%s5243_s12 + $0x38] sm:$0xff] }
  0xc2   : > { %v966_v17 = vsel %vm4735_vm15, 0, %v964_v14 }
  0xc3   : > { %v736_v21 = vsel %vm653_vm2, %v735_v47, %v734_v15  ;;  %v943_v3 = vsub.s32 0, %v941_v53  ;;  %2444 = vperm.xlu1 %3782, %v2382_v43   ;;  %2429 = vperm.xlu0 %3781, %v2379_v18   ;;  %v970_v25 = vadd.s32 3, %v966_v17  ;;  %v1082_v63 = vand.u32 3, %v966_v17 }
  0xc4   : > { %v739_v62 = vsel %vm652_vm3, %v4064_v1, %v736_v21  ;;  %v2376_v1 = vld [vmem:[%s5269_s8 + $0x28] sm:$0xff] }
  0xc5   : > { %3825 = vcosq.f32 %v739_v62  ;;  %v3608_v9 = vmin.u32 %v943_v3, %v941_v53  ;;  %v2984_v3 = vld [vmem:[%s5243_s12 + $0x20] sm:$0xff]  ;;  %vm1087_vm14 = vcmp.eq.s32.totalorder %v1082_v63, 2  ;;  %vm1084_vm2 = vcmp.eq.s32.totalorder %v1082_v63, 0 }
  0xc6   : > { %3827 = vsinq.f32 %v739_v62  ;;  %v2372_v62 = vld [vmem:[%s5269_s8 + $0x8] sm:$0xff]  ;;  %s5183_s8 = scalar_lea.hbm %s5248_s17, %s3705_s22 }
  0xc7   : > { %v945_v57 = vclz %v3608_v9  ;;  %2434 = vperm.xlu1 %3782, %v2380_v6   ;;  %2419 = vperm.xlu0 %3781, %v2377_v10   ;;  %v971_v9 = vand.u32 3, %v970_v25 }
  0xc9   : > { %v3609_v52 = vadd.s32 4294967294, %v945_v57  ;;  %vm976_vm10 = vcmp.eq.s32.totalorder %v971_v9, 2  ;;  %vm973_vm1 = vcmp.eq.s32.totalorder %v971_v9, 0  ;;  %vm972_vm3 = vcmp.lt.s32.totalorder %v971_v9, 2 }
  0xcb   : > { %vm3610_vm0 = vcmp.lt.s32.totalorder %v3609_v52, 0  ;;  %2424 = vperm.xlu1 %3782, %v2378_v59   ;;  %2409 = vperm.xlu0 %3781, %v2375_v38   ;;  %v3174_v59 = vld [vmem:[%s5245_s14 + $0x10] sm:$0xff] }
  0xcc   : > { %v948_v5 = vsel %vm3610_vm0, 0, %v3609_v52  ;;  %v2980_v52 = vld [vmem:[%s5243_s12] sm:$0xff]  ;;  %vm1083_vm0 = vcmp.lt.s32.totalorder %v1082_v63, 2 }
  0xcd   : > { %v949_v60 = vsub.s32 32, %v948_v5  ;;  %v950_v16 = vshll.u32 %v941_v53, %v948_v5  ;;  %v953_v45 = vsub.s32 4294967266, %v948_v5  ;;  %v2986_v53 = vld [vmem:[%s5243_s12 + $0x30] sm:$0xff]  ;;  %v2981_v5 = vld [vmem:[%s5243_s12 + $0x8] sm:$0xff] }
  0xcf   : > { %v951_v36 = vshrl.u32 %v933_v8, %v949_v60  ;;  %v954_v32 = vadd.s32 127, %v953_v45  ;;  %2414 = vperm.xlu1 %3782, %v2376_v1   ;;  %2399 = vperm.xlu0 %3781, %v2373_v39   ;;  %v3178_v45 = vld [vmem:[%s5245_s14 + $0x30] sm:$0xff]  ;;  %v3785_v1 = vld [vmem:[%s5272_s5 + $0x8] sm:$0xff]  }
  0xd0   : > { %v3790_v39 = vld [vmem:[%s5272_s5 + $0x30] sm:$0xff]  }
  0xd1   : > { %v952_v20 = vor.u32 %v951_v36, %v950_v16  ;;  %v955_v12 = vshll.u32 %v954_v32, 23 }
  0xd2   : > { %v3826_v33 = vpop.eup %3825 }
  0xd3   : > { %v3828_v44 = vpop.eup %3827  ;;  %v751_v2 = vxor.u32 2147483648, %v3826_v33  ;;  %v956_v7 = vor.u32 4788187, %v955_v12  ;;  %v959_v22 = vcvt.s32.f32 %v952_v20  ;;  %2404 = vperm.xlu1 %3782, %v2374_v51   ;;  %2389 = vperm.xlu0 %3781, %v2371_v56   ;;  %v3177_v12 = vld [vmem:[%s5245_s14 + $0x28] sm:$0xff] }
  0xd4   : > { %v748_v19 = vxor.u32 2147483648, %v3828_v44 }
  0xd5   : > { %v752_v35 = vsel %vm750_vm4, %v751_v2, %v3828_v44  ;;  %v863_v26 = vsel %vm861_vm5, %v751_v2, %v3828_v44  ;;  %v957_v42 = vand.u32 2147483647, %v956_v7  ;;  %vm969_vm4 = vweird.f32 %v4438_v30  ;;  %v3179_v2 = vld [vmem:[%s5245_s14 + $0x38] sm:$0xff] }
  0xd6   : > { %v749_v40 = vsel %vm747_vm6, %v3826_v33, %v748_v19  ;;  %v860_v61 = vsel %vm858_vm8, %v3826_v33, %v748_v19  ;;  %v3176_v19 = vld [vmem:[%s5245_s14 + $0x20] sm:$0xff]  ;;  %vm2159_vm5 = vcmask 318464  }
  0xd7   : > { %v753_v27 = vsel %vm746_vm9, %v749_v40, %v752_v35  ;;  %v864_v50 = vsel %vm857_vm7, %v860_v61, %v863_v26  ;;  %v960_v41 = vmul.f32 %v959_v22, %v957_v42  ;;  %2394 = vperm.xlu1 %3782, %v2372_v62   ;;  %3020 = vperm.xlu0 %3781, %v2986_v53   ;;  %v3175_v26 = vld [vmem:[%s5245_s14 + $0x18] sm:$0xff]  ;;  %v3172_v61 = vld [vmem:[%s5245_s14] sm:$0xff]  ;;  %vm3048_vm9 = vcmask 48128  }
  0xd8   : > { %v754_v28 = vsel %vm743_vm11, nan, %v753_v27  ;;  %v865_v13 = vsel %vm743_vm11, nan, %v864_v50  ;;  %v3173_v50 = vld [vmem:[%s5245_s14 + $0x8] sm:$0xff]  ;;  %v2677_v42 = vld [vmem:[%s5273_s10] sm:$0x3f]  ;;  %s3912_s10 = smov [#allocation5]  }
  0xd9   : > { %v756_v49 = vcombine.high %v754_v28, %v754_v28  ;;  %v867_v4 = vcombine.high %v865_v13, %v865_v13  ;;  %v757_v37 = vrot.slane %v754_v28, 5  ;;  %v868_v34 = vrot.slane %v865_v13, 2  ;;  %v3351_v28 = vld [vmem:[#allocation4] sm:$0x1]  ;;  %s3845_s0 = sshll.u32 %s3912_s10, 4  ;;  %s3846_s0 = int_to_ptr.vmem [resolvable:$false] %s3845_s0 }
  0xda   : > { %v961_v47 = vxor.u32 2147483648, %v960_v41  ;;  %v3784_v13 = vld [vmem:[%s5272_s5] sm:$0xff]   ;;  %s3847_s6 = scalar_lea.vmem %s3846_s0, 1024 }
  0xdb   : > { %v758_v31 = vrot.slane %v756_v49, 5  ;;  %v869_v15 = vrot.slane %v867_v4, 2  ;;  %761 = vst [vmem:[#allocation2 + $0x30] sm:$0x38] %v757_v37  ;;  %3025 = vperm.xlu1 %3782, %v2987_v0   ;;  %3010 = vperm.xlu0 %3781, %v2984_v3   ;;  %v3786_v49 = vld [vmem:[%s5272_s5 + $0x10] sm:$0xff]   ;;  %v3787_v4 = vld [vmem:[%s5272_s5 + $0x18] sm:$0xff]  }
  0xdc   : > { %872 = vst [vmem:[#allocation2 + $0x18] ss:$28 sps:$4 sm:$0xc1] %v868_v34   ;;  %v962_v21 = vsel %vm879_vm13, %v961_v47, %v960_v41  ;;  %v3788_v37 = vld [vmem:[%s5272_s5 + $0x20] sm:$0xff]   ;;  %v3789_v34 = vld [vmem:[%s5272_s5 + $0x28] sm:$0xff]   ;;  %v3791_v41 = vld [vmem:[%s5272_s5 + $0x38] sm:$0xff]  }
  0xdd   : > { %762 = vst [vmem:[#allocation2] sm:$0x38] %v758_v31  ;;  %873 = vst [vmem:[#allocation2 + $0x10] ss:$-12 sps:$4 sm:$0xc1] %v869_v15   ;;  %v965_v29 = vsel %vm4735_vm15, %v4438_v30, %v962_v21 }
  0xde   : > { %3829 = vcosq.f32 %v965_v29 }
  0xdf   : > { %3831 = vsinq.f32 %v965_v29  ;;  %3015 = vperm.xlu1 %3782, %v2985_v24   ;;  %3000 = vperm.xlu0 %3781, %v2982_v48  }
  0xe3   : > { %3005 = vperm.xlu1 %3782, %v2983_v54   ;;  %2990 = vperm.xlu0 %3781, %v2980_v52   ;;  %v1991_v35 = vld [vmem:[#allocation2 + $0x30] sm:$0xff] }
  0xe4   : > { %v1992_v38 = vld [vmem:[#allocation2] sm:$0xff] }
  0xe7   : > { %2995 = vperm.xlu1 %3782, %v2981_v5   ;;  %3212 = vperm.xlu0 %3781, %v3178_v45  }
  0xeb   : > { %v3830_v57 = vpop.eup %3829  ;;  %3217 = vperm.xlu1 %3782, %v3179_v2   ;;  %3202 = vperm.xlu0 %3781, %v3176_v19  }
  0xec   : > { %v3832_v43 = vpop.eup %3831  ;;  %v977_v18 = vxor.u32 2147483648, %v3830_v57 }
  0xed   : > { %v974_v58 = vxor.u32 2147483648, %v3832_v43 }
  0xee   : > { %v978_v55 = vsel %vm976_vm10, %v977_v18, %v3832_v43  ;;  %v1089_v8 = vsel %vm1087_vm14, %v977_v18, %v3832_v43 }
  0xef   : > { %v975_v60 = vsel %vm973_vm1, %v3830_v57, %v974_v58  ;;  %v1086_v16 = vsel %vm1084_vm2, %v3830_v57, %v974_v58  ;;  %3207 = vperm.xlu1 %3782, %v3177_v12   ;;  %3192 = vperm.xlu0 %3781, %v3174_v59  }
  0xf0   : > { %v979_v6 = vsel %vm972_vm3, %v975_v60, %v978_v55  ;;  %v1090_v10 = vsel %vm1083_vm0, %v1086_v16, %v1089_v8 }
  0xf1   : > { %v980_v33 = vsel %vm969_vm4, nan, %v979_v6  ;;  %v1091_v36 = vsel %vm969_vm4, nan, %v1090_v10 }
  0xf2   : > { %v982_v32 = vcombine.high %v980_v33, %v980_v33  ;;  %1096 = vst [vmem:[#allocation2 + $0x10] sm:$0x70] %v1091_v36  ;;  %v983_v30 = vrot.slane %v980_v33, 7  ;;  %v1093_v44 = vcombine.low %v1091_v36, %v1091_v36 }
  0xf3   : > { %3197 = vperm.xlu1 %3782, %v3175_v26   ;;  %3182 = vperm.xlu0 %3781, %v3172_v61  }
  0xf4   : > { %v984_v20 = vrot.slane %v982_v32, 7  ;;  %987 = vst [vmem:[#allocation2 + $0x18] sm:$0xe] %v983_v30  ;;  %1095 = vst [vmem:[#allocation2 + $0x18] sm:$0x70] %v1093_v44 }
  0xf6   : > { %988 = vst [vmem:[#allocation2 + $0x10] sm:$0xe] %v984_v20 }
  0xf7   : > { %3187 = vperm.xlu1 %3782, %v3173_v50   ;;  %3354 = vperm.xlu0 %3781, %v3351_v28  }
  0xfb   : > { %v1993_v40 = vld [vmem:[#allocation2 + $0x18] sm:$0xff]  ;;  %2680 = vperm.xlu1 %3782, %v2677_v42  }
  0xfc   : > { %v2001_v22 = vpack.c.bf16 %v1993_v40, %v1991_v35 }
  0xfd   : > { %v1994_v7 = vld [vmem:[#allocation2 + $0x10] sm:$0xff] }
  0xfe   : > { %v2002_v27 = vpack.c.bf16 %v1994_v7, %v1992_v38 }
 0x100   : > { %2208 = vmatprep.subr.bf16.mxu0 %v2002_v27 }
 0x101   : > { %2209 = vmatpush1.bf16.msra.mxu0 %v2001_v22 }
 0x104   : > { %3655 = vmatmul.mubr.msk.bf16.vlgmr.msra.gmra.mxu0 %vm2159_vm5, %v3784_v13 }
 0x105   : > { %2236 = vmatprep.mubr.bf16.mxu0 %v3910_v11 }
 0x108   : > { %v4846_v31 = vpop.permute.xlu0 %2111 }
 0x10c   : > { %3656 = vmatmul.mubr.msk.bf16.gmra.mxu0 %vm2159_vm5, %v3785_v1 }
 0x10d   : > { %2246 = vmatprep.mubr.bf16.mxu0 %v3910_v11 }
 0x112   : > { %v4850_v23 = vpop.permute.xlu0 %2116 }
 0x113   : > { %v4848_v15 = vpop.permute.xlu1 %2101 }
 0x114   : > { %3657 = vmatmul.mubr.msk.bf16.gmra.mxu0 %vm2159_vm5, %v3786_v49 }
 0x115   : > { %2256 = vmatprep.mubr.bf16.mxu0 %v3910_v11 }
 0x116   : > { %v4854_v47 = vpop.permute.xlu0 %2091 }
 0x117   : > { %v4852_v46 = vpop.permute.xlu1 %2106 }
 0x11a   : > { %v4858_v56 = vpop.permute.xlu0 %2081 }
 0x11b   : > { %v4856_v51 = vpop.permute.xlu1 %2096 }
 0x11c   : > { %3658 = vmatmul.mubr.msk.bf16.gmra.mxu0 %vm2159_vm5, %v3787_v4 }
 0x11d   : > { %2266 = vmatprep.mubr.bf16.mxu0 %v3910_v11 }
 0x11e   : > { %v4862_v14 = vpop.permute.xlu0 %2071 }
 0x11f   : > { %v4860_v21 = vpop.permute.xlu1 %2086 }
 0x122   : > { %v4866_v62 = vpop.permute.xlu0 %2061 }
 0x123   : > { %v4864_v29 = vpop.permute.xlu1 %2076 }
 0x124   : > { %3659 = vmatmul.mubr.msk.bf16.gmra.mxu0 %vm2159_vm5, %v3788_v37 }
 0x125   : > { %2276 = vmatprep.mubr.bf16.mxu0 %v3910_v11 }
 0x12a   : > { %v4868_v53 = vpop.permute.xlu1 %2066  ;;  %v2052_v17 = vpop.permute.xlu0 %2051 }
 0x12c   : > { %3660 = vmatmul.mubr.msk.bf16.gmra.mxu0 %vm2159_vm5, %v3789_v34 }
 0x12d   : > { %2286 = vmatprep.mubr.bf16.mxu0 %v3910_v11 }
 0x12e   : > { %v2057_v0 = vpop.permute.xlu1 %2056  ;;  %v2042_v3 = vpop.permute.xlu0 %2041 }
 0x132   : > { %v2047_v63 = vpop.permute.xlu1 %2046 }
 0x134   : > { %3661 = vmatmul.mubr.msk.bf16.gmra.mxu0 %vm2159_vm5, %v3790_v39 }
 0x135   : > { %2296 = vmatprep.mubr.bf16.mxu0 %v3910_v11 }
 0x13c   : > { %3662 = vmatmul.mubr.msk.bf16.gmra.mxu0 %vm2159_vm5, %v3791_v41 }
 0x13d   : > { %2715 = vmatprep.mubr.bf16.mxu0 %v3910_v11 }
 0x1c4   : > { %v2228_v25 = vpop.f32.mrf.mxu0 }
 0x1c5   : > { %v2229_v9 = vadd.f32 %v2228_v25, %v2042_v3 }
 0x1c6   : > { %v2230_v24 = vpop.f32.mrf.mxu0 }
 0x1c7   : > { %v2231_v54 = vadd.f32 %v2230_v24, %v2042_v3  ;;  %v2307_v43 = vmax.f32 %v2229_v9, 0.0 }
 0x1c8   : > { %v2232_v48 = vpop.f32.mrf.mxu0 }
 0x1c9   : > { %v2233_v57 = vadd.f32 %v2232_v48, %v2047_v63  ;;  %v2308_v8 = vmax.f32 %v2231_v54, 0.0 }
 0x1ca   : > { %v2234_v52 = vpop.f32.mrf.mxu0 }
 0x1cb   : > { %v2309_v18 = vmax.f32 %v2233_v57, 0.0  ;;  %v2235_v58 = vadd.f32 %v2234_v52, %v2047_v63 }
 0x1cc   : > { %v2238_v55 = vpop.f32.mrf.mxu0 }
 0x1cd   : > { %v4870_v5 = vpack.c.bf16 %v2309_v18, %v2307_v43  ;;  %v2310_v60 = vmax.f32 %v2235_v58, 0.0  ;;  %v2239_v6 = vadd.f32 %v2238_v55, %v2052_v17 }
 0x1ce   : > { %v2240_v16 = vpop.f32.mrf.mxu0 }
 0x1cf   : > { %v4872_v45 = vpack.c.bf16 %v2310_v60, %v2308_v8  ;;  %v2241_v33 = vadd.f32 %v2240_v16, %v2052_v17  ;;  %v2311_v30 = vmax.f32 %v2239_v6, 0.0 }
 0x1d0   : > { %v2242_v10 = vpop.f32.mrf.mxu0 }
 0x1d1   : > { %v2243_v36 = vadd.f32 %v2242_v10, %v2057_v0  ;;  %v2312_v20 = vmax.f32 %v2241_v33, 0.0 }
 0x1d2   : > { %v2244_v32 = vpop.f32.mrf.mxu0 }
 0x1d3   : > { %v2313_v44 = vmax.f32 %v2243_v36, 0.0  ;;  %v2245_v2 = vadd.f32 %v2244_v32, %v2057_v0 }
 0x1d4   : > { %v4874_v19 = vpop.f32.mrf.mxu0 }
 0x1d5   : > { %v4876_v12 = vpack.c.bf16 %v2313_v44, %v2311_v30  ;;  %v2314_v59 = vmax.f32 %v2245_v2, 0.0 }
 0x1d6   : > { %v4878_v35 = vpop.f32.mrf.mxu0 }
 0x1d7   : > { %v4880_v26 = vpack.c.bf16 %v2314_v59, %v2312_v20 }
 0x1d8   : > { %v4882_v38 = vpop.f32.mrf.mxu0 }
 0x1da   : > { %v4884_v40 = vpop.f32.mrf.mxu0 }
 0x1dc   : > { %v4886_v61 = vpop.f32.mrf.mxu0 }
 0x1de   : > { %v2260_v7 = vpop.f32.mrf.mxu0 }
 0x1e0   : > { %v2262_v22 = vpop.f32.mrf.mxu0 }
 0x1e2   : > { %v2264_v27 = vpop.f32.mrf.mxu0 }
 0x1e4   : > { %v2268_v50 = vpop.f32.mrf.mxu0 }
 0x1e6   : > { %v2270_v28 = vpop.f32.mrf.mxu0 }
 0x1e8   : > { %v2272_v13 = vpop.f32.mrf.mxu0 }
 0x1ea   : > { %v2274_v42 = vpop.f32.mrf.mxu0 }
 0x1ec   : > { %v2278_v1 = vpop.f32.mrf.mxu0 }
 0x1ed   : > { %v2279_v2 = vadd.f32 %v2278_v1, %v4854_v47 }
 0x1ee   : > { %v2280_v49 = vpop.f32.mrf.mxu0 }
 0x1ef   : > { %v2281_v10 = vadd.f32 %v2280_v49, %v4854_v47  ;;  %v2273_v49 = vadd.f32 %v2272_v13, %v4860_v21  ;;  %v2261_v47 = vadd.f32 %v2260_v7, %v4862_v14 }
 0x1f0   : > { %v2282_v4 = vpop.f32.mrf.mxu0 }
 0x1f1   : > { %v2283_v36 = vadd.f32 %v2282_v4, %v4856_v51  ;;  %v2328_v59 = vmax.f32 %v2281_v10, 0.0  ;;  %v2320_v7 = vmax.f32 %v2261_v47, 0.0 }
 0x1f2   : > { %v2284_v37 = vpop.f32.mrf.mxu0 }
 0x1f3   : > { %v2285_v58 = vadd.f32 %v2284_v37, %v4856_v51  ;;  %v2329_v37 = vmax.f32 %v2283_v36, 0.0  ;;  %v2265_v51 = vadd.f32 %v2264_v27, %v4864_v29  ;;  %v2259_v27 = vadd.f32 %v4886_v61, %v4862_v14  ;;  %v3799_v36 = vld [vmem:[%s5238_s7 + $0x38] sm:$0xff]  }
 0x1f4   : > { %v2288_v34 = vpop.f32.mrf.mxu0 }
 0x1f5   : > { %v2289_v16 = vadd.f32 %v2288_v34, %v4848_v15  ;;  %v2322_v13 = vmax.f32 %v2265_v51, 0.0 }
 0x1f6   : > { %v2290_v39 = vpop.f32.mrf.mxu0 }
 0x1f7   : > { %v2291_v57 = vadd.f32 %v2290_v39, %v4848_v15  ;;  %v2331_v20 = vmax.f32 %v2289_v16, 0.0  ;;  %v2271_v15 = vadd.f32 %v2270_v28, %v4858_v56  ;;  %v2263_v28 = vadd.f32 %v2262_v22, %v4864_v29 }
 0x1f8   : > { %v2292_v41 = vpop.f32.mrf.mxu0  ;;  %v2253_v29 = vadd.f32 %v4882_v38, %v4868_v53 }
 0x1f9   : > { %v2293_v43 = vadd.f32 %v2292_v41, %v4852_v46  ;;  %v2332_v33 = vmax.f32 %v2291_v57, 0.0  ;;  %v2327_v41 = vmax.f32 %v2279_v2, 0.0  ;;  %v2324_v1 = vmax.f32 %v2271_v15, 0.0 }
 0x1fa   : > { %v2294_v17 = vpop.f32.mrf.mxu0  ;;  %v2321_v22 = vmax.f32 %v2263_v28, 0.0  ;;  %v2317_v61 = vmax.f32 %v2253_v29, 0.0 }
 0x1fb   : > { %v2295_v24 = vadd.f32 %v2294_v17, %v4852_v46  ;;  %v2333_v32 = vmax.f32 %v2293_v43, 0.0  ;;  %v2330_v46 = vmax.f32 %v2285_v58, 0.0  ;;  %v2325_v17 = vmax.f32 %v2273_v49, 0.0 }
 0x1fc   : > { %v2298_v0 = vpop.f32.mrf.mxu0 }
 0x1fd   : > { %v2299_v48 = vadd.f32 %v2298_v0, %v4846_v31  ;;  %v2334_v55 = vmax.f32 %v2295_v24, 0.0  ;;  %v2367_v34 = vpack.c.bf16 %v2333_v32, %v2331_v20  ;;  %v2366_v39 = vpack.c.bf16 %v2330_v46, %v2328_v59 }
 0x1fe   : > { %v2300_v25 = vpop.f32.mrf.mxu0  ;;  %v2365_v0 = vpack.c.bf16 %v2329_v37, %v2327_v41 }
 0x1ff   : > { %v2301_v9 = vadd.f32 %v2300_v25, %v4846_v31  ;;  %v2335_v6 = vmax.f32 %v2299_v48, 0.0  ;;  %v2368_v44 = vpack.c.bf16 %v2334_v55, %v2332_v33 }
 0x200   : > { %v2302_v3 = vpop.f32.mrf.mxu0 }
 0x201   : > { %v2303_v63 = vadd.f32 %v2302_v3, %v4850_v23  ;;  %v2336_v8 = vmax.f32 %v2301_v9, 0.0  ;;  %v2362_v9 = vpack.c.bf16 %v2322_v13, %v2320_v7 }
 0x202   : > { %v2304_v54 = vpop.f32.mrf.mxu0 }
 0x203   : > { %v2305_v52 = vadd.f32 %v2304_v54, %v4850_v23  ;;  %v2337_v18 = vmax.f32 %v2303_v63, 0.0  ;;  %v2275_v23 = vadd.f32 %v2274_v42, %v4860_v21  ;;  %v2269_v42 = vadd.f32 %v2268_v50, %v4858_v56 }
 0x204   : > { %v2255_v21 = vadd.f32 %v4884_v40, %v4868_v53  ;;  %v2251_v56 = vadd.f32 %v4878_v35, %v4866_v62  ;;  %v2249_v40 = vadd.f32 %v4874_v19, %v4866_v62  ;;  %v2319_v63 = vmax.f32 %v2259_v27, 0.0  ;;  %v3792_v62 = vld [vmem:[%s5238_s7] sm:$0xff]   ;;  %v3793_v53 = vld [vmem:[%s5238_s7 + $0x8] sm:$0xff]  }
 0x205   : > { %v2338_v60 = vmax.f32 %v2305_v52, 0.0  ;;  %v2369_v30 = vpack.c.bf16 %v2337_v18, %v2335_v6  ;;  %v2326_v4 = vmax.f32 %v2275_v23, 0.0  ;;  %v2323_v3 = vmax.f32 %v2269_v42, 0.0  ;;  %v3796_v19 = vld [vmem:[%s5238_s7 + $0x20] sm:$0xff]   ;;  %v3797_v52 = vld [vmem:[%s5238_s7 + $0x28] sm:$0xff]  }
 0x206   : > { %v2318_v24 = vmax.f32 %v2255_v21, 0.0  ;;  %v2316_v14 = vmax.f32 %v2251_v56, 0.0  ;;  %v2361_v48 = vpack.c.bf16 %v2321_v22, %v2319_v63  ;;  %v2315_v35 = vmax.f32 %v2249_v40, 0.0  ;;  %v644_v6 = vld [vmem:[%s631_s25] sm:$0x77] }
 0x207   : > { %v2370_v31 = vpack.c.bf16 %v2338_v60, %v2336_v8  ;;  %v2364_v25 = vpack.c.bf16 %v2326_v4, %v2324_v1  ;;  %v2363_v50 = vpack.c.bf16 %v2325_v17, %v2323_v3  ;;  %v3798_v60 = vld [vmem:[%s5238_s7 + $0x30] sm:$0xff]   ;;  %v2724_v10 = vmul.f32 %v644_v6, %v644_v6 }
 0x208   : > { %v2360_v54 = vpack.c.bf16 %v2318_v24, %v2316_v14  ;;  %v2359_v57 = vpack.c.bf16 %v2317_v61, %v2315_v35 }
 0x209   : > { %2515 = vmatprep.subr.bf16.mxu1 %v2370_v31  ;;  %v3671_v33 = vrot.slane %v2724_v10, 9  ;;  %v2737_v31 = vlaneseq }
 0x20a   : > { %2516 = vmatpush1.bf16.msra.mxu1 %v2369_v30  ;;  %v3672_v30 = vrot.slane %v2724_v10, 10 }
 0x20b   : > { %2517 = vmatprep.subr.bf16.mxu1 %v2368_v44  ;;  %v2729_v32 = vadd.f32 %v3671_v33, %v2724_v10  ;;  %v4965_v46 = vshrl.u32 %v2737_v31, 7  ;;  %vm3455_vm11 = vcmp.lt.s32.totalorder %v2737_v31, 256 }
 0x20d   : > { %v2733_v23 = vadd.f32 %v3672_v30, %v2729_v32  ;;  %v4969_v2 = vsub.s32 0, %v4965_v46  ;;  %v4972_v20 = vsub.s32 4, %v4965_v46 }
 0x20e   : > { %2518 = vmatpush1.bf16.msra.mxu1 %v2367_v34 }
 0x20f   : > { %2519 = vmatprep.subr.bf16.mxu1 %v2366_v39  ;;  %v2734_v44 = vmax.f32 %v2733_v23, 1e-20 }
 0x212   : > { %2520 = vmatpush1.bf16.msra.mxu1 %v2365_v0 }
 0x213   : > { %2521 = vmatprep.subr.bf16.mxu1 %v2364_v25 }
 0x216   : > { %2522 = vmatpush1.bf16.msra.mxu1 %v2363_v50 }
 0x217   : > { %2523 = vmatprep.subr.bf16.mxu1 %v2362_v9 }
 0x21a   : > { %2524 = vmatpush1.bf16.msra.mxu1 %v2361_v48 }
 0x21b   : > { %2525 = vmatprep.subr.bf16.mxu1 %v2360_v54 }
 0x21e   : > { %2526 = vmatpush1.bf16.msra.mxu1 %v2359_v57 }
 0x21f   : > { %2527 = vmatprep.subr.bf16.mxu1 %v4880_v26  ;;  %v643_v26 = vld [vmem:[%s625_s19] sm:$0x77]  ;;  %s637_s19 = scalar_lea.vmem %s5235_s4, %s4058_s23 }
 0x220   : > { %v645_v39 = vld [vmem:[%s637_s19] sm:$0x77] }
 0x222   : > { %2528 = vmatpush1.bf16.msra.mxu1 %v4876_v12  ;;  %v642_v12 = vld [vmem:[%s619_s18] sm:$0x77]  ;;  %s606_s18 = sand.u32 1, %s3893_s27  }
 0x223   : > { %2529 = vmatprep.subr.bf16.mxu1 %v4872_v45  ;;  %v3794_v45 = vld [vmem:[%s5238_s7 + $0x10] sm:$0xff]   ;;  %v2760_v38 = vsub.f32 %v643_v26, %v642_v12  ;;  %v2838_v12 = vcombine.high %v645_v39, %v645_v39  ;;  %s3588_s19 = sshll.u32 %s606_s18, 5  ;;  %s5191_s16 = scalar_lea.sflag [#allocation6], %s606_s18 }
 0x224   : > { %s5128_s23 = scalar_lea.vmem [#allocation5], %s3588_s19 }
 0x225   : > { %v2761_v43 = vmul.f32 %v2760_v38, %v2760_v38  ;;  %s3474_s1 = sshll.u32 %s5128_s23, 4  ;;  %s5177_s1 = int_to_ptr.vmem [resolvable:$true] %s3474_s1 }
 0x226   : > { %2530 = vmatpush1.bf16.msra.mxu1 %v4870_v5  ;;  %v3795_v5 = vld [vmem:[%s5238_s7 + $0x18] sm:$0xff]   ;;  %s3841_s25 = scalar_lea.vmem %s5177_s1, 512  ;;  %p3848_p0 = scmp.lt.s32.totalorder %s5177_s1, %s3846_s0 }
 0x227   : > { %v3673_v18 = vrot.slane %v2761_v43, 9  ;;  %v3674_v55 = vrot.slane %v2761_v43, 10  ;;  %p3842_p11 = scmp.ne.s32.totalorder %s5177_s1, %s3841_s25  ;;  %p3849_p1 = scmp.lt.s32.totalorder %s3847_s6, %s3841_s25 }
 0x229   : > { %2548 = vmatmul.mubr.bf16.vlgmr.msra.gmra.mxu1 %v3792_v62  ;;  %v2766_v58 = vadd.f32 %v3673_v18, %v2761_v43  ;;  %p3843_p12 = pnand %p3842_p11, %p4047_p5  ;;  %p3850_p2 = por %p3849_p1, %p3848_p0 }
 0x22a   : > { %2557 = vmatprep.mubr.bf16.mxu1 %v3910_v11 }
 0x22b   : > { %v2770_v8 = vadd.f32 %v3674_v55, %v2766_v58  ;;  %p3844_p13 = pneg %p3843_p12 }
 0x22d   : > { %v2771_v16 = vmax.f32 %v2770_v8, 1e-20  ;;  %p3851_p3 = pnand %p3850_p2, %p3844_p13 }
 0x22f   : > { %3833 = vrsqrt.f32 %v2771_v16 }
 0x230   : > { %3835 = vrsqrt.f32 %v2734_v44 }
 0x231   : > { %2558 = vmatmul.mubr.bf16.gmra.mxu1 %v3793_v53 }
 0x232   : > { %2567 = vmatprep.mubr.bf16.mxu1 %v3910_v11 }
 0x239   : > { %2568 = vmatmul.mubr.bf16.gmra.mxu1 %v3794_v45 }
 0x23a   : > { %2577 = vmatprep.mubr.bf16.mxu1 %v3910_v11 }
 0x23c   : > { %v3834_v15 = vpop.eup %3833 }
 0x23d   : > { %v2777_v59 = vrot.slane %v3834_v15, %v4969_v2  ;;  %v2781_v49 = vrot.slane %v3834_v15, %v4972_v20  ;;  %v3836_v41 = vpop.eup %3835 }
 0x23e   : > { %v2740_v1 = vrot.slane %v3836_v41, %v4969_v2  ;;  %v2744_v28 = vrot.slane %v3836_v41, %v4972_v20 }
 0x23f   : > { %v2787_v37 = vrot.slane %v2777_v59, %v4969_v2  ;;  %v2791_v34 = vrot.slane %v2781_v49, %v4969_v2 }
 0x240   : > { %v2750_v21 = vrot.slane %v2740_v1, %v4969_v2  ;;  %v2754_v13 = vrot.slane %v2744_v28, %v4969_v2 }
 0x241   : > { %2578 = vmatmul.mubr.bf16.gmra.mxu1 %v3795_v5  ;;  %v2794_v51 = vcombine.low %v2787_v37, %v2791_v34  ;;  %v2836_v5 = vsub.f32 0.0, %v645_v39 }
 0x242   : > { %2587 = vmatprep.mubr.bf16.mxu1 %v3910_v11  ;;  %v2757_v27 = vcombine.low %v2750_v21, %v2754_v13 }
 0x243   : > { %v4982_v4 = vmul.f32 %v2794_v51, %v2760_v38  ;;  %v2841_v26 = vcombine.high %v2836_v5, %v2836_v5 }
 0x244   : > { %v2759_v3 = vmul.f32 %v2757_v27, %v644_v6 }
 0x245   : > { %v2797_v42 = vmul.f32 %v4982_v4, %v645_v39 }
 0x246   : > { %v2808_v22 = vsub.f32 0.0, %v2759_v3  ;;  %v2829_v9 = vcombine.high %v2759_v3, %v2759_v3 }
 0x247   : > { %v3675_v47 = vrot.slane %v2797_v42, 9  ;;  %v3676_v0 = vrot.slane %v2797_v42, 10 }
 0x248   : > { %v2832_v40 = vcombine.high %v2808_v22, %v2808_v22 }
 0x249   : > { %2588 = vmatmul.mubr.bf16.gmra.mxu1 %v3796_v19  ;;  %v2802_v17 = vadd.f32 %v3675_v47, %v2797_v42  ;;  %v2924_v42 = vcombine.high %v4982_v4, %v4982_v4 }
 0x24a   : > { %2597 = vmatprep.mubr.bf16.mxu1 %v3910_v11 }
 0x24b   : > { %v2806_v25 = vadd.f32 %v3676_v0, %v2802_v17 }
 0x24d   : > { %vm2807_vm6 = vcmp.gt.f32.partialorder %v2806_v25, 0.0 }
 0x24e   : > { %v2809_v56 = vsel %vm2807_vm6, 1, %v3910_v11 }
 0x24f   : > { %v2813_v7 = vrot.slane %v2809_v56, %v4969_v2  ;;  %v2817_v29 = vrot.slane %v2809_v56, %v4972_v20 }
 0x251   : > { %2598 = vmatmul.mubr.bf16.gmra.mxu1 %v3797_v52  ;;  %v2821_v50 = vrot.slane %v2813_v7, %v4969_v2  ;;  %v2825_v24 = vrot.slane %v2817_v29, %v4969_v2 }
 0x252   : > { %2607 = vmatprep.mubr.bf16.mxu1 %v3910_v11 }
 0x253   : > { %vm2826_vm7 = vcmp.eq.s32.totalorder %v2821_v50, 1  ;;  %vm2827_vm8 = vcmp.eq.s32.totalorder %v2825_v24, 1  ;;  %v5011_v50 = vpop.permute.xlu0 %2459 }
 0x254   : > { %v2834_v63 = vsel %vm2826_vm7, %v2759_v3, %v2808_v22  ;;  %v2835_v14 = vsel %vm2827_vm8, %v2829_v9, %v2832_v40  ;;  %v2843_v43 = vsel %vm2826_vm7, %v645_v39, %v2836_v5  ;;  %v2844_v18 = vsel %vm2827_vm8, %v2838_v12, %v2841_v26  ;;  %v5014_v9 = vpop.permute.xlu1 %2464 }
 0x255   : > { %v2847_v61 = vcombine.low %v2834_v63, %v2835_v14  ;;  %v2862_v58 = vsub.f32 %v2834_v63, %v2843_v43  ;;  %v2863_v55 = vsub.f32 %v2835_v14, %v2844_v18 }
 0x257   : > { %v2849_v48 = vmul.f32 %v2847_v61, %v4982_v4 }
 0x259   : > { %2608 = vmatmul.mubr.bf16.gmra.mxu1 %v3798_v60  ;;  %v3677_v54 = vrot.slane %v2849_v48, 9  ;;  %v3678_v57 = vrot.slane %v2849_v48, 10 }
 0x25a   : > { %2617 = vmatprep.mubr.bf16.mxu1 %v3910_v11 }
 0x25b   : > { %v2854_v35 = vadd.f32 %v3677_v54, %v2849_v48  ;;  %v5017_v48 = vpop.permute.xlu0 %2449 }
 0x25d   : > { %v2858_v62 = vadd.f32 %v3678_v57, %v2854_v35  ;;  %v5019_v35 = vpop.permute.xlu1 %2454 }
 0x25f   : > { %v2859_v53 = vmul.f32 10.0, %v2858_v62  ;;  %v5021_v57 = vpop.permute.xlu0 %2439 }
 0x261   : > { %2618 = vmatmul.mubr.bf16.gmra.mxu1 %v3799_v36  ;;  %v2860_v45 = vmax.f32 %v2859_v53, 0.0  ;;  %v5023_v62 = vpop.permute.xlu1 %2444 }
 0x262   : > { %3285 = vmatprep.mubr.bf16.mxu1 %v3910_v11 }
 0x263   : > { %v2861_v19 = vmin.f32 %v2860_v45, 1.0  ;;  %v5025_v53 = vpop.permute.xlu0 %2429 }
 0x265   : > { %v2868_v38 = vrot.slane %v2861_v19, %v4969_v2  ;;  %v2872_v52 = vrot.slane %v2861_v19, %v4972_v20  ;;  %v5027_v45 = vpop.permute.xlu1 %2434 }
 0x267   : > { %v2878_v8 = vrot.slane %v2868_v38, %v4969_v2  ;;  %v2882_v60 = vrot.slane %v2872_v52, %v4969_v2  ;;  %v5029_v5 = vpop.permute.xlu0 %2419 }
 0x269   : > { %v2883_v16 = vmul.f32 %v2878_v8, %v2862_v58  ;;  %v2884_v6 = vmul.f32 %v2882_v60, %v2863_v55  ;;  %v5031_v19 = vpop.permute.xlu1 %2424 }
 0x26b   : > { %v2885_v10 = vadd.f32 %v2883_v16, %v2843_v43  ;;  %v2886_v33 = vadd.f32 %v2884_v6, %v2844_v18  ;;  %v5033_v12 = vpop.permute.xlu0 %2409 }
 0x26d   : > { %v2889_v36 = vcombine.low %v2885_v10, %v2886_v33  ;;  %v5035_v26 = vpop.permute.xlu1 %2414 }
 0x26f   : > { %v2891_v32 = vmul.f32 %v2889_v36, %v4982_v4  ;;  %v2400_v38 = vpop.permute.xlu0 %2399 }
 0x271   : > { %v3679_v30 = vrot.slane %v2891_v32, 9  ;;  %v3680_v44 = vrot.slane %v2891_v32, 10  ;;  %v2405_v52 = vpop.permute.xlu1 %2404 }
 0x273   : > { %v2896_v23 = vadd.f32 %v3679_v30, %v2891_v32  ;;  %v2390_v18 = vpop.permute.xlu0 %2389 }
 0x275   : > { %v2900_v15 = vadd.f32 %v3680_v44, %v2896_v23  ;;  %v2395_v8 = vpop.permute.xlu1 %2394 }
 0x277   : > { %v2901_v59 = vmul.f32 2.0, %v2900_v15 }
 0x279   : > { %v2910_v49 = vrot.slane %v2901_v59, %v4972_v20  ;;  %v2906_v37 = vrot.slane %v2901_v59, %v4969_v2 }
 0x27b   : > { %v2920_v34 = vrot.slane %v2910_v49, %v4969_v2  ;;  %v2916_v51 = vrot.slane %v2906_v37, %v4969_v2 }
 0x27d   : > { %v2922_v39 = vmul.f32 %v2920_v34, %v2886_v33  ;;  %v2921_v41 = vmul.f32 %v2916_v51, %v2885_v10 }
 0x27f   : > { %v2927_v47 = vsub.f32 %v2922_v39, %v2924_v42  ;;  %v2926_v1 = vsub.f32 %v2921_v41, %v4982_v4 }
 0x281   : > { %v2929_v28 = vmul.f32 %v2927_v47, %v2927_v47  ;;  %v2928_v17 = vmul.f32 %v2926_v1, %v2926_v1 }
 0x283   : > { %v2933_v0 = vrot.slane %v2929_v28, 1  ;;  %v2932_v21 = vrot.slane %v2928_v17, 1  ;;  %v2939_v20 = vrot.slane %v2929_v28, 2  ;;  %v2938_v27 = vrot.slane %v2928_v17, 2 }
 0x285   : > { %v2937_v13 = vadd.f32 %v2933_v0, %v2929_v28  ;;  %v2936_v25 = vadd.f32 %v2932_v21, %v2928_v17 }
 0x287   : > { %v2943_v3 = vadd.f32 %v2939_v20, %v2937_v13  ;;  %v2942_v56 = vadd.f32 %v2938_v27, %v2936_v25 }
 0x289   : > { %v2945_v7 = vmax.f32 %v2943_v3, 1e-20  ;;  %v2944_v29 = vmax.f32 %v2942_v56, 1e-20 }
 0x28b   : > { %3837 = vrsqrt.f32 %v2945_v7 }
 0x28c   : > { %3839 = vrsqrt.f32 %v2944_v29 }
 0x298   : > { %v3838_v22 = vpop.eup %3837 }
 0x299   : > { %v3840_v24 = vpop.eup %3839  ;;  %v2955_v4 = vrot.slane %v3838_v22, %v4969_v2 }
 0x29a   : > { %v2951_v40 = vrot.slane %v3840_v24, %v4969_v2 }
 0x29b   : > { %v2957_v63 = vmul.f32 %v2955_v4, %v2927_v47 }
 0x29c   : > { %v2956_v14 = vmul.f32 %v2951_v40, %v2926_v1 }
 0x29d   : > { %v2963_v61 = vrot.slane %v2957_v63, 5 }
 0x29e   : > { %v2962_v54 = vrot.slane %v2956_v14, 5 }
 0x29f   : > { %2967 = vst [vmem:[#allocation3] sm:$0x38] %v2963_v61 }
 0x2a0   : > { %2966 = vst [vmem:[#allocation3 + $0x8] sm:$0x38] %v2962_v54 }
 0x2e9   : > { %v2549_v43 = vpop.f32.mrf.mxu1 }
 0x2ea   : > { %v2550_v55 = vadd.f32 %v2549_v43, %v2390_v18 }
 0x2eb   : > { %v2551_v58 = vpop.f32.mrf.mxu1 }
 0x2ec   : > { %v2552_v16 = vadd.f32 %v2551_v58, %v2390_v18  ;;  %v2628_v33 = vmax.f32 %v2550_v55, 0.0 }
 0x2ed   : > { %v2553_v60 = vpop.f32.mrf.mxu1 }
 0x2ee   : > { %v2554_v6 = vadd.f32 %v2553_v60, %v2395_v8  ;;  %v2629_v23 = vmax.f32 %v2552_v16, 0.0 }
 0x2ef   : > { %v2555_v10 = vpop.f32.mrf.mxu1 }
 0x2f0   : > { %v2630_v36 = vmax.f32 %v2554_v6, 0.0  ;;  %v2556_v32 = vadd.f32 %v2555_v10, %v2395_v8 }
 0x2f1   : > { %v2559_v30 = vpop.f32.mrf.mxu1 }
 0x2f2   : > { %v5037_v44 = vpack.c.bf16 %v2630_v36, %v2628_v33  ;;  %v2631_v15 = vmax.f32 %v2556_v32, 0.0  ;;  %v2560_v37 = vadd.f32 %v2559_v30, %v2400_v38 }
 0x2f3   : > { %v2561_v59 = vpop.f32.mrf.mxu1 }
 0x2f4   : > { %v5039_v49 = vpack.c.bf16 %v2631_v15, %v2629_v23  ;;  %v2562_v51 = vadd.f32 %v2561_v59, %v2400_v38  ;;  %v2632_v41 = vmax.f32 %v2560_v37, 0.0 }
 0x2f5   : > { %v2563_v34 = vpop.f32.mrf.mxu1 }
 0x2f6   : > { %v2564_v39 = vadd.f32 %v2563_v34, %v2405_v52  ;;  %v2633_v17 = vmax.f32 %v2562_v51, 0.0 }
 0x2f7   : > { %v2565_v42 = vpop.f32.mrf.mxu1 }
 0x2f8   : > { %v2634_v47 = vmax.f32 %v2564_v39, 0.0  ;;  %v2566_v1 = vadd.f32 %v2565_v42, %v2405_v52 }
 0x2f9   : > { %v5041_v28 = vpop.f32.mrf.mxu1 }
 0x2fa   : > { %v5043_v0 = vpack.c.bf16 %v2634_v47, %v2632_v41  ;;  %v2635_v21 = vmax.f32 %v2566_v1, 0.0 }
 0x2fb   : > { %v5045_v13 = vpop.f32.mrf.mxu1 }
 0x2fc   : > { %v5047_v20 = vpack.c.bf16 %v2635_v21, %v2633_v17 }
 0x2fd   : > { %v5049_v25 = vpop.f32.mrf.mxu1 }
 0x2ff   : > { %v5051_v27 = vpop.f32.mrf.mxu1 }
 0x301   : > { %v5053_v3 = vpop.f32.mrf.mxu1 }
 0x303   : > { %v2581_v56 = vpop.f32.mrf.mxu1 }
 0x305   : > { %v2583_v7 = vpop.f32.mrf.mxu1 }
 0x307   : > { %v2585_v29 = vpop.f32.mrf.mxu1 }
 0x309   : > { %v2589_v22 = vpop.f32.mrf.mxu1 }
 0x30b   : > { %v2591_v24 = vpop.f32.mrf.mxu1 }
 0x30d   : > { %v2593_v4 = vpop.f32.mrf.mxu1 }
 0x30f   : > { %v2595_v40 = vpop.f32.mrf.mxu1 }
 0x311   : > { %v2599_v63 = vpop.f32.mrf.mxu1 }
 0x313   : > { %v2601_v14 = vpop.f32.mrf.mxu1 }
 0x314   : > { %v2602_v42 = vadd.f32 %v2601_v14, %v5021_v57  ;;  %v2594_v14 = vadd.f32 %v2593_v4, %v5027_v45 }
 0x315   : > { %v2603_v61 = vpop.f32.mrf.mxu1 }
 0x316   : > { %v2604_v47 = vadd.f32 %v2603_v61, %v5023_v62 }
 0x317   : > { %v2605_v54 = vpop.f32.mrf.mxu1 }
 0x318   : > { %v2606_v15 = vadd.f32 %v2605_v54, %v5023_v62  ;;  %v2600_v54 = vadd.f32 %v2599_v63, %v5021_v57  ;;  %v2586_v62 = vadd.f32 %v2585_v29, %v5031_v19  ;;  %v2582_v57 = vadd.f32 %v2581_v56, %v5029_v5 }
 0x319   : > { %v2609_v38 = vpop.f32.mrf.mxu1  ;;  %v2580_v29 = vadd.f32 %v5053_v3, %v5029_v5 }
 0x31a   : > { %v2610_v51 = vadd.f32 %v2609_v38, %v5017_v48  ;;  %v2649_v38 = vmax.f32 %v2602_v42, 0.0  ;;  %v2643_v4 = vmax.f32 %v2586_v62, 0.0  ;;  %v2641_v56 = vmax.f32 %v2582_v57, 0.0 }
 0x31b   : > { %v2611_v52 = vpop.f32.mrf.mxu1 }
 0x31c   : > { %v2612_v36 = vadd.f32 %v2611_v52, %v5017_v48  ;;  %v2652_v52 = vmax.f32 %v2610_v51, 0.0  ;;  %v2592_v48 = vadd.f32 %v2591_v24, %v5025_v53  ;;  %v2584_v24 = vadd.f32 %v2583_v7, %v5031_v19 }
 0x31d   : > { %v2613_v43 = vpop.f32.mrf.mxu1  ;;  %v2574_v19 = vadd.f32 %v5049_v25, %v5035_v26  ;;  %v2968_v25 = vld [vmem:[#allocation3 + $0x8] sm:$0x3f] }
 0x31e   : > { %v2614_v30 = vadd.f32 %v2613_v43, %v5019_v35  ;;  %v2653_v41 = vmax.f32 %v2612_v36, 0.0  ;;  %v2650_v43 = vmax.f32 %v2604_v47, 0.0  ;;  %v2645_v63 = vmax.f32 %v2592_v48, 0.0 }
 0x31f   : > { %v2615_v18 = vpop.f32.mrf.mxu1  ;;  %v2642_v7 = vmax.f32 %v2584_v24, 0.0  ;;  %v2640_v36 = vmax.f32 %v2580_v29, 0.0  ;;  %v2638_v3 = vmax.f32 %v2574_v19, 0.0  ;;  %v3021_v24 = vpop.permute.xlu0 %3020 }
 0x320   : > { %v2616_v60 = vadd.f32 %v2615_v18, %v5019_v35  ;;  %v2654_v1 = vmax.f32 %v2614_v30, 0.0  ;;  %v2651_v35 = vmax.f32 %v2606_v15, 0.0  ;;  %v2660_v15 = vld [vmem:[%s5240_s9] sm:$0x7] }
 0x321   : > { %v2619_v58 = vpop.f32.mrf.mxu1 }
 0x322   : > { %v2620_v10 = vadd.f32 %v2619_v58, %v5011_v50  ;;  %v2655_v59 = vmax.f32 %v2616_v60, 0.0  ;;  %v2673_v18 = vpack.c.bf16 %v2654_v1, %v2652_v52  ;;  %v2672_v58 = vpack.c.bf16 %v2651_v35, %v2649_v38 }
 0x323   : > { %v2621_v55 = vpop.f32.mrf.mxu1 }
 0x324   : > { %v2622_v16 = vadd.f32 %v2621_v55, %v5011_v50  ;;  %v2656_v39 = vmax.f32 %v2620_v10, 0.0  ;;  %v2674_v21 = vpack.c.bf16 %v2655_v59, %v2653_v41  ;;  %v2648_v55 = vmax.f32 %v2600_v54, 0.0 }
 0x325   : > { %v2623_v8 = vpop.f32.mrf.mxu1 }
 0x326   : > { %v2624_v6 = vadd.f32 %v2623_v8, %v5014_v9  ;;  %v2657_v37 = vmax.f32 %v2622_v16, 0.0  ;;  %v2646_v8 = vmax.f32 %v2594_v14, 0.0  ;;  %v2671_v60 = vpack.c.bf16 %v2650_v43, %v2648_v55 }
 0x327   : > { %v2625_v33 = vpop.f32.mrf.mxu1 }
 0x328   : > { %v2626_v32 = vadd.f32 %v2625_v33, %v5014_v9  ;;  %v2658_v23 = vmax.f32 %v2624_v6, 0.0  ;;  %v2596_v9 = vadd.f32 %v2595_v40, %v5027_v45  ;;  %v2590_v40 = vadd.f32 %v2589_v22, %v5025_v53 }
 0x329   : > { %v2576_v45 = vadd.f32 %v5051_v27, %v5035_v26  ;;  %v2572_v53 = vadd.f32 %v5045_v13, %v5033_v12  ;;  %v2668_v33 = vpack.c.bf16 %v2643_v4, %v2641_v56  ;;  %v2570_v27 = vadd.f32 %v5041_v28, %v5033_v12  ;;  %v2969_v26 = vld [vmem:[#allocation3] sm:$0x3f]  ;;  %v3011_v4 = vpop.permute.xlu0 %3010 }
 0x32a   : > { %v2659_v34 = vmax.f32 %v2626_v32, 0.0  ;;  %v2675_v17 = vpack.c.bf16 %v2658_v23, %v2656_v39  ;;  %v2647_v61 = vmax.f32 %v2596_v9, 0.0  ;;  %v2644_v6 = vmax.f32 %v2590_v40, 0.0 }
 0x32b   : > { %v2639_v10 = vmax.f32 %v2576_v45, 0.0  ;;  %v2637_v5 = vmax.f32 %v2572_v53, 0.0  ;;  %v2667_v32 = vpack.c.bf16 %v2642_v7, %v2640_v36  ;;  %v2636_v13 = vmax.f32 %v2570_v27, 0.0 }
 0x32c   : > { %v2676_v50 = vpack.c.bf16 %v2659_v34, %v2657_v37  ;;  %v2670_v16 = vpack.c.bf16 %v2647_v61, %v2645_v63  ;;  %v2669_v22 = vpack.c.bf16 %v2646_v8, %v2644_v6  ;;  %v2971_v12 = vpack.c.bf16 %v2969_v26, %v2969_v26  ;;  %v3026_v37 = vpop.permute.xlu1 %3025 }
 0x32d   : > { %v2666_v30 = vpack.c.bf16 %v2639_v10, %v2637_v5  ;;  %v2665_v23 = vpack.c.bf16 %v2638_v3, %v2636_v13  ;;  %v2970_v28 = vpack.c.bf16 %v2968_v25, %v2968_v25 }
 0x32e   : > { %2683 = vmatprep.subr.bf16.mxu0 %v2676_v50 }
 0x32f   : > { %2684 = vmatpush1.bf16.msra.mxu0 %v2675_v17  ;;  %v3062_v59 = vsel %vm2184_vm12, %v2970_v28, 0 }
 0x330   : > { %2685 = vmatprep.subr.bf16.mxu0 %v2674_v21  ;;  %v3016_v34 = vpop.permute.xlu1 %3015 }
 0x333   : > { %2686 = vmatpush1.bf16.msra.mxu0 %v2673_v18 }
 0x334   : > { %2687 = vmatprep.subr.bf16.mxu0 %v2672_v58  ;;  %v3006_v51 = vpop.permute.xlu1 %3005 }
 0x337   : > { %2688 = vmatpush1.bf16.msra.mxu0 %v2671_v60 }
 0x338   : > { %2689 = vmatprep.subr.bf16.mxu0 %v2670_v16  ;;  %v5110_v39 = vpop.permute.xlu1 %2995 }
 0x33b   : > { %2690 = vmatpush1.bf16.msra.mxu0 %v2669_v22 }
 0x33c   : > { %2691 = vmatprep.subr.bf16.mxu0 %v2668_v33  ;;  %v5112_v42 = vpop.permute.xlu1 %3217  ;;  %v3001_v33 = vpop.permute.xlu0 %3000 }
 0x33f   : > { %2692 = vmatpush1.bf16.msra.mxu0 %v2667_v32 }
 0x340   : > { %2693 = vmatprep.subr.bf16.mxu0 %v2666_v30  ;;  %v5114_v41 = vpop.permute.xlu1 %3207 }
 0x343   : > { %2694 = vmatpush1.bf16.msra.mxu0 %v2665_v23 }
 0x344   : > { %2695 = vmatprep.subr.bf16.mxu0 %v5047_v20  ;;  %v3804_v20 = vld [vmem:[%s5242_s11 + $0x18] sm:$0xff]   ;;  %v5116_v50 = vpop.permute.xlu1 %3197 }
 0x347   : > { %2696 = vmatpush1.bf16.msra.mxu0 %v5043_v0  ;;  %v3803_v0 = vld [vmem:[%s5242_s11 + $0x10] sm:$0xff]  }
 0x348   : > { %2697 = vmatprep.subr.bf16.mxu0 %v5039_v49  ;;  %v3801_v49 = vld [vmem:[%s5242_s11] sm:$0xff]   ;;  %v5118_v47 = vpop.permute.xlu1 %3187 }
 0x34b   : > { %2698 = vmatpush1.bf16.msra.mxu0 %v5037_v44  ;;  %v3802_v44 = vld [vmem:[%s5242_s11 + $0x8] sm:$0xff]  }
 0x34c   : > { %3685 = vmatprep.subr.msk.bf16.mxu0 %vm2184_vm12, %v2971_v12  ;;  %v2681_v1 = vpop.permute.xlu1 %2680  ;;  %vm3240_vm12 = vcmask 523264  }
 0x34e   : > { %2716 = vmatmul.mubr.bf16.vlgmr.msra.gmra.mxu0 %v2660_v15 }
 0x34f   : > { %3082 = vmatpush1.bf16.msra.mxu0 %v3062_v59  ;;  %3099 = vmatprep.mubr.bf16.mxu0 %v3910_v11 }
 0x356   : > { %3686 = vmatmul.mubr.msk.bf16.vlgmr.msra.gmra.mxu0 %vm3048_vm9, %v3801_v49 }
 0x357   : > { %3109 = vmatprep.mubr.bf16.mxu0 %v3910_v11 }
 0x35e   : > { %3687 = vmatmul.mubr.msk.bf16.gmra.mxu0 %vm3048_vm9, %v3802_v44 }
 0x35f   : > { %3119 = vmatprep.mubr.bf16.mxu0 %v3910_v11 }
 0x366   : > { %3688 = vmatmul.mubr.msk.bf16.gmra.mxu0 %vm3048_vm9, %v3803_v0 }
 0x367   : > { %3129 = vmatprep.mubr.bf16.mxu0 %v3910_v11 }
 0x36e   : > { %3689 = vmatmul.mubr.msk.bf16.gmra.mxu0 %vm3048_vm9, %v3804_v20  ;;  %v2991_v20 = vpop.permute.xlu0 %2990 }
 0x36f   : > { %3396 = vmatprep.mubr.bf16.mxu0 %v3910_v11 }
 0x40e   : > { %v2717_v17 = vpop.f32.mrf.mxu0 }
 0x40f   : > { %v5123_v9 = vadd.f32 %v2717_v17, %v2681_v1 }
 0x410   : > { %v2719_v35 = vpop.f32.mrf.mxu0 }
 0x411   : > { %v3427_v21 = vrot.slane %v5123_v9, 5  ;;  %v5126_v54 = vadd.f32 %v2719_v35, %v2681_v1 }
 0x412   : > { %v2721_v52 = vpop.f32.mrf.mxu0 }
 0x413   : > { %3431 = vst [vmem:[%s5128_s23] sm:$0xf8] %v3427_v21  ;;  %3433 = vst [vmem:[%s5128_s23 + $0x10] sm:$0x1] %v3427_v21  ;;  %v3428_v48 = vrot.slane %v5126_v54, 5 }
 0x414   : > { %v2722_v38 = vpop.f32.mrf.mxu0 }
 0x415   : > { %3432 = vst [vmem:[%s5128_s23 + $0x8] sm:$0xf8] %v3428_v48  ;;  %3434 = vst [vmem:[%s5128_s23 + $0x18] sm:$0x1] %v3428_v48 }
 0x416   : > { %v3101_v14 = vpop.f32.mrf.mxu0 }
 0x417   : > { %v3102_v38 = vadd.f32 %v3101_v14, %v2991_v20  ;;  %v3806_v14 = vld [vmem:[%s5244_s13 + $0x8] sm:$0xff]  }
 0x418   : > { %v3103_v43 = vpop.f32.mrf.mxu0 }
 0x419   : > { %v3104_v1 = vadd.f32 %v3103_v43, %v2991_v20 }
 0x41a   : > { %v3105_v18 = vpop.f32.mrf.mxu0 }
 0x41b   : > { %v3106_v35 = vadd.f32 %v3105_v18, %v5110_v39  ;;  %v3807_v18 = vld [vmem:[%s5244_s13 + $0x10] sm:$0xff]  }
 0x41c   : > { %v3107_v62 = vpop.f32.mrf.mxu0 }
 0x41d   : > { %v3108_v49 = vadd.f32 %v3107_v62, %v5110_v39  ;;  %v3141_v62 = vmax.f32 %v3104_v1, 0.0  ;;  %v3805_v39 = vld [vmem:[%s5244_s13] sm:$0xff]  }
 0x41e   : > { %v3111_v61 = vpop.f32.mrf.mxu0 }
 0x41f   : > { %v3143_v48 = vmax.f32 %v3108_v49, 0.0 }
 0x420   : > { %v3113_v58 = vpop.f32.mrf.mxu0 }
 0x421   : > { %v3114_v26 = vadd.f32 %v3113_v58, %v3001_v33 }
 0x422   : > { %v3115_v40 = vpop.f32.mrf.mxu0 }
 0x423   : > { %v3116_v28 = vadd.f32 %v3115_v40, %v3006_v51  ;;  %v3145_v17 = vmax.f32 %v3114_v26, 0.0  ;;  %v3142_v40 = vmax.f32 %v3106_v35, 0.0 }
 0x424   : > { %v3117_v55 = vpop.f32.mrf.mxu0 }
 0x425   : > { %v3118_v5 = vadd.f32 %v3117_v55, %v3006_v51  ;;  %v3146_v21 = vmax.f32 %v3116_v28, 0.0 }
 0x426   : > { %v3121_v57 = vpop.f32.mrf.mxu0 }
 0x427   : > { %v3122_v13 = vadd.f32 %v3121_v57, %v3011_v4  ;;  %v3147_v44 = vmax.f32 %v3118_v5, 0.0  ;;  %v3165_v57 = vpack.c.bf16 %v3143_v48, %v3141_v62 }
 0x428   : > { %v3123_v63 = vpop.f32.mrf.mxu0 }
 0x429   : > { %v3124_v22 = vadd.f32 %v3123_v63, %v3011_v4  ;;  %v3167_v51 = vpack.c.bf16 %v3147_v44, %v3145_v17  ;;  %v3808_v63 = vld [vmem:[%s5244_s13 + $0x18] sm:$0xff]  }
 0x42a   : > { %v3125_v8 = vpop.f32.mrf.mxu0 }
 0x42b   : > { %v3126_v27 = vadd.f32 %v3125_v8, %v3016_v34  ;;  %v3149_v25 = vmax.f32 %v3124_v22, 0.0 }
 0x42c   : > { %v3127_v60 = vpop.f32.mrf.mxu0 }
 0x42d   : > { %v3128_v6 = vadd.f32 %v3127_v60, %v3016_v34  ;;  %v3150_v15 = vmax.f32 %v3126_v27, 0.0  ;;  %v3148_v34 = vmax.f32 %v3122_v13, 0.0 }
 0x42e   : > { %v3131_v45 = vpop.f32.mrf.mxu0 }
 0x42f   : > { %v3132_v19 = vadd.f32 %v3131_v45, %v3021_v24  ;;  %v3151_v3 = vmax.f32 %v3128_v6, 0.0  ;;  %v3168_v52 = vpack.c.bf16 %v3150_v15, %v3148_v34 }
 0x430   : > { %v3133_v16 = vpop.f32.mrf.mxu0 }
 0x431   : > { %v3134_v53 = vadd.f32 %v3133_v16, %v3021_v24  ;;  %v3152_v23 = vmax.f32 %v3132_v19, 0.0  ;;  %v3169_v0 = vpack.c.bf16 %v3151_v3, %v3149_v25  ;;  %v3213_v19 = vpop.permute.xlu0 %3212 }
 0x432   : > { %v3135_v29 = vpop.f32.mrf.mxu0 }
 0x433   : > { %v3136_v56 = vadd.f32 %v3135_v29, %v3026_v37  ;;  %v3153_v32 = vmax.f32 %v3134_v53, 0.0 }
 0x434   : > { %v3137_v7 = vpop.f32.mrf.mxu0 }
 0x435   : > { %v3138_v10 = vadd.f32 %v3137_v7, %v3026_v37  ;;  %v3154_v36 = vmax.f32 %v3136_v56, 0.0  ;;  %v3112_v37 = vadd.f32 %v3111_v61, %v3001_v33  ;;  %v3140_v61 = vmax.f32 %v3102_v38, 0.0 }
 0x437   : > { %v3155_v30 = vmax.f32 %v3138_v10, 0.0  ;;  %v3170_v59 = vpack.c.bf16 %v3154_v36, %v3152_v23  ;;  %v3144_v58 = vmax.f32 %v3112_v37, 0.0  ;;  %v3164_v43 = vpack.c.bf16 %v3142_v40, %v3140_v61  ;;  %v3203_v10 = vpop.permute.xlu0 %3202 }
 0x439   : > { %v3171_v12 = vpack.c.bf16 %v3155_v30, %v3153_v32  ;;  %v3166_v55 = vpack.c.bf16 %v3146_v21, %v3144_v58 }
 0x43b   : > { %3261 = vmatprep.subr.bf16.mxu1 %v3171_v12  ;;  %v3193_v26 = vpop.permute.xlu0 %3192 }
 0x43c   : > { %3262 = vmatpush1.bf16.msra.mxu1 %v3170_v59 }
 0x43d   : > { %3263 = vmatprep.subr.bf16.mxu1 %v3169_v0 }
 0x440   : > { %3264 = vmatpush1.bf16.msra.mxu1 %v3168_v52 }
 0x441   : > { %3265 = vmatprep.subr.bf16.mxu1 %v3167_v51 }
 0x444   : > { %3266 = vmatpush1.bf16.msra.mxu1 %v3166_v55 }
 0x445   : > { %3267 = vmatprep.subr.bf16.mxu1 %v3165_v57 }
 0x448   : > { %3268 = vmatpush1.bf16.msra.mxu1 %v3164_v43 }
 0x44b   : > { %3694 = vmatmul.mubr.msk.bf16.vlgmr.msra.gmra.mxu1 %vm3240_vm12, %v3805_v39 }
 0x44c   : > { %3295 = vmatprep.mubr.bf16.mxu1 %v3910_v11 }
 0x453   : > { %3695 = vmatmul.mubr.msk.bf16.gmra.mxu1 %vm3240_vm12, %v3806_v14 }
 0x454   : > { %3305 = vmatprep.mubr.bf16.mxu1 %v3910_v11 }
 0x45b   : > { %3696 = vmatmul.mubr.msk.bf16.gmra.mxu1 %vm3240_vm12, %v3807_v18 }
 0x45c   : > { %3315 = vmatprep.mubr.bf16.mxu1 %v3910_v11 }
 0x463   : > { %3697 = vmatmul.mubr.msk.bf16.gmra.mxu1 %vm3240_vm12, %v3808_v63 }
 0x50b   : > { %v3287_v24 = vpop.f32.mrf.mxu1 }
 0x50d   : > { %v3289_v8 = vpop.f32.mrf.mxu1 }
 0x50f   : > { %v3291_v60 = vpop.f32.mrf.mxu1 }
 0x510   : > { %v3292_v62 = vadd.f32 %v3291_v60, %v5118_v47 }
 0x511   : > { %v3293_v45 = vpop.f32.mrf.mxu1 }
 0x512   : > { %v3328_v14 = vmax.f32 %v3292_v62, 0.0 }
 0x513   : > { %v3297_v4 = vpop.f32.mrf.mxu1 }
 0x514   : > { %v3298_v48 = vadd.f32 %v3297_v4, %v3193_v26 }
 0x515   : > { %v3299_v16 = vpop.f32.mrf.mxu1 }
 0x516   : > { %v3300_v20 = vadd.f32 %v3299_v16, %v3193_v26  ;;  %v3330_v43 = vmax.f32 %v3298_v48, 0.0 }
 0x517   : > { %v3301_v29 = vpop.f32.mrf.mxu1 }
 0x518   : > { %v3302_v1 = vadd.f32 %v3301_v29, %v5116_v50  ;;  %v3331_v58 = vmax.f32 %v3300_v20, 0.0 }
 0x519   : > { %v3303_v6 = vpop.f32.mrf.mxu1 }
 0x51a   : > { %v3304_v28 = vadd.f32 %v3303_v6, %v5116_v50  ;;  %v3332_v40 = vmax.f32 %v3302_v1, 0.0 }
 0x51b   : > { %v3307_v53 = vpop.f32.mrf.mxu1 }
 0x51c   : > { %v3308_v44 = vadd.f32 %v3307_v53, %v3203_v10  ;;  %v3333_v21 = vmax.f32 %v3304_v28, 0.0  ;;  %v3345_v18 = vpack.c.bf16 %v3332_v40, %v3330_v43 }
 0x51d   : > { %v3309_v56 = vpop.f32.mrf.mxu1 }
 0x51e   : > { %v3310_v13 = vadd.f32 %v3309_v56, %v3203_v10  ;;  %v3334_v51 = vmax.f32 %v3308_v44, 0.0  ;;  %v3346_v50 = vpack.c.bf16 %v3333_v21, %v3331_v58 }
 0x51f   : > { %v3311_v7 = vpop.f32.mrf.mxu1 }
 0x520   : > { %v3312_v25 = vadd.f32 %v3311_v7, %v5114_v41  ;;  %v3335_v37 = vmax.f32 %v3310_v13, 0.0 }
 0x521   : > { %v3313_v22 = vpop.f32.mrf.mxu1 }
 0x522   : > { %v3314_v36 = vadd.f32 %v3313_v22, %v5114_v41  ;;  %v3336_v17 = vmax.f32 %v3312_v25, 0.0  ;;  %v3183_v41 = vpop.permute.xlu0 %3182 }
 0x523   : > { %v3317_v11 = vpop.f32.mrf.mxu1  ;;  %v3290_v38 = vadd.f32 %v3289_v8, %v3183_v41  ;;  %v3288_v61 = vadd.f32 %v3287_v24, %v3183_v41  ;;  %v3911_v24 = vmov 1966171168  }
 0x524   : > { %v3318_v32 = vadd.f32 %v3317_v11, %v3213_v19  ;;  %v3337_v15 = vmax.f32 %v3314_v36, 0.0  ;;  %v3347_v55 = vpack.c.bf16 %v3336_v17, %v3334_v51  ;;  %v3439_v60 = vunpack.c.l.s4 %v3911_v24 }
 0x525   : > { %v3319_v33 = vpop.f32.mrf.mxu1  ;;  %v3327_v39 = vmax.f32 %v3290_v38, 0.0 }
 0x526   : > { %v3320_v5 = vadd.f32 %v3319_v33, %v3213_v19  ;;  %v3338_v0 = vmax.f32 %v3318_v32, 0.0  ;;  %v3348_v52 = vpack.c.bf16 %v3337_v15, %v3335_v37  ;;  %v3355_v4 = vpop.permute.xlu0 %3354  ;;  %v3440_v29 = vunpack.c.0.s8 %v3439_v60 }
 0x527   : > { %v3321_v27 = vpop.f32.mrf.mxu1  ;;  %v3360_v16 = vrot.slane %v3355_v4, %v4969_v2 }
 0x528   : > { %v3322_v3 = vadd.f32 %v3321_v27, %v5112_v42  ;;  %v3339_v59 = vmax.f32 %v3320_v5, 0.0  ;;  %v3443_v22 = vsub.s32 %v3440_v29, %v4965_v46 }
 0x529   : > { %v3323_v30 = vpop.f32.mrf.mxu1 }
 0x52a   : > { %v3324_v23 = vadd.f32 %v3323_v30, %v5112_v42  ;;  %v3340_v12 = vmax.f32 %v3322_v3, 0.0  ;;  %v3294_v42 = vadd.f32 %v3293_v45, %v5118_v47  ;;  %v3326_v45 = vmax.f32 %v3288_v61, 0.0  ;;  %v3342_v47 = vld [vmem:[%s5246_s15] sm:$0x1] }
 0x52c   : > { %v3341_v49 = vmax.f32 %v3324_v23, 0.0  ;;  %v3349_v35 = vpack.c.bf16 %v3340_v12, %v3338_v0  ;;  %v3329_v57 = vmax.f32 %v3294_v42, 0.0  ;;  %v3343_v8 = vpack.c.bf16 %v3328_v14, %v3326_v45 }
 0x52e   : > { %v3350_v34 = vpack.c.bf16 %v3341_v49, %v3339_v59  ;;  %v3344_v63 = vpack.c.bf16 %v3329_v57, %v3327_v39 }
 0x530   : > { %3372 = vmatprep.subr.bf16.mxu0 %v3350_v34 }
 0x531   : > { %3373 = vmatpush1.bf16.msra.mxu0 %v3349_v35 }
 0x532   : > { %3374 = vmatprep.subr.bf16.mxu0 %v3348_v52 }
 0x535   : > { %3375 = vmatpush1.bf16.msra.mxu0 %v3347_v55 }
 0x536   : > { %3376 = vmatprep.subr.bf16.mxu0 %v3346_v50 }
 0x539   : > { %3377 = vmatpush1.bf16.msra.mxu0 %v3345_v18 }
 0x53a   : > { %3378 = vmatprep.subr.bf16.mxu0 %v3344_v63 }
 0x53d   : > { %3379 = vmatpush1.bf16.msra.mxu0 %v3343_v8 }
 0x540   : > { %3698 = vmatmul.mubr.msk.bf16.vlgmr.msra.gmra.mxu0 %vm3240_vm12, %v3342_v47 }
 0x600   : > { %v3398_v6 = vpop.f32.mrf.mxu0 }
 0x601   : > { %v3399_v53 = vadd.f32 %v3398_v6, %v3360_v16 }
 0x602   : > { %v3400_v56 = vpop.f32.mrf.mxu0 }
 0x603   : > { %v3408_v19 = vrot.slane %v3399_v53, %v4969_v2  ;;  %v3401_v7 = vadd.f32 %v3400_v56, %v3360_v16 }
 0x604   : > { %v3402_v11 = vpop.f32.mrf.mxu0 }
 0x605   : > { %v3413_v10 = vmul.f32 %v3408_v19, %v5123_v9  ;;  %v3412_v33 = vrot.slane %v3401_v7, %v4969_v2  ;;  %v3437_v27 = vcombine.low %v3399_v53, %v3401_v7 }
 0x606   : > { %v3403_v36 = vpop.f32.mrf.mxu0 }
 0x607   : > { %v3417_v5 = vrot.slane %v3413_v10, 3  ;;  %v3414_v3 = vmul.f32 %v3412_v33, %v5126_v54  ;;  %v3444_v32 = vrot.slane %v3437_v27, %v3443_v22 }
 0x609   : > { %v3421_v46 = vadd.f32 %v3417_v5, %v5123_v9  ;;  %v3418_v2 = vrot.slane %v3414_v3, 3  ;;  %v3451_v30 = vrot.slane %v3444_v32, %v3443_v22 }
 0x60b   : > { %3423 = vst [vmem:[%s5128_s23] sm:$0x7] %v3421_v46  ;;  %v3422_v13 = vadd.f32 %v3418_v2, %v5126_v54  ;;  %3699 = vst.msk [vmem:[%s5128_s23 + $0x11] ss:$8 sm:$0x3] %vm3455_vm11, %v3451_v30 }
 0x60d   : > { %3424 = vst [vmem:[%s5128_s23 + $0x8] sm:$0x7] %v3422_v13 }
 0x60e   : > { %3854 = shalt.err (!%p3851_p3)
}
 0x60f   : > { %s3855_s18 = scalar_lea.hbm %s5183_s8, 512  ;;  %s3859_s22 = scalar_lea.hbm %s5248_s17, 1024 }
 0x610   : > { %p3856_p4 = scmp.ne.s32.totalorder %s5183_s8, %s3855_s18  ;;  %p3860_p9 = scmp.lt.s32.totalorder %s5183_s8, %s5248_s17 }
 0x611   : > { %p3861_p10 = scmp.lt.s32.totalorder %s3859_s22, %s3855_s18 }
 0x612   : > { %p3857_p7 = pnand %p3856_p4, %p4047_p5 }
 0x613   : > { %p3862_p11 = por %p3861_p10, %p3860_p9 }
 0x614   : > { %p3858_p8 = pneg %p3857_p7 }
 0x616   : > { %p3863_p12 = pnand %p3862_p11, %p3858_p8 }
 0x618   : > { %3866 = shalt.err (!%p3863_p12)
}
 0x619   : > { %s3913_s25 = smov 256   ;;  %s3914_s10 = smov 512  }
 0x61a   : > { %s3915_s0 = smov 16  }
 0x61b   : > { %3730 = dma.vmem_to_hbm [thread:$0]  (%p4047_p5), %s5177_s1, 512, %s5183_s8, %s5191_s16, %s3913_s25, %s3914_s10, %s3915_s0  }
 0x61c PF: > { %p3736_p13 = scmp.ge.s32.totalorder %s3901_s29, 2  ;;  %s3489_s6 = sand.u32 1, %s3889_s26  }
 0x61d   : > { %s3490_s18 = scalar_lea.sflag [#allocation6], %s3489_s6 }
 0x61e   : > { %p3733_p0 = pnand %p3736_p13, %p4051_p6 }
 0x620   : > { %p3734_p1 = pneg %p3733_p0 }
 0x622   : > { %3884 = dma.done.wait (%p3734_p1), %s3490_s18, 512  }
 0x623   : > { %3886 = vsyncadd (%p3734_p1), %s3490_s18, 4294966784  ;;  %s5275_s23 = sld [smem:[#allocation8_spill]]  ;;  %p29_p2 = scmp.ge.s32.totalorder %s4034_s30, 4  }
 0x624   : > { %s5276_s26 = smov %s3893_s27  ;;  %s5277_s27 = smov %s3897_s28 }
 0x625   : > { %s5279_s29 = smov %s4034_s30  ;;  %31 = sbr.rel (!%p29_p2) target bundleno = 10 (0xa), region = 136 }
 0x629   : > { %s5278_s28 = smov %s5275_s23 }
 0x62a   :  { %3495 = vsyncpa [#allocation6], 1 }
 0x62b   :  { %3497 = vsyncpa [#allocation6 + $0x1], 1 }

</bundles_post_ra>
